<compile_context>
chip_gen: v5e
topology: v5e:2x2
jax: 0.10.0
libtpu: 0.0.40
codegen_flags: <defaults>
</compile_context>

<pallas_src>
import jax
import jax.numpy as jnp
from jax import lax
from jax.experimental import pallas as pl
from jax.experimental.pallas import tpu as pltpu

RRELU_SLOPE = (1.0 / 8.0 + 1.0 / 3.0) / 2.0
KSIZE = 5
# Layer order: cnn_1, cnn_2, cnn_3, cnn_6, cnn_7, cnn_8
LAYER_DEFS = [(4, 1), (8, 4), (12, 8), (8, 12), (4, 8), (1, 4)]  # (Cout, Cin)
PADS = (0, 0, 0, 4, 4, 4)

# Lane-padded feature widths per stage (input + 6 layer outputs), all
# multiples of 128: true widths are 256, 576, 512, 192, 512, 576, 256.
PADDED_WIDTHS = (256, 640, 512, 256, 512, 640, 256)
MAX_WIDTH = 640


# --------------------------------------------------------------------------
# Fused kernel: six (matmul + bias + rrelu) stages, activations stay on chip,
# weights streamed from HBM per layer and overlapped with compute.
# --------------------------------------------------------------------------
def _fused_ae_kernel(x_ref, b_ref, *rest):
    """Args:
      x_ref : (TN, 256) bf16 VMEM   flattened input rows (batch on sublanes)
      b_ref : (6, 640)  f32  VMEM   zero-padded per-layer biases
      rest[0:6]   : HBM refs of the 6 dense weight matrices (bf16)
      rest[6:8]   : dec_ref (TN, 256) f32, enc_ref (TN, 256) f32
      rest[8:14]  : per-layer VMEM scratch buffers (same shapes as weights)
      rest[14]    : DMA semaphore array (6,)
    """
    w_hbm = rest[0:6]
    dec_ref, enc_ref = rest[6], rest[7]
    w_buf = rest[8:14]
    sem = rest[14]

    # Issue all weight DMAs up front; W1 goes first in the queue so compute
    # begins after ~320 KiB instead of the full ~2.4 MiB weight fetch.
    copies = []
    for l in range(6):
        cp = pltpu.make_async_copy(w_hbm[l], w_buf[l], sem.at[l])
        cp.start()
        copies.append(cp)

    b_all = b_ref[...]                               # (6, 640) f32
    a = x_ref[...]                                   # (TN, 256) bf16
    act = None
    for l in range(6):
        copies[l].wait()                             # later layers keep streaming
        out_w = PADDED_WIDTHS[l + 1]
        acc = jnp.dot(a, w_buf[l][...], preferred_element_type=jnp.float32)
        acc = acc + b_all[l:l + 1, :out_w]           # f32 bias broadcast
        act = jnp.maximum(acc, acc * RRELU_SLOPE)    # eval-mode rrelu (leaky)
        if l == 2:
            enc_ref[...] = act                       # encoder output (lane-dense)
        if l < 5:
            a = act.astype(jnp.bfloat16)             # bf16 operand for next MXU stage
    dec_ref[...] = act                               # decoder output (f32)


# --------------------------------------------------------------------------
# One-time weight preprocessing (hoisted out of the forward path).
# Conv2d(5x5, stride 1, padding p) on an (H, W) map == dense matrix
#   D[(ci,yi,xi), (co,yo,xo)] = w[co,ci, yi-yo+p, xi-xo+p]   (0 outside 0..4)
# then zero-padded to lane-dense (multiple-of-128) feature widths.
# --------------------------------------------------------------------------
def prepare_params(params, height=16, width=16):
    weights = []
    biases = jnp.zeros((6, MAX_WIDTH), jnp.float32)
    h, w = height, width
    for li, ((wt, b), pad) in enumerate(zip(params, PADS)):
        cout, cin, kh, kw = wt.shape
        ho = h + 2 * pad - kh + 1
        wo = w + 2 * pad - kw + 1

        ky = jnp.arange(kh)[:, None, None]
        yi = jnp.arange(h)[None, :, None]
        yo = jnp.arange(ho)[None, None, :]
        sy = (yi == yo + ky - pad).astype(jnp.float32)      # (kh, H, Ho)

        kx = jnp.arange(kw)[:, None, None]
        xi = jnp.arange(w)[None, :, None]
        xo = jnp.arange(wo)[None, None, :]
        sx = (xi == xo + kx - pad).astype(jnp.float32)      # (kw, W, Wo)

        dense = jnp.einsum("oikl,kab,lcd->iacobd", wt, sy, sx)
        dense = dense.reshape(cin * h * w, cout * ho * wo)  # (in_true, out_true)

        in_pad, out_pad = PADDED_WIDTHS[li], PADDED_WIDTHS[li + 1]
        dense_p = jnp.zeros((in_pad, out_pad), jnp.float32)
        dense_p = dense_p.at[: dense.shape[0], : dense.shape[1]].set(dense)
        weights.append(dense_p.astype(jnp.bfloat16))

        brow = jnp.repeat(b, ho * wo)                       # (out_true,)
        biases = biases.at[li, : brow.shape[0]].set(brow)

        h, w = ho, wo
    return weights, biases


# --------------------------------------------------------------------------
# Forward pass wrapper (NCHW in / NCHW out, like PyTorch).
# --------------------------------------------------------------------------
@jax.jit
def autoencoder_forward(x_nchw, weights, biases):
    n, _, h_in, w_in = x_nchw.shape
    x2d = x_nchw.reshape(n, -1).astype(jnp.bfloat16)        # (N, C*H*W) = (N, 256)
    f_in = x2d.shape[1]

    f_dec = PADDED_WIDTHS[6]                                # 256 (= 1*16*16, exact)
    f_enc_pad = PADDED_WIDTHS[3]                            # 256 (true 192)
    h_enc, w_enc = h_in - 12, w_in - 12                     # three valid 5x5 convs
    c_enc = LAYER_DEFS[2][0]                                # 12
    f_enc = c_enc * h_enc * w_enc                           # 192

    block_n = min(n, 128)                                   # spans both v7x TCs once n > 128
    grid = (pl.cdiv(n, block_n),)

    in_specs = [
        pl.BlockSpec((block_n, f_in), lambda i: (i, 0)),    # input rows, tiled on batch
        pl.BlockSpec(biases.shape, lambda i: (0, 0)),       # concatenated f32 biases
    ]
    in_specs += [pl.BlockSpec(memory_space=pl.ANY)] * 6     # weights stay in HBM

    scratch_shapes = [pltpu.VMEM(w.shape, jnp.bfloat16) for w in weights]
    scratch_shapes.append(pltpu.SemaphoreType.DMA((6,)))

    flops = 2 * n * sum(int(w.shape[0]) * int(w.shape[1]) for w in weights)
    bytes_accessed = (
        sum(int(w.size) * 2 for w in weights) + int(biases.size) * 4
        + int(x2d.size) * 2 + n * (f_enc_pad + f_dec) * 4)

    dec2d, enc2d = pl.pallas_call(
        _fused_ae_kernel,
        out_shape=(jax.ShapeDtypeStruct((n, f_dec), jnp.float32),
                   jax.ShapeDtypeStruct((n, f_enc_pad), jnp.float32)),
        grid=grid,
        in_specs=in_specs,
        out_specs=(pl.BlockSpec((block_n, f_dec), lambda i: (i, 0)),
                   pl.BlockSpec((block_n, f_enc_pad), lambda i: (i, 0))),
        scratch_shapes=scratch_shapes,
        compiler_params=pltpu.CompilerParams(
            dimension_semantics=("parallel",),
            vmem_limit_bytes=32 * 1024 * 1024),
        cost_estimate=pl.CostEstimate(
            flops=flops, transcendentals=0, bytes_accessed=bytes_accessed),
    )(x2d, biases, *weights)

    decoded = dec2d.reshape(n, 1, h_in, w_in)
    encoded = enc2d[:, :f_enc].reshape(n, c_enc, h_enc, w_enc)  # drop zero lane-pad
    return decoded, encoded


# --------------------------------------------------------------------------
# Deterministic PyTorch-like init and a pure-JAX reference for validation.
# --------------------------------------------------------------------------
def init_params(key):
    """U(-1/sqrt(fan_in), 1/sqrt(fan_in)) per layer, like nn.Conv2d."""
    params = []
    for i, (cout, cin) in enumerate(LAYER_DEFS):
        kw_key, kb_key = jax.random.split(jax.random.fold_in(key, i))
        fan_in = cin * KSIZE * KSIZE
        bound = 1.0 / jnp.sqrt(float(fan_in))
        w = jax.random.uniform(kw_key, (cout, cin, KSIZE, KSIZE),
                               jnp.float32, -bound, bound)
        b = jax.random.uniform(kb_key, (cout,), jnp.float32, -bound, bound)
        params.append((w, b))
    return params


def reference_forward(x, params):
    """f32 XLA reference matching the PyTorch module exactly."""
    h = x
    outs = []
    for (w, b), pad in zip(params, PADS):
        h = lax.conv_general_dilated(
            h, w, window_strides=(1, 1), padding=[(pad, pad), (pad, pad)],
            dimension_numbers=("NCHW", "OIHW", "NCHW"))
        h = h + b[None, :, None, None]
        h = jnp.where(h >= 0.0, h, h * RRELU_SLOPE)
        outs.append(h)
    return outs[5], outs[2]


if __name__ == "__main__":
    key = jax.random.PRNGKey(0)
    pkey, xkey = jax.random.split(key)

    params = init_params(pkey)
    weights, biases = prepare_params(params, height=16, width=16)

    # Batch=2, 1 channel, 16x16 spatial (>= 13 required by the encoder).
    x = jax.random.normal(xkey, (2, 1, 16, 16), dtype=jnp.float32)

    decoded, encoded = autoencoder_forward(x, weights, biases)
    decoded, encoded = jax.block_until_ready((decoded, encoded))

    assert decoded.shape == (2, 1, 16, 16), decoded.shape
    assert encoded.shape == (2, 12, 4, 4), encoded.shape

    # Numerical check vs. f32 XLA conv reference (kernel matmuls run in bf16).
    dec_ref, enc_ref = reference_forward(x, params)
    assert jnp.allclose(decoded, dec_ref, atol=2e-2, rtol=2e-2), "decoded mismatch"
    assert jnp.allclose(encoded, enc_ref, atol=2e-2, rtol=2e-2), "encoded mismatch"

    print("KERNEL_OK")
</pallas_src>

<mosaic_0001>
module attributes {stable_mosaic.version = 11 : i64} {
  func.func @_fused_ae_kernel(%arg0: i32, %arg1: memref<2x256xbf16, #tpu.memory_space<vmem>>, %arg2: memref<6x640xf32, #tpu.memory_space<vmem>>, %arg3: memref<256x640xbf16, #tpu.memory_space<any>>, %arg4: memref<640x512xbf16, #tpu.memory_space<any>>, %arg5: memref<512x256xbf16, #tpu.memory_space<any>>, %arg6: memref<256x512xbf16, #tpu.memory_space<any>>, %arg7: memref<512x640xbf16, #tpu.memory_space<any>>, %arg8: memref<640x256xbf16, #tpu.memory_space<any>>, %arg9: memref<2x256xf32, #tpu.memory_space<vmem>>, %arg10: memref<2x256xf32, #tpu.memory_space<vmem>>, %arg11: memref<256x640xbf16, #tpu.memory_space<vmem>>, %arg12: memref<640x512xbf16, #tpu.memory_space<vmem>>, %arg13: memref<512x256xbf16, #tpu.memory_space<vmem>>, %arg14: memref<256x512xbf16, #tpu.memory_space<vmem>>, %arg15: memref<512x640xbf16, #tpu.memory_space<vmem>>, %arg16: memref<640x256xbf16, #tpu.memory_space<vmem>>, %arg17: memref<6x!tpu.dma_semaphore, #tpu.memory_space<semaphore_mem>>) attributes {dimension_semantics = [#tpu.dimension_semantics<parallel>], iteration_bounds = array<i64: 1>, scalar_prefetch = 0 : i64, scratch_operands = 7 : i64, tpu.core_type = #tpu.core_type<tc>, window_params = [{transform_indices = @transform_0, window_bounds = array<i64: 2, 256>}, {pipeline_mode = #tpu.pipeline_mode<synchronous>, transform_indices = @transform_1, window_bounds = array<i64: 6, 640>}, {}, {}, {}, {}, {}, {}, {transform_indices = @transform_8, window_bounds = array<i64: 2, 256>}, {transform_indices = @transform_9, window_bounds = array<i64: 2, 256>}]} {
    %c0_i32 = arith.constant 0 : i32
    %0 = tpu.memref_slice %arg17[%c0_i32] : memref<6x!tpu.dma_semaphore, #tpu.memory_space<semaphore_mem>> -> memref<1x!tpu.dma_semaphore, #tpu.memory_space<semaphore_mem>>
    %1 = tpu.memref_squeeze %0 : memref<1x!tpu.dma_semaphore, #tpu.memory_space<semaphore_mem>> -> memref<!tpu.dma_semaphore, #tpu.memory_space<semaphore_mem>>
    tpu.enqueue_dma source(%arg3 : memref<256x640xbf16, #tpu.memory_space<any>>) target(%arg11 : memref<256x640xbf16, #tpu.memory_space<vmem>>) target_semaphore(%1 : memref<!tpu.dma_semaphore, #tpu.memory_space<semaphore_mem>>)
    %c1_i32 = arith.constant 1 : i32
    %2 = tpu.memref_slice %arg17[%c1_i32] : memref<6x!tpu.dma_semaphore, #tpu.memory_space<semaphore_mem>> -> memref<1x!tpu.dma_semaphore, #tpu.memory_space<semaphore_mem>>
    %3 = tpu.memref_squeeze %2 : memref<1x!tpu.dma_semaphore, #tpu.memory_space<semaphore_mem>> -> memref<!tpu.dma_semaphore, #tpu.memory_space<semaphore_mem>>
    tpu.enqueue_dma source(%arg4 : memref<640x512xbf16, #tpu.memory_space<any>>) target(%arg12 : memref<640x512xbf16, #tpu.memory_space<vmem>>) target_semaphore(%3 : memref<!tpu.dma_semaphore, #tpu.memory_space<semaphore_mem>>)
    %c2_i32 = arith.constant 2 : i32
    %4 = tpu.memref_slice %arg17[%c2_i32] : memref<6x!tpu.dma_semaphore, #tpu.memory_space<semaphore_mem>> -> memref<1x!tpu.dma_semaphore, #tpu.memory_space<semaphore_mem>>
    %5 = tpu.memref_squeeze %4 : memref<1x!tpu.dma_semaphore, #tpu.memory_space<semaphore_mem>> -> memref<!tpu.dma_semaphore, #tpu.memory_space<semaphore_mem>>
    tpu.enqueue_dma source(%arg5 : memref<512x256xbf16, #tpu.memory_space<any>>) target(%arg13 : memref<512x256xbf16, #tpu.memory_space<vmem>>) target_semaphore(%5 : memref<!tpu.dma_semaphore, #tpu.memory_space<semaphore_mem>>)
    %c3_i32 = arith.constant 3 : i32
    %6 = tpu.memref_slice %arg17[%c3_i32] : memref<6x!tpu.dma_semaphore, #tpu.memory_space<semaphore_mem>> -> memref<1x!tpu.dma_semaphore, #tpu.memory_space<semaphore_mem>>
    %7 = tpu.memref_squeeze %6 : memref<1x!tpu.dma_semaphore, #tpu.memory_space<semaphore_mem>> -> memref<!tpu.dma_semaphore, #tpu.memory_space<semaphore_mem>>
    tpu.enqueue_dma source(%arg6 : memref<256x512xbf16, #tpu.memory_space<any>>) target(%arg14 : memref<256x512xbf16, #tpu.memory_space<vmem>>) target_semaphore(%7 : memref<!tpu.dma_semaphore, #tpu.memory_space<semaphore_mem>>)
    %c4_i32 = arith.constant 4 : i32
    %8 = tpu.memref_slice %arg17[%c4_i32] : memref<6x!tpu.dma_semaphore, #tpu.memory_space<semaphore_mem>> -> memref<1x!tpu.dma_semaphore, #tpu.memory_space<semaphore_mem>>
    %9 = tpu.memref_squeeze %8 : memref<1x!tpu.dma_semaphore, #tpu.memory_space<semaphore_mem>> -> memref<!tpu.dma_semaphore, #tpu.memory_space<semaphore_mem>>
    tpu.enqueue_dma source(%arg7 : memref<512x640xbf16, #tpu.memory_space<any>>) target(%arg15 : memref<512x640xbf16, #tpu.memory_space<vmem>>) target_semaphore(%9 : memref<!tpu.dma_semaphore, #tpu.memory_space<semaphore_mem>>)
    %c5_i32 = arith.constant 5 : i32
    %10 = tpu.memref_slice %arg17[%c5_i32] : memref<6x!tpu.dma_semaphore, #tpu.memory_space<semaphore_mem>> -> memref<1x!tpu.dma_semaphore, #tpu.memory_space<semaphore_mem>>
    %11 = tpu.memref_squeeze %10 : memref<1x!tpu.dma_semaphore, #tpu.memory_space<semaphore_mem>> -> memref<!tpu.dma_semaphore, #tpu.memory_space<semaphore_mem>>
    tpu.enqueue_dma source(%arg8 : memref<640x256xbf16, #tpu.memory_space<any>>) target(%arg16 : memref<640x256xbf16, #tpu.memory_space<vmem>>) target_semaphore(%11 : memref<!tpu.dma_semaphore, #tpu.memory_space<semaphore_mem>>)
    %c0 = arith.constant 0 : index
    %c0_0 = arith.constant 0 : index
    %12 = vector.load %arg2[%c0, %c0_0] : memref<6x640xf32, #tpu.memory_space<vmem>>, vector<6x640xf32>
    %c0_1 = arith.constant 0 : index
    %c0_2 = arith.constant 0 : index
    %13 = vector.load %arg1[%c0_1, %c0_2] : memref<2x256xbf16, #tpu.memory_space<vmem>>, vector<2x256xbf16>
    %c0_i32_3 = arith.constant 0 : i32
    %14 = tpu.memref_slice %arg17[%c0_i32_3] : memref<6x!tpu.dma_semaphore, #tpu.memory_space<semaphore_mem>> -> memref<1x!tpu.dma_semaphore, #tpu.memory_space<semaphore_mem>>
    %15 = tpu.memref_squeeze %14 : memref<1x!tpu.dma_semaphore, #tpu.memory_space<semaphore_mem>> -> memref<!tpu.dma_semaphore, #tpu.memory_space<semaphore_mem>>
    tpu.wait_dma2 semaphore(%15 : memref<!tpu.dma_semaphore, #tpu.memory_space<semaphore_mem>>) src(%arg3 : memref<256x640xbf16, #tpu.memory_space<any>>) dst(%arg11 : memref<256x640xbf16, #tpu.memory_space<vmem>>)
    %c0_4 = arith.constant 0 : index
    %c0_5 = arith.constant 0 : index
    %16 = vector.load %arg11[%c0_4, %c0_5] : memref<256x640xbf16, #tpu.memory_space<vmem>>, vector<256x640xbf16>
    %cst = arith.constant dense<0.000000e+00> : vector<2x640xf32>
    %17 = tpu.matmul %13, %16, %cst {dimension_numbers = #tpu.dot_dimension_numbers<[1], [0], [0], [1], [0, 0, 1, 1], [], []>} : vector<2x256xbf16>, vector<256x640xbf16>, vector<2x640xf32> -> vector<2x640xf32>
    %18 = vector.extract_strided_slice %12 {offsets = [0, 0], sizes = [1, 640], strides = [1, 1]} : vector<6x640xf32> to vector<1x640xf32>
    %19 = vector.broadcast %18 : vector<1x640xf32> to vector<2x640xf32>
    %20 = arith.addf %17, %19 : vector<2x640xf32>
    %cst_6 = arith.constant 0.229166672 : f32
    %21 = vector.broadcast %cst_6 : f32 to vector<2x640xf32>
    %22 = arith.mulf %20, %21 : vector<2x640xf32>
    %23 = arith.maximumf %20, %22 : vector<2x640xf32>
    %24 = arith.truncf %23 : vector<2x640xf32> to vector<2x640xbf16>
    %c1_i32_7 = arith.constant 1 : i32
    %25 = tpu.memref_slice %arg17[%c1_i32_7] : memref<6x!tpu.dma_semaphore, #tpu.memory_space<semaphore_mem>> -> memref<1x!tpu.dma_semaphore, #tpu.memory_space<semaphore_mem>>
    %26 = tpu.memref_squeeze %25 : memref<1x!tpu.dma_semaphore, #tpu.memory_space<semaphore_mem>> -> memref<!tpu.dma_semaphore, #tpu.memory_space<semaphore_mem>>
    tpu.wait_dma2 semaphore(%26 : memref<!tpu.dma_semaphore, #tpu.memory_space<semaphore_mem>>) src(%arg4 : memref<640x512xbf16, #tpu.memory_space<any>>) dst(%arg12 : memref<640x512xbf16, #tpu.memory_space<vmem>>)
    %c0_8 = arith.constant 0 : index
    %c0_9 = arith.constant 0 : index
    %27 = vector.load %arg12[%c0_8, %c0_9] : memref<640x512xbf16, #tpu.memory_space<vmem>>, vector<640x512xbf16>
    %cst_10 = arith.constant dense<0.000000e+00> : vector<2x512xf32>
    %28 = tpu.matmul %24, %27, %cst_10 {dimension_numbers = #tpu.dot_dimension_numbers<[1], [0], [0], [1], [0, 0, 1, 1], [], []>} : vector<2x640xbf16>, vector<640x512xbf16>, vector<2x512xf32> -> vector<2x512xf32>
    %29 = vector.extract_strided_slice %12 {offsets = [1, 0], sizes = [1, 512], strides = [1, 1]} : vector<6x640xf32> to vector<1x512xf32>
    %30 = vector.broadcast %29 : vector<1x512xf32> to vector<2x512xf32>
    %31 = arith.addf %28, %30 : vector<2x512xf32>
    %cst_11 = arith.constant 0.229166672 : f32
    %32 = vector.broadcast %cst_11 : f32 to vector<2x512xf32>
    %33 = arith.mulf %31, %32 : vector<2x512xf32>
    %34 = arith.maximumf %31, %33 : vector<2x512xf32>
    %35 = arith.truncf %34 : vector<2x512xf32> to vector<2x512xbf16>
    %c2_i32_12 = arith.constant 2 : i32
    %36 = tpu.memref_slice %arg17[%c2_i32_12] : memref<6x!tpu.dma_semaphore, #tpu.memory_space<semaphore_mem>> -> memref<1x!tpu.dma_semaphore, #tpu.memory_space<semaphore_mem>>
    %37 = tpu.memref_squeeze %36 : memref<1x!tpu.dma_semaphore, #tpu.memory_space<semaphore_mem>> -> memref<!tpu.dma_semaphore, #tpu.memory_space<semaphore_mem>>
    tpu.wait_dma2 semaphore(%37 : memref<!tpu.dma_semaphore, #tpu.memory_space<semaphore_mem>>) src(%arg5 : memref<512x256xbf16, #tpu.memory_space<any>>) dst(%arg13 : memref<512x256xbf16, #tpu.memory_space<vmem>>)
    %c0_13 = arith.constant 0 : index
    %c0_14 = arith.constant 0 : index
    %38 = vector.load %arg13[%c0_13, %c0_14] : memref<512x256xbf16, #tpu.memory_space<vmem>>, vector<512x256xbf16>
    %cst_15 = arith.constant dense<0.000000e+00> : vector<2x256xf32>
    %39 = tpu.matmul %35, %38, %cst_15 {dimension_numbers = #tpu.dot_dimension_numbers<[1], [0], [0], [1], [0, 0, 1, 1], [], []>} : vector<2x512xbf16>, vector<512x256xbf16>, vector<2x256xf32> -> vector<2x256xf32>
    %40 = vector.extract_strided_slice %12 {offsets = [2, 0], sizes = [1, 256], strides = [1, 1]} : vector<6x640xf32> to vector<1x256xf32>
    %41 = vector.broadcast %40 : vector<1x256xf32> to vector<2x256xf32>
    %42 = arith.addf %39, %41 : vector<2x256xf32>
    %cst_16 = arith.constant 0.229166672 : f32
    %43 = vector.broadcast %cst_16 : f32 to vector<2x256xf32>
    %44 = arith.mulf %42, %43 : vector<2x256xf32>
    %45 = arith.maximumf %42, %44 : vector<2x256xf32>
    %c0_17 = arith.constant 0 : index
    %c0_18 = arith.constant 0 : index
    %46 = vector.load %arg10[%c0_17, %c0_18] : memref<2x256xf32, #tpu.memory_space<vmem>>, vector<2x256xf32>
    tpu.vector_store %arg10[%c0_17, %c0_18], %45 {strides = array<i32>} : memref<2x256xf32, #tpu.memory_space<vmem>>, vector<2x256xf32>,
    %47 = arith.truncf %45 : vector<2x256xf32> to vector<2x256xbf16>
    %c3_i32_19 = arith.constant 3 : i32
    %48 = tpu.memref_slice %arg17[%c3_i32_19] : memref<6x!tpu.dma_semaphore, #tpu.memory_space<semaphore_mem>> -> memref<1x!tpu.dma_semaphore, #tpu.memory_space<semaphore_mem>>
    %49 = tpu.memref_squeeze %48 : memref<1x!tpu.dma_semaphore, #tpu.memory_space<semaphore_mem>> -> memref<!tpu.dma_semaphore, #tpu.memory_space<semaphore_mem>>
    tpu.wait_dma2 semaphore(%49 : memref<!tpu.dma_semaphore, #tpu.memory_space<semaphore_mem>>) src(%arg6 : memref<256x512xbf16, #tpu.memory_space<any>>) dst(%arg14 : memref<256x512xbf16, #tpu.memory_space<vmem>>)
    %c0_20 = arith.constant 0 : index
    %c0_21 = arith.constant 0 : index
    %50 = vector.load %arg14[%c0_20, %c0_21] : memref<256x512xbf16, #tpu.memory_space<vmem>>, vector<256x512xbf16>
    %cst_22 = arith.constant dense<0.000000e+00> : vector<2x512xf32>
    %51 = tpu.matmul %47, %50, %cst_22 {dimension_numbers = #tpu.dot_dimension_numbers<[1], [0], [0], [1], [0, 0, 1, 1], [], []>} : vector<2x256xbf16>, vector<256x512xbf16>, vector<2x512xf32> -> vector<2x512xf32>
    %52 = vector.extract_strided_slice %12 {offsets = [3, 0], sizes = [1, 512], strides = [1, 1]} : vector<6x640xf32> to vector<1x512xf32>
    %53 = vector.broadcast %52 : vector<1x512xf32> to vector<2x512xf32>
    %54 = arith.addf %51, %53 : vector<2x512xf32>
    %cst_23 = arith.constant 0.229166672 : f32
    %55 = vector.broadcast %cst_23 : f32 to vector<2x512xf32>
    %56 = arith.mulf %54, %55 : vector<2x512xf32>
    %57 = arith.maximumf %54, %56 : vector<2x512xf32>
    %58 = arith.truncf %57 : vector<2x512xf32> to vector<2x512xbf16>
    %c4_i32_24 = arith.constant 4 : i32
    %59 = tpu.memref_slice %arg17[%c4_i32_24] : memref<6x!tpu.dma_semaphore, #tpu.memory_space<semaphore_mem>> -> memref<1x!tpu.dma_semaphore, #tpu.memory_space<semaphore_mem>>
    %60 = tpu.memref_squeeze %59 : memref<1x!tpu.dma_semaphore, #tpu.memory_space<semaphore_mem>> -> memref<!tpu.dma_semaphore, #tpu.memory_space<semaphore_mem>>
    tpu.wait_dma2 semaphore(%60 : memref<!tpu.dma_semaphore, #tpu.memory_space<semaphore_mem>>) src(%arg7 : memref<512x640xbf16, #tpu.memory_space<any>>) dst(%arg15 : memref<512x640xbf16, #tpu.memory_space<vmem>>)
    %c0_25 = arith.constant 0 : index
    %c0_26 = arith.constant 0 : index
    %61 = vector.load %arg15[%c0_25, %c0_26] : memref<512x640xbf16, #tpu.memory_space<vmem>>, vector<512x640xbf16>
    %cst_27 = arith.constant dense<0.000000e+00> : vector<2x640xf32>
    %62 = tpu.matmul %58, %61, %cst_27 {dimension_numbers = #tpu.dot_dimension_numbers<[1], [0], [0], [1], [0, 0, 1, 1], [], []>} : vector<2x512xbf16>, vector<512x640xbf16>, vector<2x640xf32> -> vector<2x640xf32>
    %63 = vector.extract_strided_slice %12 {offsets = [4, 0], sizes = [1, 640], strides = [1, 1]} : vector<6x640xf32> to vector<1x640xf32>
    %64 = vector.broadcast %63 : vector<1x640xf32> to vector<2x640xf32>
    %65 = arith.addf %62, %64 : vector<2x640xf32>
    %cst_28 = arith.constant 0.229166672 : f32
    %66 = vector.broadcast %cst_28 : f32 to vector<2x640xf32>
    %67 = arith.mulf %65, %66 : vector<2x640xf32>
    %68 = arith.maximumf %65, %67 : vector<2x640xf32>
    %69 = arith.truncf %68 : vector<2x640xf32> to vector<2x640xbf16>
    %c5_i32_29 = arith.constant 5 : i32
    %70 = tpu.memref_slice %arg17[%c5_i32_29] : memref<6x!tpu.dma_semaphore, #tpu.memory_space<semaphore_mem>> -> memref<1x!tpu.dma_semaphore, #tpu.memory_space<semaphore_mem>>
    %71 = tpu.memref_squeeze %70 : memref<1x!tpu.dma_semaphore, #tpu.memory_space<semaphore_mem>> -> memref<!tpu.dma_semaphore, #tpu.memory_space<semaphore_mem>>
    tpu.wait_dma2 semaphore(%71 : memref<!tpu.dma_semaphore, #tpu.memory_space<semaphore_mem>>) src(%arg8 : memref<640x256xbf16, #tpu.memory_space<any>>) dst(%arg16 : memref<640x256xbf16, #tpu.memory_space<vmem>>)
    %c0_30 = arith.constant 0 : index
    %c0_31 = arith.constant 0 : index
    %72 = vector.load %arg16[%c0_30, %c0_31] : memref<640x256xbf16, #tpu.memory_space<vmem>>, vector<640x256xbf16>
    %cst_32 = arith.constant dense<0.000000e+00> : vector<2x256xf32>
    %73 = tpu.matmul %69, %72, %cst_32 {dimension_numbers = #tpu.dot_dimension_numbers<[1], [0], [0], [1], [0, 0, 1, 1], [], []>} : vector<2x640xbf16>, vector<640x256xbf16>, vector<2x256xf32> -> vector<2x256xf32>
    %74 = vector.extract_strided_slice %12 {offsets = [5, 0], sizes = [1, 256], strides = [1, 1]} : vector<6x640xf32> to vector<1x256xf32>
    %75 = vector.broadcast %74 : vector<1x256xf32> to vector<2x256xf32>
    %76 = arith.addf %73, %75 : vector<2x256xf32>
    %cst_33 = arith.constant 0.229166672 : f32
    %77 = vector.broadcast %cst_33 : f32 to vector<2x256xf32>
    %78 = arith.mulf %76, %77 : vector<2x256xf32>
    %79 = arith.maximumf %76, %78 : vector<2x256xf32>
    %c0_34 = arith.constant 0 : index
    %c0_35 = arith.constant 0 : index
    %80 = vector.load %arg9[%c0_34, %c0_35] : memref<2x256xf32, #tpu.memory_space<vmem>>, vector<2x256xf32>
    tpu.vector_store %arg9[%c0_34, %c0_35], %79 {strides = array<i32>} : memref<2x256xf32, #tpu.memory_space<vmem>>, vector<2x256xf32>,
    return
  }
  func.func @transform_0(%arg0: i32) -> (i32, i32) {
    %c0_i32 = arith.constant 0 : i32
    %c0_i32_0 = arith.constant 0 : i32
    return %arg0, %c0_i32 : i32, i32
  }
  func.func @transform_1(%arg0: i32) -> (i32, i32) {
    %c0_i32 = arith.constant 0 : i32
    %c0_i32_0 = arith.constant 0 : i32
    %c0_i32_1 = arith.constant 0 : i32
    return %c0_i32, %c0_i32_0 : i32, i32
  }
  func.func @transform_8(%arg0: i32) -> (i32, i32) {
    %c0_i32 = arith.constant 0 : i32
    %c0_i32_0 = arith.constant 0 : i32
    return %arg0, %c0_i32 : i32, i32
  }
  func.func @transform_9(%arg0: i32) -> (i32, i32) {
    %c0_i32 = arith.constant 0 : i32
    %c0_i32_0 = arith.constant 0 : i32
    return %arg0, %c0_i32 : i32, i32
  }
}

</mosaic_0001>

<bundles_post_ra>
// kernel: autoencoder_forward.1
= control target key start
LH: loop header
LB: loop body
LE: loop exit
PB: predicated region body
PF: predicated region fallthrough
CT: control target
= control target key end

     0   :  { %s8223_s12 = smov [#allocation2]   ;;  %s8224_s28 = smov [#allocation3]   ;;  %s8475_s0 = inlined_call_operand.vmem [shape: bf16[2,256], index: 0, kind: input, shape index: {}]   ;;  %s8476_s1 = inlined_call_operand.vmem [shape: f32[6,640], index: 1, kind: input, shape index: {}]   ;;  %s8477_s2 = inlined_call_operand.hbm [shape: bf16[256,640], index: 2, kind: input, shape index: {}]   ;;  %s8478_s8 = inlined_call_operand.vmem [shape: f32[2,256], index: 8, kind: output, shape index: {0}]   ;;  %s8479_s9 = inlined_call_operand.vmem [shape: f32[2,256], index: 9, kind: output, shape index: {1}]   ;;  %s8480_s3 = inlined_call_operand.hbm [shape: bf16[640,512], index: 3, kind: input, shape index: {}]   ;;  %s8481_s4 = inlined_call_operand.hbm [shape: bf16[512,256], index: 4, kind: input, shape index: {}]   ;;  %s8482_s5 = inlined_call_operand.hbm [shape: bf16[256,512], index: 5, kind: input, shape index: {}]   ;;  %s8483_s6 = inlined_call_operand.hbm [shape: bf16[512,640], index: 6, kind: input, shape index: {}]   ;;  %s8484_s7 = inlined_call_operand.hbm [shape: bf16[640,256], index: 7, kind: input, shape index: {}]  }
   0x1   :  { %s26_s11 = sshll.u32 %s8477_s2, 4  ;;  %s28_s13 = sshll.u32 %s8223_s12, 4  ;;  %v8285_v0 = vld [vmem:[%s8476_s1] sm:$0x3f]  ;;  %v8290_v1 = vld [vmem:[%s8476_s1 + $0x8] sm:$0x3f]  ;;  %s27_s11 = int_to_ptr.hbm [resolvable:$true] %s26_s11  ;;  %s29_s13 = int_to_ptr.vmem [resolvable:$true] %s28_s13 }
   0x2   :  { %v8295_v2 = vld [vmem:[%s8476_s1 + $0x10] sm:$0x3f]  ;;  %v8300_v3 = vld [vmem:[%s8476_s1 + $0x18] sm:$0x3f]  ;;  %v8305_v4 = vld [vmem:[%s8476_s1 + $0x20] sm:$0x3f] }
   0x3   :  { %31 = dma.hbm_to_vmem [thread:$0]  %s27_s11, 10240, %s29_s13, [#allocation8]  ;;  %v107_v5 = vld [vmem:[%s8475_s0] sm:$0x3] }
   0x4   :  { %s40_s27 = sshll.u32 %s8480_s3, 4  ;;  %s42_s29 = sshll.u32 %s8224_s28, 4  ;;  %s41_s27 = int_to_ptr.hbm [resolvable:$true] %s40_s27  ;;  %s43_s29 = int_to_ptr.vmem [resolvable:$true] %s42_s29 }
   0x5   :  { %45 = dma.hbm_to_vmem [thread:$0]  %s41_s27, 20480, %s43_s29, [#allocation8 + $0x1] }
   0x6   :  { %s54_s12 = sshll.u32 %s8481_s4, 4  ;;  %s8225_s1 = smov [#allocation4]   ;;  %s55_s12 = int_to_ptr.hbm [resolvable:$true] %s54_s12 }
   0x7   :  { %s56_s11 = sshll.u32 %s8225_s1, 4  ;;  %s68_s0 = sshll.u32 %s8482_s5, 4  ;;  %s57_s11 = int_to_ptr.vmem [resolvable:$true] %s56_s11  ;;  %s69_s0 = int_to_ptr.hbm [resolvable:$true] %s68_s0 }
   0x8   :  { %59 = dma.hbm_to_vmem [thread:$0]  %s55_s12, 8192, %s57_s11, [#allocation8 + $0x2] }
   0x9   :  { %s8226_s3 = smov [#allocation5]   ;;  %s82_s18 = sshll.u32 %s8483_s6, 4  ;;  %s83_s18 = int_to_ptr.hbm [resolvable:$true] %s82_s18 }
   0xa   :  { %s70_s15 = sshll.u32 %s8226_s3, 4  ;;  %s96_s2 = sshll.u32 %s8484_s7, 4  ;;  %s71_s15 = int_to_ptr.vmem [resolvable:$true] %s70_s15  ;;  %s97_s2 = int_to_ptr.hbm [resolvable:$true] %s96_s2 }
   0xb   :  { %73 = dma.hbm_to_vmem [thread:$0]  %s69_s0, 8192, %s71_s15, [#allocation8 + $0x3] }
   0xc   :  { %s8227_s20 = smov [#allocation6]   ;;  %s8228_s5 = smov [#allocation7]  }
   0xd   :  { %s84_s21 = sshll.u32 %s8227_s20, 4  ;;  %s98_s22 = sshll.u32 %s8228_s5, 4  ;;  %s85_s21 = int_to_ptr.vmem [resolvable:$true] %s84_s21  ;;  %s99_s22 = int_to_ptr.vmem [resolvable:$true] %s98_s22 }
   0xe   :  { %87 = dma.hbm_to_vmem [thread:$0]  %s83_s18, 20480, %s85_s21, [#allocation8 + $0x4] }
   0xf   :  { %101 = dma.hbm_to_vmem [thread:$0]  %s97_s2, 10240, %s99_s22, [#allocation8 + $0x5] }
  0x10   :  { %8211 = dma.done.wait [#allocation8], 10240 }
  0x11   :  { %8212 = vsyncadd [#allocation8], 4294957056  ;;  %214 = vst [vmem:[#allocation1] ss:$9 sm:$0xff] %v107_v5  ;;  %v5157_v6 = vld [vmem:[#allocation2 + $0x118] sm:$0xf] }
  0x12   :  { %v7490_v7 = vld [vmem:[#allocation2 + $0x128] sm:$0xf0]  ;;  %v5317_v8 = vld [vmem:[#allocation2 + $0x258] sm:$0xf]  ;;  %v5137_v11 = vld [vmem:[#allocation2 + $0xf0] sm:$0xf] }
  0x13   :  { %v5158_v9 = vor.u32 %v7490_v7, %v5157_v6  ;;  %v7530_v10 = vld [vmem:[#allocation2 + $0x268] sm:$0xf0]  ;;  %v7485_v12 = vld [vmem:[#allocation2 + $0x100] sm:$0xf0]  ;;  %v5297_v14 = vld [vmem:[#allocation2 + $0x230] sm:$0xf] }
  0x14   :  { %v5318_v13 = vor.u32 %v7530_v10, %v5317_v8  ;;  %v7525_v15 = vld [vmem:[#allocation2 + $0x240] sm:$0xf0]  ;;  %v5138_v16 = vor.u32 %v7485_v12, %v5137_v11  ;;  %v5117_v18 = vld [vmem:[#allocation2 + $0xc8] sm:$0xf]  ;;  %v7480_v19 = vld [vmem:[#allocation2 + $0xd8] sm:$0xf0] }
  0x15   :  { %635 = vmatpush.bf16.msra.mxu0 %v5158_v9  ;;  %v5298_v17 = vor.u32 %v7525_v15, %v5297_v14  ;;  %v5277_v20 = vld [vmem:[#allocation2 + $0x208] sm:$0xf]  ;;  %v7520_v21 = vld [vmem:[#allocation2 + $0x218] sm:$0xf0]  ;;  %v5159_v23 = vld [vmem:[#allocation2 + $0x12c] sm:$0xf0]  ;;  %v5118_v25 = vor.u32 %v7480_v19, %v5117_v18 }
  0x16   :  { %648 = vmatpush.bf16.msra.mxu1 %v5318_v13  ;;  %v7488_v22 = vld [vmem:[#allocation2 + $0x11c] sm:$0xf]  ;;  %v5097_v26 = vld [vmem:[#allocation2 + $0xa0] sm:$0xf]  ;;  %v5319_v28 = vld [vmem:[#allocation2 + $0x26c] sm:$0xf0]  ;;  %v5278_v29 = vor.u32 %v7520_v21, %v5277_v20 }
  0x17   :  { %v5162_v24 = vor.u32 %v7488_v22, %v5159_v23  ;;  %v7528_v27 = vld [vmem:[#allocation2 + $0x25c] sm:$0xf]  ;;  %v7475_v30 = vld [vmem:[#allocation2 + $0xb0] sm:$0xf0]  ;;  %v5139_v33 = vld [vmem:[#allocation2 + $0x104] sm:$0xf0] }
  0x18   :  { %v5322_v31 = vor.u32 %v7528_v27, %v5319_v28  ;;  %v7483_v32 = vld [vmem:[#allocation2 + $0xf4] sm:$0xf]  ;;  %v5257_v34 = vld [vmem:[#allocation2 + $0x1e0] sm:$0xf]  ;;  %v5299_v38 = vld [vmem:[#allocation2 + $0x244] sm:$0xf0]  ;;  %v5098_v40 = vor.u32 %v7475_v30, %v5097_v26 }
  0x19   :  { %636 = vmatpush.bf16.msra.mxu0 %v5138_v16  ;;  %661 = vmatpush.bf16.msra.mxu2 %v5162_v24  ;;  %v7515_v35 = vld [vmem:[#allocation2 + $0x1f0] sm:$0xf0]  ;;  %v5142_v36 = vor.u32 %v7483_v32, %v5139_v33  ;;  %v7478_v39 = vld [vmem:[#allocation2 + $0xcc] sm:$0xf]  ;;  %v5077_v41 = vld [vmem:[#allocation2 + $0x78] sm:$0xf] }
  0x1a   :  { %649 = vmatpush.bf16.msra.mxu1 %v5298_v17  ;;  %674 = vmatpush.bf16.msra.mxu3 %v5322_v31  ;;  %v7523_v37 = vld [vmem:[#allocation2 + $0x234] sm:$0xf]  ;;  %v7470_v42 = vld [vmem:[#allocation2 + $0x88] sm:$0xf0]  ;;  %v5119_v44 = vld [vmem:[#allocation2 + $0xdc] sm:$0xf0]  ;;  %v5258_v45 = vor.u32 %v7515_v35, %v5257_v34 }
  0x1b   :  { %v5302_v43 = vor.u32 %v7523_v37, %v5299_v38  ;;  %v5237_v46 = vld [vmem:[#allocation2 + $0x1b8] sm:$0xf]  ;;  %v7510_v47 = vld [vmem:[#allocation2 + $0x1c8] sm:$0xf0]  ;;  %v5122_v48 = vor.u32 %v7478_v39, %v5119_v44  ;;  %v5279_v50 = vld [vmem:[#allocation2 + $0x21c] sm:$0xf0]  ;;  %v5078_v54 = vor.u32 %v7470_v42, %v5077_v41 }
  0x1c   :  { %v7518_v49 = vld [vmem:[#allocation2 + $0x20c] sm:$0xf]  ;;  %v7473_v51 = vld [vmem:[#allocation2 + $0xa4] sm:$0xf]  ;;  %v5099_v52 = vld [vmem:[#allocation2 + $0xb4] sm:$0xf0]  ;;  %v5238_v57 = vor.u32 %v7510_v47, %v5237_v46 }
  0x1d   :  { %637 = vmatpush.bf16.msra.mxu0 %v5118_v25  ;;  %662 = vmatpush.bf16.msra.mxu2 %v5142_v36  ;;  %v5282_v53 = vor.u32 %v7518_v49, %v5279_v50  ;;  %v7513_v55 = vld [vmem:[#allocation2 + $0x1e4] sm:$0xf]  ;;  %v5259_v56 = vld [vmem:[#allocation2 + $0x1f4] sm:$0xf0]  ;;  %v5057_v58 = vld [vmem:[#allocation2 + $0x50] sm:$0xf]  ;;  %v5102_v61 = vor.u32 %v7473_v51, %v5099_v52 }
  0x1e   :  { %650 = vmatpush.bf16.msra.mxu1 %v5278_v29  ;;  %675 = vmatpush.bf16.msra.mxu3 %v5302_v43  ;;  %v7465_v59 = vld [vmem:[#allocation2 + $0x60] sm:$0xf0]  ;;  %v5217_v60 = vld [vmem:[#allocation2 + $0x190] sm:$0xf]  ;;  %v7468_v63 = vld [vmem:[#allocation2 + $0x7c] sm:$0xf]  ;;  %v5262_v6 = vor.u32 %v7513_v55, %v5259_v56 }
  0x1f   :  { %v7505_v62 = vld [vmem:[#allocation2 + $0x1a0] sm:$0xf0]  ;;  %v5079_v5 = vld [vmem:[#allocation2 + $0x8c] sm:$0xf0]  ;;  %v5058_v7 = vor.u32 %v7465_v59, %v5057_v58  ;;  %v7508_v8 = vld [vmem:[#allocation2 + $0x1bc] sm:$0xf] }
  0x20   :  { %v5239_v9 = vld [vmem:[#allocation2 + $0x1cc] sm:$0xf0]  ;;  %v5218_v10 = vor.u32 %v7505_v62, %v5217_v60  ;;  %v5037_v11 = vld [vmem:[#allocation2 + $0x28] sm:$0xf]  ;;  %v7460_v12 = vld [vmem:[#allocation2 + $0x38] sm:$0xf0]  ;;  %v5082_v14 = vor.u32 %v7468_v63, %v5079_v5 }
  0x21   :  { %638 = vmatpush.bf16.msra.mxu0 %v5098_v40  ;;  %663 = vmatpush.bf16.msra.mxu2 %v5122_v48  ;;  %v5197_v13 = vld [vmem:[#allocation2 + $0x168] sm:$0xf]  ;;  %v7500_v15 = vld [vmem:[#allocation2 + $0x178] sm:$0xf0]  ;;  %v7463_v16 = vld [vmem:[#allocation2 + $0x54] sm:$0xf]  ;;  %v5242_v18 = vor.u32 %v7508_v8, %v5239_v9  ;;  %v5038_v19 = vor.u32 %v7460_v12, %v5037_v11 }
  0x22   :  { %651 = vmatpush.bf16.msra.mxu1 %v5258_v45  ;;  %676 = vmatpush.bf16.msra.mxu3 %v5282_v53  ;;  %v5059_v17 = vld [vmem:[#allocation2 + $0x64] sm:$0xf0]  ;;  %v5017_v20 = vld [vmem:[#allocation2] sm:$0xf]  ;;  %v7503_v21 = vld [vmem:[#allocation2 + $0x194] sm:$0xf]  ;;  %v5198_v23 = vor.u32 %v7500_v15, %v5197_v13 }
  0x23   :  { %v5219_v22 = vld [vmem:[#allocation2 + $0x1a4] sm:$0xf0]  ;;  %v7455_v24 = vld [vmem:[#allocation2 + $0x10] sm:$0xf0]  ;;  %v5177_v25 = vld [vmem:[#allocation2 + $0x140] sm:$0xf]  ;;  %v5062_v27 = vor.u32 %v7463_v16, %v5059_v17 }
  0x24   :  { %v7495_v26 = vld [vmem:[#allocation2 + $0x150] sm:$0xf0]  ;;  %v5165_v28 = vld [vmem:[#allocation2 + $0x120] sm:$0xf]  ;;  %v5222_v32 = vor.u32 %v7503_v21, %v5219_v22  ;;  %v7458_v33 = vld [vmem:[#allocation2 + $0x2c] sm:$0xf]  ;;  %v5018_v35 = vor.u32 %v7455_v24, %v5017_v20 }
  0x25   :  { %639 = vmatpush.bf16.msra.mxu0 %v5078_v54  ;;  %664 = vmatpush.bf16.msra.mxu2 %v5102_v61  ;;  %v7491_v29 = vld [vmem:[#allocation2 + $0x130] sm:$0xf0]  ;;  %v5325_v30 = vld [vmem:[#allocation2 + $0x260] sm:$0xf]  ;;  %v7498_v36 = vld [vmem:[#allocation2 + $0x16c] sm:$0xf]  ;;  %v5178_v38 = vor.u32 %v7495_v26, %v5177_v25 }
  0x26   :  { %652 = vmatpush.bf16.msra.mxu1 %v5238_v57  ;;  %677 = vmatpush.bf16.msra.mxu3 %v5262_v6  ;;  %v7531_v31 = vld [vmem:[#allocation2 + $0x270] sm:$0xf0]  ;;  %v5039_v34 = vld [vmem:[#allocation2 + $0x3c] sm:$0xf0]  ;;  %v5166_v39 = vor.u32 %v7491_v29, %v5165_v28  ;;  %v5145_v40 = vld [vmem:[#allocation2 + $0xf8] sm:$0xf] }
  0x27   :  { %v5199_v37 = vld [vmem:[#allocation2 + $0x17c] sm:$0xf0]  ;;  %v7486_v41 = vld [vmem:[#allocation2 + $0x108] sm:$0xf0]  ;;  %v5326_v42 = vor.u32 %v7531_v31, %v5325_v30  ;;  %v5305_v43 = vld [vmem:[#allocation2 + $0x238] sm:$0xf]  ;;  %v5042_v45 = vor.u32 %v7458_v33, %v5039_v34 }
  0x28   :  { %v7526_v44 = vld [vmem:[#allocation2 + $0x248] sm:$0xf0]  ;;  %v7453_v46 = vld [vmem:[#allocation2 + $0x4] sm:$0xf]  ;;  %v5202_v47 = vor.u32 %v7498_v36, %v5199_v37  ;;  %v5019_v48 = vld [vmem:[#allocation2 + $0x14] sm:$0xf0]  ;;  %v5146_v54 = vor.u32 %v7486_v41, %v5145_v40 }
  0x29   :  { %640 = vmatpush.bf16.msra.mxu0 %v5058_v7  ;;  %665 = vmatpush.bf16.msra.mxu2 %v5082_v14  ;;  %v7493_v49 = vld [vmem:[#allocation2 + $0x144] sm:$0xf]  ;;  %v5179_v50 = vld [vmem:[#allocation2 + $0x154] sm:$0xf0]  ;;  %v5306_v58 = vor.u32 %v7526_v44, %v5305_v43  ;;  %v5125_v59 = vld [vmem:[#allocation2 + $0xd0] sm:$0xf]  ;;  %v5022_v61 = vor.u32 %v7453_v46, %v5019_v48 }
  0x2a   :  { %653 = vmatpush.bf16.msra.mxu1 %v5218_v10  ;;  %678 = vmatpush.bf16.msra.mxu3 %v5242_v18  ;;  %v7489_v51 = vld [vmem:[#allocation2 + $0x124] sm:$0xf]  ;;  %v5167_v52 = vld [vmem:[#allocation2 + $0x134] sm:$0xf0]  ;;  %v5285_v62 = vld [vmem:[#allocation2 + $0x210] sm:$0xf]  ;;  %v5182_v5 = vor.u32 %v7493_v49, %v5179_v50 }
  0x2b   :  { %v8325_v53 = vld [vmem:[#allocation1] sm:$0xff]  ;;  %v7529_v55 = vld [vmem:[#allocation2 + $0x264] sm:$0xf]  ;;  %v5170_v6 = vor.u32 %v7489_v51, %v5167_v52  ;;  %v5147_v9 = vld [vmem:[#allocation2 + $0x10c] sm:$0xf0] }
  0x2c   :  { %v5327_v56 = vld [vmem:[#allocation2 + $0x274] sm:$0xf0]  ;;  %v8327_v57 = vld [vmem:[#allocation1 + $0x9] sm:$0xff]  ;;  %v7484_v8 = vld [vmem:[#allocation2 + $0xfc] sm:$0xf] }
  0x2d   :  { %641 = vmatpush.bf16.msra.mxu0 %v5038_v19  ;;  %666 = vmatpush.bf16.msra.mxu2 %v5062_v27  ;;  %v7481_v60 = vld [vmem:[#allocation2 + $0xe0] sm:$0xf0]  ;;  %v5330_v7 = vor.u32 %v7529_v55, %v5327_v56  ;;  %v7524_v11 = vld [vmem:[#allocation2 + $0x23c] sm:$0xf]  ;;  %v5307_v12 = vld [vmem:[#allocation2 + $0x24c] sm:$0xf0]  ;;  %v5150_v18 = vor.u32 %v7484_v8, %v5147_v9 }
  0x2e   :  { %654 = vmatpush.bf16.msra.mxu1 %v5198_v23  ;;  %679 = vmatpush.bf16.msra.mxu3 %v5222_v32  ;;  %v7521_v63 = vld [vmem:[#allocation2 + $0x220] sm:$0xf0]  ;;  %v5126_v10 = vor.u32 %v7481_v60, %v5125_v59  ;;  %v5105_v14 = vld [vmem:[#allocation2 + $0xa8] sm:$0xf]  ;;  %v7476_v15 = vld [vmem:[#allocation2 + $0xb8] sm:$0xf0]  ;;  %v5310_v19 = vor.u32 %v7524_v11, %v5307_v12 }
  0x2f   :  { %v5286_v13 = vor.u32 %v7521_v63, %v5285_v62  ;;  %v5265_v16 = vld [vmem:[#allocation2 + $0x1e8] sm:$0xf]  ;;  %v7516_v17 = vld [vmem:[#allocation2 + $0x1f8] sm:$0xf0]  ;;  %v7479_v20 = vld [vmem:[#allocation2 + $0xd4] sm:$0xf]  ;;  %v5106_v22 = vor.u32 %v7476_v15, %v5105_v14 }
  0x30   :  { %v5127_v21 = vld [vmem:[#allocation2 + $0xe4] sm:$0xf0]  ;;  %v7519_v23 = vld [vmem:[#allocation2 + $0x214] sm:$0xf]  ;;  %v5266_v25 = vor.u32 %v7516_v17, %v5265_v16  ;;  %v5085_v26 = vld [vmem:[#allocation2 + $0x80] sm:$0xf] }
  0x31   :  { %642 = vmatpush.bf16.msra.mxu0 %v5018_v35  ;;  %667 = vmatpush.bf16.msra.mxu2 %v5042_v45  ;;  %v5287_v24 = vld [vmem:[#allocation2 + $0x224] sm:$0xf0]  ;;  %v7471_v27 = vld [vmem:[#allocation2 + $0x90] sm:$0xf0]  ;;  %v5245_v28 = vld [vmem:[#allocation2 + $0x1c0] sm:$0xf]  ;;  %v5130_v30 = vor.u32 %v7479_v20, %v5127_v21 }
  0x32   :  { %655 = vmatpush.bf16.msra.mxu1 %v5178_v38  ;;  %680 = vmatpush.bf16.msra.mxu3 %v5202_v47  ;;  %v7511_v29 = vld [vmem:[#allocation2 + $0x1d0] sm:$0xf0]  ;;  %v5290_v31 = vor.u32 %v7519_v23, %v5287_v24  ;;  %v7474_v32 = vld [vmem:[#allocation2 + $0xac] sm:$0xf]  ;;  %v5107_v33 = vld [vmem:[#allocation2 + $0xbc] sm:$0xf0]  ;;  %v5086_v34 = vor.u32 %v7471_v27, %v5085_v26 }
  0x33   :  { %v7514_v35 = vld [vmem:[#allocation2 + $0x1ec] sm:$0xf]  ;;  %v5267_v36 = vld [vmem:[#allocation2 + $0x1fc] sm:$0xf0]  ;;  %v5246_v37 = vor.u32 %v7511_v29, %v5245_v28  ;;  %v5065_v38 = vld [vmem:[#allocation2 + $0x58] sm:$0xf] }
  0x34   :  { %643 = vmatmul.bf16.vlgmr.msra.gmra.mxu0 %v8325_v53  ;;  %v5225_v40 = vld [vmem:[#allocation2 + $0x198] sm:$0xf]  ;;  %v7506_v41 = vld [vmem:[#allocation2 + $0x1a8] sm:$0xf0]  ;;  %v5270_v43 = vor.u32 %v7514_v35, %v5267_v36  ;;  %v7469_v44 = vld [vmem:[#allocation2 + $0x84] sm:$0xf] }
  0x35   :  { %687 = vmatpush.bf16.msrb.mxu0 %v5166_v39  ;;  %656 = vmatmul.bf16.vlgmr.msra.gmra.mxu1 %v8327_v57  ;;  %v7466_v39 = vld [vmem:[#allocation2 + $0x68] sm:$0xf0]  ;;  %v5087_v45 = vld [vmem:[#allocation2 + $0x94] sm:$0xf0]  ;;  %v7509_v47 = vld [vmem:[#allocation2 + $0x1c4] sm:$0xf]  ;;  %v5226_v49 = vor.u32 %v7506_v41, %v5225_v40 }
  0x36   :  { %700 = vmatpush.bf16.msrb.mxu1 %v5326_v42  ;;  %668 = vmatpush.bf16.msra.mxu2 %v5022_v61  ;;  %v5110_v42 = vor.u32 %v7474_v32, %v5107_v33  ;;  %v5066_v46 = vor.u32 %v7466_v39, %v5065_v38  ;;  %v5247_v48 = vld [vmem:[#allocation2 + $0x1d4] sm:$0xf0]  ;;  %v5045_v50 = vld [vmem:[#allocation2 + $0x30] sm:$0xf]  ;;  %v7461_v51 = vld [vmem:[#allocation2 + $0x40] sm:$0xf0]  ;;  %v5090_v55 = vor.u32 %v7469_v44, %v5087_v45 }
  0x37   :  { %681 = vmatpush.bf16.msra.mxu3 %v5182_v5  ;;  %v5205_v52 = vld [vmem:[#allocation2 + $0x170] sm:$0xf]  ;;  %v5250_v56 = vor.u32 %v7509_v47, %v5247_v48  ;;  %v5046_v60 = vor.u32 %v7461_v51, %v5045_v50  ;;  %v5025_v61 = vld [vmem:[#allocation2 + $0x8] sm:$0xf]  ;;  %v7504_v62 = vld [vmem:[#allocation2 + $0x19c] sm:$0xf] }
  0x38   :  { %v5067_v59 = vld [vmem:[#allocation2 + $0x6c] sm:$0xf0]  ;;  %v7496_v8 = vld [vmem:[#allocation2 + $0x158] sm:$0xf0]  ;;  %v5173_v9 = vld [vmem:[#allocation2 + $0x128] sm:$0xf] }
  0x39   :  { %688 = vmatpush.bf16.msrb.mxu0 %v5146_v54  ;;  %669 = vmatmul.bf16.vlgmr.msra.gmra.mxu2 %v8325_v53  ;;  %v7501_v54 = vld [vmem:[#allocation2 + $0x180] sm:$0xf0]  ;;  %v5227_v63 = vld [vmem:[#allocation2 + $0x1ac] sm:$0xf0]  ;;  %v5333_v11 = vld [vmem:[#allocation2 + $0x268] sm:$0xf] }
  0x3a   :  { %701 = vmatpush.bf16.msrb.mxu1 %v5306_v58  ;;  %713 = vmatpush.bf16.msrb.mxu2 %v5170_v6  ;;  %v7464_v58 = vld [vmem:[#allocation2 + $0x5c] sm:$0xf]  ;;  %v5206_v5 = vor.u32 %v7501_v54, %v5205_v52  ;;  %v5230_v14 = vor.u32 %v7504_v62, %v5227_v63  ;;  %v7459_v15 = vld [vmem:[#allocation2 + $0x34] sm:$0xf]  ;;  %v5047_v16 = vld [vmem:[#allocation2 + $0x44] sm:$0xf0] }
  0x3b   :  { %726 = vmatpush.bf16.msrb.mxu3 %v5330_v7  ;;  %v7456_v6 = vld [vmem:[#allocation2 + $0x18] sm:$0xf0]  ;;  %v5185_v7 = vld [vmem:[#allocation2 + $0x148] sm:$0xf]  ;;  %v5070_v12 = vor.u32 %v7464_v58, %v5067_v59  ;;  %v5153_v23 = vld [vmem:[#allocation2 + $0x100] sm:$0xf]  ;;  %v5050_v26 = vor.u32 %v7459_v15, %v5047_v16 }
  0x3c   :  { %682 = vmatmul.bf16.vlgmr.msra.gmra.mxu3 %v8327_v57  ;;  %v5026_v17 = vor.u32 %v7456_v6, %v5025_v61  ;;  %v5186_v20 = vor.u32 %v7496_v8, %v5185_v7  ;;  %v7487_v24 = vld [vmem:[#allocation2 + $0x110] sm:$0xf0]  ;;  %v7454_v29 = vld [vmem:[#allocation2 + $0xc] sm:$0xf]  ;;  %v5187_v32 = vld [vmem:[#allocation2 + $0x15c] sm:$0xf0] }
  0x3d   :  { %689 = vmatpush.bf16.msrb.mxu0 %v5126_v10  ;;  %v7492_v10 = vld [vmem:[#allocation2 + $0x138] sm:$0xf0]  ;;  %v7527_v27 = vld [vmem:[#allocation2 + $0x250] sm:$0xf0]  ;;  %v5154_v33 = vor.u32 %v7487_v24, %v5153_v23  ;;  %v5133_v35 = vld [vmem:[#allocation2 + $0xd8] sm:$0xf] }
  0x3e   :  { %702 = vmatpush.bf16.msrb.mxu1 %v5286_v13  ;;  %714 = vmatpush.bf16.msrb.mxu2 %v5150_v18  ;;  %v7532_v13 = vld [vmem:[#allocation2 + $0x278] sm:$0xf0]  ;;  %v7499_v18 = vld [vmem:[#allocation2 + $0x174] sm:$0xf]  ;;  %v5174_v21 = vor.u32 %v7492_v10, %v5173_v9  ;;  %v7482_v36 = vld [vmem:[#allocation2 + $0xe8] sm:$0xf0] }
  0x3f   :  { %727 = vmatpush.bf16.msrb.mxu3 %v5310_v19  ;;  %v5207_v19 = vld [vmem:[#allocation2 + $0x184] sm:$0xf0]  ;;  %v5293_v38 = vld [vmem:[#allocation2 + $0x218] sm:$0xf]  ;;  %v7522_v39 = vld [vmem:[#allocation2 + $0x228] sm:$0xf0]  ;;  %v5134_v41 = vor.u32 %v7482_v36, %v5133_v35 }
  0x40   :  { %v5210_v28 = vor.u32 %v7499_v18, %v5207_v19  ;;  %v7477_v44 = vld [vmem:[#allocation2 + $0xc0] sm:$0xf0]  ;;  %v5273_v45 = vld [vmem:[#allocation2 + $0x1f0] sm:$0xf]  ;;  %v7472_v50 = vld [vmem:[#allocation2 + $0x98] sm:$0xf0] }
  0x41   :  { %690 = vmatpush.bf16.msrb.mxu0 %v5106_v22  ;;  %v5334_v22 = vor.u32 %v7532_v13, %v5333_v11  ;;  %v5253_v51 = vld [vmem:[#allocation2 + $0x1c8] sm:$0xf]  ;;  %v7512_v52 = vld [vmem:[#allocation2 + $0x1d8] sm:$0xf0]  ;;  %v7467_v58 = vld [vmem:[#allocation2 + $0x70] sm:$0xf0] }
  0x42   :  { %703 = vmatpush.bf16.msrb.mxu1 %v5266_v25  ;;  %715 = vmatpush.bf16.msrb.mxu2 %v5130_v30  ;;  %v5313_v25 = vld [vmem:[#allocation2 + $0x240] sm:$0xf]  ;;  %v5053_v63 = vld [vmem:[#allocation2 + $0x38] sm:$0xf]  ;;  %v7502_v7 = vld [vmem:[#allocation2 + $0x188] sm:$0xf0] }
  0x43   :  { %728 = vmatpush.bf16.msrb.mxu3 %v5290_v31  ;;  %v5027_v30 = vld [vmem:[#allocation2 + $0x1c] sm:$0xf0]  ;;  %v7494_v31 = vld [vmem:[#allocation2 + $0x14c] sm:$0xf]  ;;  %v5213_v6 = vld [vmem:[#allocation2 + $0x178] sm:$0xf] }
  0x44   :  { %v5190_v40 = vor.u32 %v7494_v31, %v5187_v32  ;;  %v5233_v59 = vld [vmem:[#allocation2 + $0x1a0] sm:$0xf]  ;;  %v5214_v9 = vor.u32 %v7502_v7, %v5213_v6  ;;  %v5033_v10 = vld [vmem:[#allocation2 + $0x10] sm:$0xf]  ;;  %v7457_v11 = vld [vmem:[#allocation2 + $0x20] sm:$0xf0] }
  0x45   :  { %691 = vmatpush.bf16.msrb.mxu0 %v5086_v34  ;;  %v5314_v34 = vor.u32 %v7527_v27, %v5313_v25  ;;  %v7497_v13 = vld [vmem:[#allocation2 + $0x160] sm:$0xf0]  ;;  %v208_v16 = vperm.slane %v8285_v0, 0 }
  0x46   :  { %704 = vmatpush.bf16.msrb.mxu1 %v5246_v37  ;;  %716 = vmatpush.bf16.msrb.mxu2 %v5110_v42  ;;  %v5030_v37 = vor.u32 %v7454_v29, %v5027_v30  ;;  %v5294_v42 = vor.u32 %v7522_v39, %v5293_v38 }
  0x47   :  { %729 = vmatpush.bf16.msrb.mxu3 %v5270_v43  ;;  %v5113_v43 = vld [vmem:[#allocation2 + $0xb0] sm:$0xf] }
  0x48   :  { %v5114_v47 = vor.u32 %v7477_v44, %v5113_v43  ;;  %v211_v44 = vperm.slane %v8300_v3, 0 }
  0x49   :  { %692 = vmatpush.bf16.msrb.mxu0 %v5066_v46  ;;  %v7517_v46 = vld [vmem:[#allocation2 + $0x200] sm:$0xf0] }
  0x4a   :  { %705 = vmatpush.bf16.msrb.mxu1 %v5226_v49  ;;  %717 = vmatpush.bf16.msrb.mxu2 %v5090_v55  ;;  %v5274_v48 = vor.u32 %v7517_v46, %v5273_v45  ;;  %v5093_v49 = vld [vmem:[#allocation2 + $0x88] sm:$0xf]  ;;  %v5254_v55 = vor.u32 %v7512_v52, %v5253_v51 }
  0x4b   :  { %730 = vmatpush.bf16.msrb.mxu3 %v5250_v56  ;;  %v5094_v54 = vor.u32 %v7472_v50, %v5093_v49  ;;  %v5073_v56 = vld [vmem:[#allocation2 + $0x60] sm:$0xf] }
  0x4c   :  { %v5074_v61 = vor.u32 %v7467_v58, %v5073_v56 }
  0x4d   :  { %693 = vmatpush.bf16.msrb.mxu0 %v5046_v60  ;;  %v7507_v60 = vld [vmem:[#allocation2 + $0x1b0] sm:$0xf0] }
  0x4e   :  { %706 = vmatpush.bf16.msrb.mxu1 %v5206_v5  ;;  %718 = vmatpush.bf16.msrb.mxu2 %v5070_v12  ;;  %v5234_v62 = vor.u32 %v7507_v60, %v5233_v59  ;;  %v7462_v5 = vld [vmem:[#allocation2 + $0x48] sm:$0xf0]  ;;  %v5193_v12 = vld [vmem:[#allocation2 + $0x150] sm:$0xf] }
  0x4f   :  { %731 = vmatpush.bf16.msrb.mxu3 %v5230_v14  ;;  %v5054_v8 = vor.u32 %v7462_v5, %v5053_v63  ;;  %v5034_v14 = vor.u32 %v7457_v11, %v5033_v10  ;;  %v5194_v15 = vor.u32 %v7497_v13, %v5193_v12 }
  0x51   :  { %694 = vmatpush.bf16.msrb.mxu0 %v5026_v17 }
  0x52   :  { %707 = vmatpush.bf16.msrb.mxu1 %v5186_v20  ;;  %719 = vmatpush.bf16.msrb.mxu2 %v5050_v26  ;;  %v209_v26 = vperm.slane %v8290_v1, 0 }
  0x53   :  { %732 = vmatpush.bf16.msrb.mxu3 %v5210_v28 }
  0x54   :  { %695 = vmatmul.bf16.vlgmr.msrb.gmra.mxu0 %v8325_v53 }
  0x55   :  { %739 = vmatpush.bf16.msra.mxu0 %v5174_v21  ;;  %708 = vmatmul.bf16.vlgmr.msrb.gmra.mxu1 %v8327_v57 }
  0x56   :  { %752 = vmatpush.bf16.msra.mxu1 %v5334_v22  ;;  %720 = vmatpush.bf16.msrb.mxu2 %v5030_v37 }
  0x57   :  { %733 = vmatpush.bf16.msrb.mxu3 %v5190_v40 }
  0x59   :  { %740 = vmatpush.bf16.msra.mxu0 %v5154_v33  ;;  %721 = vmatmul.bf16.vlgmr.msrb.gmra.mxu2 %v8325_v53 }
  0x5a   :  { %753 = vmatpush.bf16.msra.mxu1 %v5314_v34  ;;  %734 = vmatmul.bf16.vlgmr.msrb.gmra.mxu3 %v8327_v57  ;;  %v210_v34 = vperm.slane %v8295_v2, 0 }
  0x5d   :  { %741 = vmatpush.bf16.msra.mxu0 %v5134_v41 }
  0x5e   :  { %754 = vmatpush.bf16.msra.mxu1 %v5294_v42 }
  0x61   :  { %742 = vmatpush.bf16.msra.mxu0 %v5114_v47 }
  0x62   :  { %755 = vmatpush.bf16.msra.mxu1 %v5274_v48 }
  0x65   :  { %743 = vmatpush.bf16.msra.mxu0 %v5094_v54 }
  0x66   :  { %756 = vmatpush.bf16.msra.mxu1 %v5254_v55  ;;  %v212_v55 = vperm.slane %v8305_v4, 0 }
  0x69   :  { %744 = vmatpush.bf16.msra.mxu0 %v5074_v61 }
  0x6a   :  { %757 = vmatpush.bf16.msra.mxu1 %v5234_v62 }
  0x6d   :  { %745 = vmatpush.bf16.msra.mxu0 %v5054_v8 }
  0x6e   :  { %758 = vmatpush.bf16.msra.mxu1 %v5214_v9 }
  0x71   :  { %746 = vmatpush.bf16.msra.mxu0 %v5034_v14 }
  0x72   :  { %759 = vmatpush.bf16.msra.mxu1 %v5194_v15 }
  0x74   :  { %747 = vmatmul.bf16.vlgmr.msra.gmra.mxu0 %v8325_v53 }
  0x75   :  { %760 = vmatmul.bf16.vlgmr.msra.gmra.mxu1 %v8327_v57 }
  0xb1   :  { %v644_v17 = vpop.f32.mrf.mxu0 }
  0xb2   :  { %v645_v18 = vadd.f32 %v644_v17, %v208_v16  ;;  %v657_v19 = vpop.f32.mrf.mxu1 }
  0xb4   :  { %v658_v20 = vadd.f32 %v657_v19, %v645_v18 }
  0xb6   :  { %v765_v21 = vmul.f32 0.22916667, %v658_v20 }
  0xb8   :  { %v770_v22 = vmax.f32 %v658_v20, %v765_v21 }
  0xb9   :  { %v646_v23 = vpop.f32.mrf.mxu0 }
  0xba   :  { %v8340_v24 = vpack.c.bf16 %v770_v22, %v770_v22  ;;  %v659_v25 = vpop.f32.mrf.mxu1 }
  0xbc   :  { %v670_v27 = vpop.f32.mrf.mxu2 }
  0xbd   :  { %v671_v28 = vadd.f32 %v670_v27, %v209_v26 }
  0xbf   :  { %v683_v29 = vpop.f32.mrf.mxu3 }
  0xc0   :  { %v684_v53 = vadd.f32 %v683_v29, %v671_v28 }
  0xc2   :  { %v766_v30 = vmul.f32 0.22916667, %v684_v53 }
  0xc4   :  { %v771_v57 = vmax.f32 %v684_v53, %v766_v30  ;;  %v672_v31 = vpop.f32.mrf.mxu2 }
  0xc6   :  { %v8343_v32 = vpack.c.bf16 %v771_v57, %v771_v57 }
  0xc7   :  { %v685_v33 = vpop.f32.mrf.mxu3 }
  0xd1   :  { %v696_v35 = vpop.f32.mrf.mxu0 }
  0xd2   :  { %v697_v36 = vadd.f32 %v696_v35, %v210_v34  ;;  %v709_v37 = vpop.f32.mrf.mxu1 }
  0xd4   :  { %v710_v38 = vadd.f32 %v709_v37, %v697_v36 }
  0xd6   :  { %v767_v39 = vmul.f32 0.22916667, %v710_v38 }
  0xd8   :  { %v772_v40 = vmax.f32 %v710_v38, %v767_v39 }
  0xd9   :  { %v698_v41 = vpop.f32.mrf.mxu0 }
  0xda   :  { %v8346_v42 = vpack.c.bf16 %v772_v40, %v772_v40  ;;  %v711_v43 = vpop.f32.mrf.mxu1 }
  0xdc   :  { %v722_v45 = vpop.f32.mrf.mxu2 }
  0xdd   :  { %v723_v46 = vadd.f32 %v722_v45, %v211_v44  ;;  %v735_v47 = vpop.f32.mrf.mxu3 }
  0xdf   :  { %v736_v48 = vadd.f32 %v735_v47, %v723_v46 }
  0xe1   :  { %v768_v49 = vmul.f32 0.22916667, %v736_v48 }
  0xe3   :  { %v773_v50 = vmax.f32 %v736_v48, %v768_v49 }
  0xe4   :  { %v724_v51 = vpop.f32.mrf.mxu2 }
  0xe5   :  { %v8349_v52 = vpack.c.bf16 %v773_v50, %v773_v50  ;;  %v737_v54 = vpop.f32.mrf.mxu3 }
  0xf1   :  { %v748_v56 = vpop.f32.mrf.mxu0 }
  0xf2   :  { %v749_v58 = vadd.f32 %v748_v56, %v212_v55  ;;  %v761_v59 = vpop.f32.mrf.mxu1 }
  0xf4   :  { %v762_v60 = vadd.f32 %v761_v59, %v749_v58 }
  0xf6   :  { %v769_v61 = vmul.f32 0.22916667, %v762_v60 }
  0xf8   :  { %v774_v62 = vmax.f32 %v762_v60, %v769_v61 }
  0xf9   :  { %v750_v63 = vpop.f32.mrf.mxu0 }
  0xfa   :  { %v8352_v5 = vpack.c.bf16 %v774_v62, %v774_v62  ;;  %v763_v6 = vpop.f32.mrf.mxu1 }
  0xfb   :  { %8213 = dma.done.wait [#allocation8 + $0x1], 20480 }
  0xfc   :  { %8214 = vsyncadd [#allocation8 + $0x1], 4294946816  ;;  %v5449_v7 = vld [vmem:[#allocation3 + $0xe0] sm:$0xf]  ;;  %v7563_v8 = vld [vmem:[#allocation3 + $0xec] sm:$0xf0] }
  0xfd   :  { %v5577_v9 = vld [vmem:[#allocation3 + $0x1e0] sm:$0xf]  ;;  %v5450_v10 = vor.u32 %v7563_v8, %v5449_v7  ;;  %v7595_v11 = vld [vmem:[#allocation3 + $0x1ec] sm:$0xf0] }
  0xfe   :  { %v5705_v12 = vld [vmem:[#allocation3 + $0x2e0] sm:$0xf]  ;;  %v7627_v13 = vld [vmem:[#allocation3 + $0x2ec] sm:$0xf0]  ;;  %v5578_v14 = vor.u32 %v7595_v11, %v5577_v9 }
  0xff   :  { %v5706_v15 = vor.u32 %v7627_v13, %v5705_v12  ;;  %v5833_v16 = vld [vmem:[#allocation3 + $0x3e0] sm:$0xf]  ;;  %v7659_v17 = vld [vmem:[#allocation3 + $0x3ec] sm:$0xf0]  ;;  %1748 = vmatpush.bf16.msra.mxu2 %v5450_v10 }
 0x100   :  { %v5433_v18 = vld [vmem:[#allocation3 + $0xc0] sm:$0xf]  ;;  %v5834_v19 = vor.u32 %v7659_v17, %v5833_v16  ;;  %v7559_v20 = vld [vmem:[#allocation3 + $0xcc] sm:$0xf0]  ;;  %1761 = vmatpush.bf16.msra.mxu3 %v5578_v14 }
 0x101   :  { %v5561_v21 = vld [vmem:[#allocation3 + $0x1c0] sm:$0xf]  ;;  %v7591_v22 = vld [vmem:[#allocation3 + $0x1cc] sm:$0xf0]  ;;  %1774 = vmatpush.bf16.msrb.mxu0 %v5706_v15  ;;  %v5434_v23 = vor.u32 %v7559_v20, %v5433_v18 }
 0x102   :  { %v5562_v25 = vor.u32 %v7591_v22, %v5561_v21  ;;  %v5689_v26 = vld [vmem:[#allocation3 + $0x2c0] sm:$0xf]  ;;  %v7623_v27 = vld [vmem:[#allocation3 + $0x2cc] sm:$0xf0]  ;;  %1787 = vmatpush.bf16.msrb.mxu1 %v5834_v19 }
 0x103   :  { %v5817_v28 = vld [vmem:[#allocation3 + $0x3c0] sm:$0xf]  ;;  %v5690_v29 = vor.u32 %v7623_v27, %v5689_v26  ;;  %v7655_v53 = vld [vmem:[#allocation3 + $0x3cc] sm:$0xf0]  ;;  %1749 = vmatpush.bf16.msra.mxu2 %v5434_v23 }
 0x104   :  { %v5417_v30 = vld [vmem:[#allocation3 + $0xa0] sm:$0xf]  ;;  %v7555_v57 = vld [vmem:[#allocation3 + $0xac] sm:$0xf0]  ;;  %v5818_v31 = vor.u32 %v7655_v53, %v5817_v28  ;;  %1762 = vmatpush.bf16.msra.mxu3 %v5562_v25 }
 0x105   :  { %v5545_v33 = vld [vmem:[#allocation3 + $0x1a0] sm:$0xf]  ;;  %v7587_v34 = vld [vmem:[#allocation3 + $0x1ac] sm:$0xf0]  ;;  %v5418_v36 = vor.u32 %v7555_v57, %v5417_v30  ;;  %1775 = vmatpush.bf16.msrb.mxu0 %v5690_v29 }
 0x106   :  { %v5673_v35 = vld [vmem:[#allocation3 + $0x2a0] sm:$0xf]  ;;  %v7619_v37 = vld [vmem:[#allocation3 + $0x2ac] sm:$0xf0]  ;;  %v5546_v40 = vor.u32 %v7587_v34, %v5545_v33  ;;  %1788 = vmatpush.bf16.msrb.mxu1 %v5818_v31 }
 0x107   :  { %v5801_v38 = vld [vmem:[#allocation3 + $0x3a0] sm:$0xf]  ;;  %v7651_v39 = vld [vmem:[#allocation3 + $0x3ac] sm:$0xf0]  ;;  %v5674_v41 = vor.u32 %v7619_v37, %v5673_v35  ;;  %1750 = vmatpush.bf16.msra.mxu2 %v5418_v36 }
 0x108   :  { %v5401_v43 = vld [vmem:[#allocation3 + $0x80] sm:$0xf]  ;;  %v7551_v44 = vld [vmem:[#allocation3 + $0x8c] sm:$0xf0]  ;;  %v5802_v46 = vor.u32 %v7651_v39, %v5801_v38  ;;  %1763 = vmatpush.bf16.msra.mxu3 %v5546_v40 }
 0x109   :  { %v5529_v45 = vld [vmem:[#allocation3 + $0x180] sm:$0xf]  ;;  %v7583_v47 = vld [vmem:[#allocation3 + $0x18c] sm:$0xf0]  ;;  %v5402_v54 = vor.u32 %v7551_v44, %v5401_v43  ;;  %1776 = vmatpush.bf16.msrb.mxu0 %v5674_v41  ;;  %v7561_v44 = vld [vmem:[#allocation3 + $0xe4] sm:$0xf] }
 0x10a   :  { %v5657_v48 = vld [vmem:[#allocation3 + $0x280] sm:$0xf]  ;;  %v7615_v49 = vld [vmem:[#allocation3 + $0x28c] sm:$0xf0]  ;;  %v5530_v55 = vor.u32 %v7583_v47, %v5529_v45  ;;  %1789 = vmatpush.bf16.msrb.mxu1 %v5802_v46  ;;  %v5451_v45 = vld [vmem:[#allocation3 + $0xf0] sm:$0xf0] }
 0x10b   :  { %v5785_v50 = vld [vmem:[#allocation3 + $0x380] sm:$0xf]  ;;  %v7647_v51 = vld [vmem:[#allocation3 + $0x38c] sm:$0xf0]  ;;  %v5658_v56 = vor.u32 %v7615_v49, %v5657_v48  ;;  %1751 = vmatpush.bf16.msra.mxu2 %v5402_v54  ;;  %v5579_v54 = vld [vmem:[#allocation3 + $0x1f0] sm:$0xf0] }
 0x10c   :  { %v5385_v58 = vld [vmem:[#allocation3 + $0x60] sm:$0xf]  ;;  %v7547_v59 = vld [vmem:[#allocation3 + $0x6c] sm:$0xf0]  ;;  %v5786_v61 = vor.u32 %v7647_v51, %v5785_v50  ;;  %1764 = vmatpush.bf16.msra.mxu3 %v5530_v55  ;;  %v7593_v51 = vld [vmem:[#allocation3 + $0x1e4] sm:$0xf] }
 0x10d   :  { %v5513_v60 = vld [vmem:[#allocation3 + $0x160] sm:$0xf]  ;;  %v7579_v62 = vld [vmem:[#allocation3 + $0x16c] sm:$0xf0]  ;;  %v5386_v9 = vor.u32 %v7547_v59, %v5385_v58  ;;  %1777 = vmatpush.bf16.msrb.mxu0 %v5658_v56  ;;  %v7625_v58 = vld [vmem:[#allocation3 + $0x2e4] sm:$0xf] }
 0x10e   :  { %v5641_v63 = vld [vmem:[#allocation3 + $0x260] sm:$0xf]  ;;  %v7611_v6 = vld [vmem:[#allocation3 + $0x26c] sm:$0xf0]  ;;  %v5514_v10 = vor.u32 %v7579_v62, %v5513_v60  ;;  %1790 = vmatpush.bf16.msrb.mxu1 %v5786_v61  ;;  %v5707_v59 = vld [vmem:[#allocation3 + $0x2f0] sm:$0xf0]  ;;  %v5454_v60 = vor.u32 %v7561_v44, %v5451_v45 }
 0x10f   :  { %v5769_v7 = vld [vmem:[#allocation3 + $0x360] sm:$0xf]  ;;  %v7643_v8 = vld [vmem:[#allocation3 + $0x36c] sm:$0xf0]  ;;  %v5642_v11 = vor.u32 %v7611_v6, %v5641_v63  ;;  %1752 = vmatpush.bf16.msra.mxu2 %v5386_v9  ;;  %v5435_v9 = vld [vmem:[#allocation3 + $0xd0] sm:$0xf0] }
 0x110   :  { %v5369_v12 = vld [vmem:[#allocation3 + $0x40] sm:$0xf]  ;;  %v7543_v13 = vld [vmem:[#allocation3 + $0x4c] sm:$0xf0]  ;;  %v5770_v15 = vor.u32 %v7643_v8, %v5769_v7  ;;  %1765 = vmatpush.bf16.msra.mxu3 %v5514_v10  ;;  %v5582_v7 = vor.u32 %v7593_v51, %v5579_v54  ;;  %v7557_v8 = vld [vmem:[#allocation3 + $0xc4] sm:$0xf]  ;;  %v5710_v10 = vor.u32 %v7625_v58, %v5707_v59 }
 0x111   :  { %v5497_v14 = vld [vmem:[#allocation3 + $0x140] sm:$0xf]  ;;  %v7575_v16 = vld [vmem:[#allocation3 + $0x14c] sm:$0xf0]  ;;  %v5370_v21 = vor.u32 %v7543_v13, %v5369_v12  ;;  %1778 = vmatpush.bf16.msrb.mxu0 %v5642_v11  ;;  %v7589_v11 = vld [vmem:[#allocation3 + $0x1c4] sm:$0xf] }
 0x112   :  { %v5625_v17 = vld [vmem:[#allocation3 + $0x240] sm:$0xf]  ;;  %v7607_v18 = vld [vmem:[#allocation3 + $0x24c] sm:$0xf0]  ;;  %v5498_v22 = vor.u32 %v7575_v16, %v5497_v14  ;;  %1791 = vmatpush.bf16.msrb.mxu1 %v5770_v15  ;;  %v5563_v12 = vld [vmem:[#allocation3 + $0x1d0] sm:$0xf0]  ;;  %v5438_v16 = vor.u32 %v7557_v8, %v5435_v9 }
 0x113   :  { %v5753_v19 = vld [vmem:[#allocation3 + $0x340] sm:$0xf]  ;;  %v7639_v20 = vld [vmem:[#allocation3 + $0x34c] sm:$0xf0]  ;;  %v5626_v23 = vor.u32 %v7607_v18, %v5625_v17  ;;  %1753 = vmatpush.bf16.msra.mxu2 %v5370_v21  ;;  %v7621_v14 = vld [vmem:[#allocation3 + $0x2c4] sm:$0xf] }
 0x114   :  { %v5353_v25 = vld [vmem:[#allocation3 + $0x20] sm:$0xf]  ;;  %v7539_v26 = vld [vmem:[#allocation3 + $0x2c] sm:$0xf0]  ;;  %v5754_v28 = vor.u32 %v7639_v20, %v5753_v19  ;;  %1766 = vmatpush.bf16.msra.mxu3 %v5498_v22  ;;  %v5691_v15 = vld [vmem:[#allocation3 + $0x2d0] sm:$0xf0]  ;;  %v5566_v19 = vor.u32 %v7589_v11, %v5563_v12 }
 0x115   :  { %v5481_v27 = vld [vmem:[#allocation3 + $0x120] sm:$0xf]  ;;  %v7571_v29 = vld [vmem:[#allocation3 + $0x12c] sm:$0xf0]  ;;  %v5354_v33 = vor.u32 %v7539_v26, %v5353_v25  ;;  %1779 = vmatpush.bf16.msrb.mxu0 %v5626_v23  ;;  %v7553_v20 = vld [vmem:[#allocation3 + $0xa4] sm:$0xf]  ;;  %v5694_v22 = vor.u32 %v7621_v14, %v5691_v15 }
 0x116   :  { %v5609_v53 = vld [vmem:[#allocation3 + $0x220] sm:$0xf]  ;;  %v7603_v30 = vld [vmem:[#allocation3 + $0x22c] sm:$0xf0]  ;;  %v5482_v36 = vor.u32 %v7571_v29, %v5481_v27  ;;  %1792 = vmatpush.bf16.msrb.mxu1 %v5754_v28  ;;  %v5419_v21 = vld [vmem:[#allocation3 + $0xb0] sm:$0xf0] }
 0x117   :  { %v5737_v57 = vld [vmem:[#allocation3 + $0x320] sm:$0xf]  ;;  %v7635_v31 = vld [vmem:[#allocation3 + $0x32c] sm:$0xf0]  ;;  %v5610_v37 = vor.u32 %v7603_v30, %v5609_v53  ;;  %1754 = vmatpush.bf16.msra.mxu2 %v5354_v33  ;;  %v7585_v23 = vld [vmem:[#allocation3 + $0x1a4] sm:$0xf]  ;;  %v5422_v29 = vor.u32 %v7553_v20, %v5419_v21 }
 0x118   :  { %v5337_v34 = vld [vmem:[#allocation3] sm:$0xf]  ;;  %v7535_v35 = vld [vmem:[#allocation3 + $0xc] sm:$0xf0]  ;;  %v5738_v41 = vor.u32 %v7635_v31, %v5737_v57  ;;  %1767 = vmatpush.bf16.msra.mxu3 %v5482_v36  ;;  %v5547_v25 = vld [vmem:[#allocation3 + $0x1b0] sm:$0xf0] }
 0x119   :  { %v5465_v38 = vld [vmem:[#allocation3 + $0x100] sm:$0xf]  ;;  %v7567_v39 = vld [vmem:[#allocation3 + $0x10c] sm:$0xf0]  ;;  %v5338_v49 = vor.u32 %v7535_v35, %v5337_v34  ;;  %1780 = vmatpush.bf16.msrb.mxu0 %v5610_v37  ;;  %v7617_v27 = vld [vmem:[#allocation3 + $0x2a4] sm:$0xf]  ;;  %v5550_v57 = vor.u32 %v7585_v23, %v5547_v25 }
 0x11a   :  { %v5961_v40 = vld [vmem:[#allocation3 + $0x4e0] sm:$0xf]  ;;  %v7691_v43 = vld [vmem:[#allocation3 + $0x4ec] sm:$0xf0]  ;;  %v5466_v55 = vor.u32 %v7567_v39, %v5465_v38  ;;  %1793 = vmatpush.bf16.msrb.mxu1 %v5738_v41  ;;  %v5675_v28 = vld [vmem:[#allocation3 + $0x2b0] sm:$0xf0] }
 0x11b   :  { %v5593_v46 = vld [vmem:[#allocation3 + $0x200] sm:$0xf]  ;;  %v7599_v47 = vld [vmem:[#allocation3 + $0x20c] sm:$0xf0]  ;;  %v5962_v56 = vor.u32 %v7691_v43, %v5961_v40  ;;  %1755 = vmatpush.bf16.msra.mxu2 %v5338_v49  ;;  %v7549_v31 = vld [vmem:[#allocation3 + $0x84] sm:$0xf]  ;;  %v5678_v34 = vor.u32 %v7617_v27, %v5675_v28 }
 0x11c   :  { %v5721_v48 = vld [vmem:[#allocation3 + $0x300] sm:$0xf]  ;;  %v7631_v50 = vld [vmem:[#allocation3 + $0x30c] sm:$0xf0]  ;;  %v5594_v61 = vor.u32 %v7599_v47, %v5593_v46  ;;  %1768 = vmatpush.bf16.msra.mxu3 %v5466_v55  ;;  %v5403_v33 = vld [vmem:[#allocation3 + $0x90] sm:$0xf0] }
 0x11d   :  { %v5945_v62 = vld [vmem:[#allocation3 + $0x4c0] sm:$0xf]  ;;  %v7687_v63 = vld [vmem:[#allocation3 + $0x4cc] sm:$0xf0]  ;;  %v5722_v6 = vor.u32 %v7631_v50, %v5721_v48  ;;  %v7581_v35 = vld [vmem:[#allocation3 + $0x184] sm:$0xf]  ;;  %v5406_v40 = vor.u32 %v7549_v31, %v5403_v33 }
 0x11e   :  { %v5946_v13 = vor.u32 %v7687_v63, %v5945_v62  ;;  %1781 = vmatpush.bf16.msrb.mxu0 %v5594_v61  ;;  %v5929_v17 = vld [vmem:[#allocation3 + $0x4a0] sm:$0xf]  ;;  %v7683_v18 = vld [vmem:[#allocation3 + $0x4ac] sm:$0xf0]  ;;  %1756 = vmatmul.bf16.vlgmr.msra.gmra.mxu2 %v8340_v24  ;;  %v5531_v36 = vld [vmem:[#allocation3 + $0x190] sm:$0xf0] }
 0x11f   :  { %1800 = vmatpush.bf16.msrb.mxu2 %v5962_v56  ;;  %1794 = vmatpush.bf16.msrb.mxu1 %v5722_v6  ;;  %v5930_v26 = vor.u32 %v7683_v18, %v5929_v17  ;;  %v5913_v53 = vld [vmem:[#allocation3 + $0x480] sm:$0xf]  ;;  %v7679_v30 = vld [vmem:[#allocation3 + $0x48c] sm:$0xf0]  ;;  %v7613_v38 = vld [vmem:[#allocation3 + $0x284] sm:$0xf]  ;;  %v5534_v44 = vor.u32 %v7581_v35, %v5531_v36 }
 0x120   :  { %1813 = vmatpush.bf16.msrb.mxu3 %v5454_v60  ;;  %v5914_v37 = vor.u32 %v7679_v30, %v5913_v53  ;;  %v5659_v39 = vld [vmem:[#allocation3 + $0x290] sm:$0xf0]  ;;  %v5897_v41 = vld [vmem:[#allocation3 + $0x460] sm:$0xf]  ;;  %v7675_v43 = vld [vmem:[#allocation3 + $0x46c] sm:$0xf0] }
 0x121   :  { %1769 = vmatmul.bf16.vlgmr.msra.gmra.mxu3 %v8343_v32  ;;  %1782 = vmatmul.bf16.vlgmr.msrb.gmra.mxu0 %v8346_v42  ;;  %v7545_v45 = vld [vmem:[#allocation3 + $0x64] sm:$0xf]  ;;  %v5387_v46 = vld [vmem:[#allocation3 + $0x70] sm:$0xf0]  ;;  %v5662_v47 = vor.u32 %v7613_v38, %v5659_v39  ;;  %v5898_v50 = vor.u32 %v7675_v43, %v5897_v41  ;;  %v5881_v56 = vld [vmem:[#allocation3 + $0x440] sm:$0xf] }
 0x122   :  { %1826 = vmatpush.bf16.msra.mxu0 %v5582_v7  ;;  %1795 = vmatmul.bf16.vlgmr.msrb.gmra.mxu1 %v8349_v52  ;;  %v7577_v48 = vld [vmem:[#allocation3 + $0x164] sm:$0xf]  ;;  %v5515_v49 = vld [vmem:[#allocation3 + $0x170] sm:$0xf0]  ;;  %v5390_v55 = vor.u32 %v7545_v45, %v5387_v46  ;;  %v7671_v58 = vld [vmem:[#allocation3 + $0x44c] sm:$0xf0] }
 0x123   :  { %1839 = vmatpush.bf16.msra.mxu1 %v5710_v10  ;;  %1801 = vmatpush.bf16.msrb.mxu2 %v5946_v13  ;;  %v7609_v51 = vld [vmem:[#allocation3 + $0x264] sm:$0xf]  ;;  %v5643_v54 = vld [vmem:[#allocation3 + $0x270] sm:$0xf0]  ;;  %v5518_v59 = vor.u32 %v7577_v48, %v5515_v49  ;;  %v5882_v7 = vor.u32 %v7671_v58, %v5881_v56  ;;  %v5865_v11 = vld [vmem:[#allocation3 + $0x420] sm:$0xf] }
 0x124   :  { %1814 = vmatpush.bf16.msrb.mxu3 %v5438_v16  ;;  %v7541_v60 = vld [vmem:[#allocation3 + $0x44] sm:$0xf]  ;;  %v5371_v61 = vld [vmem:[#allocation3 + $0x50] sm:$0xf0]  ;;  %v5646_v62 = vor.u32 %v7609_v51, %v5643_v54  ;;  %v7667_v12 = vld [vmem:[#allocation3 + $0x42c] sm:$0xf0] }
 0x125   :  { %v7573_v63 = vld [vmem:[#allocation3 + $0x144] sm:$0xf]  ;;  %v5499_v6 = vld [vmem:[#allocation3 + $0x150] sm:$0xf0]  ;;  %v5374_v10 = vor.u32 %v7541_v60, %v5371_v61  ;;  %v5866_v20 = vor.u32 %v7667_v12, %v5865_v11  ;;  %v7663_v23 = vld [vmem:[#allocation3 + $0x40c] sm:$0xf0] }
 0x126   :  { %1827 = vmatpush.bf16.msra.mxu0 %v5566_v19  ;;  %v7605_v8 = vld [vmem:[#allocation3 + $0x244] sm:$0xf]  ;;  %v5627_v9 = vld [vmem:[#allocation3 + $0x250] sm:$0xf0]  ;;  %v5502_v13 = vor.u32 %v7573_v63, %v5499_v6  ;;  %v5457_v38 = vld [vmem:[#allocation3 + $0xe8] sm:$0xf] }
 0x127   :  { %1840 = vmatpush.bf16.msra.mxu1 %v5694_v22  ;;  %1802 = vmatpush.bf16.msrb.mxu2 %v5930_v26  ;;  %v7537_v14 = vld [vmem:[#allocation3 + $0x24] sm:$0xf]  ;;  %v5355_v15 = vld [vmem:[#allocation3 + $0x30] sm:$0xf0]  ;;  %v5630_v16 = vor.u32 %v7605_v8, %v5627_v9  ;;  %v5849_v22 = vld [vmem:[#allocation3 + $0x400] sm:$0xf] }
 0x128   :  { %1815 = vmatpush.bf16.msrb.mxu3 %v5422_v29  ;;  %v7569_v17 = vld [vmem:[#allocation3 + $0x124] sm:$0xf]  ;;  %v5483_v18 = vld [vmem:[#allocation3 + $0x130] sm:$0xf0]  ;;  %v5358_v25 = vor.u32 %v7537_v14, %v5355_v15  ;;  %v5850_v36 = vor.u32 %v7663_v23, %v5849_v22  ;;  %v7564_v39 = vld [vmem:[#allocation3 + $0xf4] sm:$0xf0] }
 0x129   :  { %v7601_v19 = vld [vmem:[#allocation3 + $0x224] sm:$0xf]  ;;  %v5611_v21 = vld [vmem:[#allocation3 + $0x230] sm:$0xf0]  ;;  %v5486_v29 = vor.u32 %v7569_v17, %v5483_v18  ;;  %v5585_v43 = vld [vmem:[#allocation3 + $0x1e8] sm:$0xf] }
 0x12a   :  { %1828 = vmatpush.bf16.msra.mxu0 %v5550_v57  ;;  %v7533_v26 = vld [vmem:[#allocation3 + $0x4] sm:$0xf]  ;;  %v5339_v27 = vld [vmem:[#allocation3 + $0x10] sm:$0xf0]  ;;  %v5614_v31 = vor.u32 %v7601_v19, %v5611_v21  ;;  %v5441_v56 = vld [vmem:[#allocation3 + $0xc8] sm:$0xf] }
 0x12b   :  { %1841 = vmatpush.bf16.msra.mxu1 %v5678_v34  ;;  %1803 = vmatpush.bf16.msrb.mxu2 %v5914_v37  ;;  %v7657_v28 = vld [vmem:[#allocation3 + $0x3e4] sm:$0xf]  ;;  %v5835_v53 = vld [vmem:[#allocation3 + $0x3f0] sm:$0xf0]  ;;  %v7560_v58 = vld [vmem:[#allocation3 + $0xd4] sm:$0xf0] }
 0x12c   :  { %1816 = vmatpush.bf16.msrb.mxu3 %v5406_v40  ;;  %v7689_v30 = vld [vmem:[#allocation3 + $0x4e4] sm:$0xf]  ;;  %v5963_v57 = vld [vmem:[#allocation3 + $0x4f0] sm:$0xf0]  ;;  %v5342_v40 = vor.u32 %v7533_v26, %v5339_v27  ;;  %v5838_v41 = vor.u32 %v7657_v28, %v5835_v53  ;;  %v5569_v60 = vld [vmem:[#allocation3 + $0x1c8] sm:$0xf] }
 0x12d   :  { %v7565_v33 = vld [vmem:[#allocation3 + $0x104] sm:$0xf]  ;;  %v5467_v34 = vld [vmem:[#allocation3 + $0x110] sm:$0xf0]  ;;  %v5966_v45 = vor.u32 %v7689_v30, %v5963_v57  ;;  %v7592_v61 = vld [vmem:[#allocation3 + $0x1d4] sm:$0xf0] }
 0x12e   :  { %1829 = vmatpush.bf16.msra.mxu0 %v5534_v44  ;;  %v7597_v35 = vld [vmem:[#allocation3 + $0x204] sm:$0xf]  ;;  %v5595_v37 = vld [vmem:[#allocation3 + $0x210] sm:$0xf0]  ;;  %v7596_v44 = vld [vmem:[#allocation3 + $0x1f4] sm:$0xf0]  ;;  %v5470_v46 = vor.u32 %v7565_v33, %v5467_v34 }
 0x12f   :  { %1842 = vmatpush.bf16.msra.mxu1 %v5662_v47  ;;  %1804 = vmatpush.bf16.msrb.mxu2 %v5898_v50  ;;  %v7653_v47 = vld [vmem:[#allocation3 + $0x3c4] sm:$0xf]  ;;  %v5819_v48 = vld [vmem:[#allocation3 + $0x3d0] sm:$0xf0]  ;;  %v5598_v49 = vor.u32 %v7597_v35, %v5595_v37  ;;  %v5458_v50 = vor.u32 %v7564_v39, %v5457_v38  ;;  %v5425_v11 = vld [vmem:[#allocation3 + $0xa8] sm:$0xf] }
 0x130   :  { %1817 = vmatpush.bf16.msrb.mxu3 %v5390_v55  ;;  %v7685_v51 = vld [vmem:[#allocation3 + $0x4c4] sm:$0xf]  ;;  %v5947_v54 = vld [vmem:[#allocation3 + $0x4d0] sm:$0xf0]  ;;  %v5586_v55 = vor.u32 %v7596_v44, %v5585_v43  ;;  %v7556_v12 = vld [vmem:[#allocation3 + $0xb4] sm:$0xf0] }
 0x131   :  { %v7649_v63 = vld [vmem:[#allocation3 + $0x3a4] sm:$0xf]  ;;  %v5803_v6 = vld [vmem:[#allocation3 + $0x3b0] sm:$0xf0]  ;;  %v5553_v14 = vld [vmem:[#allocation3 + $0x1a8] sm:$0xf]  ;;  %v5426_v19 = vor.u32 %v7556_v12, %v5425_v11 }
 0x132   :  { %1830 = vmatpush.bf16.msra.mxu0 %v5518_v59  ;;  %v5822_v59 = vor.u32 %v7653_v47, %v5819_v48  ;;  %v7681_v8 = vld [vmem:[#allocation3 + $0x4a4] sm:$0xf]  ;;  %v5931_v9 = vld [vmem:[#allocation3 + $0x4b0] sm:$0xf0]  ;;  %v7588_v15 = vld [vmem:[#allocation3 + $0x1b4] sm:$0xf0] }
 0x133   :  { %1843 = vmatpush.bf16.msra.mxu1 %v5646_v62  ;;  %1805 = vmatpush.bf16.msrb.mxu2 %v5882_v7  ;;  %v5950_v62 = vor.u32 %v7685_v51, %v5947_v54  ;;  %v5442_v7 = vor.u32 %v7560_v58, %v5441_v56  ;;  %v7645_v17 = vld [vmem:[#allocation3 + $0x384] sm:$0xf]  ;;  %v5787_v18 = vld [vmem:[#allocation3 + $0x390] sm:$0xf0]  ;;  %v5554_v22 = vor.u32 %v7588_v15, %v5553_v14  ;;  %v5409_v23 = vld [vmem:[#allocation3 + $0x88] sm:$0xf] }
 0x134   :  { %1818 = vmatpush.bf16.msrb.mxu3 %v5374_v10  ;;  %v5570_v10 = vor.u32 %v7592_v61, %v5569_v60  ;;  %v5915_v21 = vld [vmem:[#allocation3 + $0x490] sm:$0xf0]  ;;  %v5790_v26 = vor.u32 %v7645_v17, %v5787_v18  ;;  %v5537_v27 = vld [vmem:[#allocation3 + $0x188] sm:$0xf]  ;;  %v7584_v28 = vld [vmem:[#allocation3 + $0x194] sm:$0xf0] }
 0x135   :  { %v7641_v53 = vld [vmem:[#allocation3 + $0x364] sm:$0xf]  ;;  %v5771_v30 = vld [vmem:[#allocation3 + $0x370] sm:$0xf0]  ;;  %v5538_v34 = vor.u32 %v7584_v28, %v5537_v27  ;;  %v5393_v35 = vld [vmem:[#allocation3 + $0x68] sm:$0xf] }
 0x136   :  { %1831 = vmatpush.bf16.msra.mxu0 %v5502_v13  ;;  %v5806_v13 = vor.u32 %v7649_v63, %v5803_v6  ;;  %v5899_v33 = vld [vmem:[#allocation3 + $0x470] sm:$0xf0]  ;;  %v5774_v37 = vor.u32 %v7641_v53, %v5771_v30  ;;  %v5521_v38 = vld [vmem:[#allocation3 + $0x168] sm:$0xf]  ;;  %v7580_v39 = vld [vmem:[#allocation3 + $0x174] sm:$0xf0] }
 0x137   :  { %1844 = vmatpush.bf16.msra.mxu1 %v5630_v16  ;;  %1806 = vmatpush.bf16.msrb.mxu2 %v5866_v20  ;;  %v5934_v16 = vor.u32 %v7681_v8, %v5931_v9  ;;  %v7677_v20 = vld [vmem:[#allocation3 + $0x484] sm:$0xf]  ;;  %v5755_v43 = vld [vmem:[#allocation3 + $0x350] sm:$0xf0]  ;;  %v5522_v47 = vor.u32 %v7580_v39, %v5521_v38  ;;  %v5377_v48 = vld [vmem:[#allocation3 + $0x48] sm:$0xf] }
 0x138   :  { %1819 = vmatpush.bf16.msrb.mxu3 %v5358_v25  ;;  %v7552_v25 = vld [vmem:[#allocation3 + $0x94] sm:$0xf0]  ;;  %v5505_v51 = vld [vmem:[#allocation3 + $0x148] sm:$0xf]  ;;  %v7633_v56 = vld [vmem:[#allocation3 + $0x324] sm:$0xf] }
 0x139   :  { %v5410_v57 = vor.u32 %v7552_v25, %v5409_v23  ;;  %v7576_v54 = vld [vmem:[#allocation3 + $0x154] sm:$0xf0]  ;;  %v5739_v58 = vld [vmem:[#allocation3 + $0x330] sm:$0xf0]  ;;  %v7665_v60 = vld [vmem:[#allocation3 + $0x424] sm:$0xf] }
 0x13a   :  { %1832 = vmatpush.bf16.msra.mxu0 %v5486_v29  ;;  %v5918_v29 = vor.u32 %v7677_v20, %v5915_v21  ;;  %v5867_v61 = vld [vmem:[#allocation3 + $0x430] sm:$0xf0]  ;;  %v5361_v63 = vld [vmem:[#allocation3 + $0x28] sm:$0xf]  ;;  %v7540_v6 = vld [vmem:[#allocation3 + $0x34] sm:$0xf0]  ;;  %v5742_v8 = vor.u32 %v7633_v56, %v5739_v58 }
 0x13b   :  { %1845 = vmatpush.bf16.msra.mxu1 %v5614_v31  ;;  %1807 = vmatpush.bf16.msrb.mxu2 %v5850_v36  ;;  %v7673_v31 = vld [vmem:[#allocation3 + $0x464] sm:$0xf]  ;;  %v7548_v36 = vld [vmem:[#allocation3 + $0x74] sm:$0xf0]  ;;  %v5723_v11 = vld [vmem:[#allocation3 + $0x310] sm:$0xf0]  ;;  %v5870_v12 = vor.u32 %v7665_v60, %v5867_v61 }
 0x13c   :  { %1820 = vmatpush.bf16.msrb.mxu3 %v5342_v40  ;;  %v5902_v40 = vor.u32 %v7673_v31, %v5899_v33  ;;  %v5394_v44 = vor.u32 %v7548_v36, %v5393_v35  ;;  %v7572_v9 = vld [vmem:[#allocation3 + $0x134] sm:$0xf0]  ;;  %v5851_v14 = vld [vmem:[#allocation3 + $0x410] sm:$0xf0]  ;;  %v5713_v15 = vld [vmem:[#allocation3 + $0x2e8] sm:$0xf] }
 0x13d   :  { %v7628_v17 = vld [vmem:[#allocation3 + $0x2f4] sm:$0xf0]  ;;  %v5841_v18 = vld [vmem:[#allocation3 + $0x3e8] sm:$0xf]  ;;  %v7562_v30 = vld [vmem:[#allocation3 + $0xec] sm:$0xf] }
 0x13e   :  { %1833 = vmatpush.bf16.msra.mxu0 %v5470_v46  ;;  %1808 = vmatmul.bf16.vlgmr.msrb.gmra.mxu2 %v8352_v5  ;;  %v5883_v46 = vld [vmem:[#allocation3 + $0x450] sm:$0xf0]  ;;  %v5345_v21 = vld [vmem:[#allocation3 + $0x8] sm:$0xf]  ;;  %v7692_v28 = vld [vmem:[#allocation3 + $0x4f4] sm:$0xf0]  ;;  %v5714_v53 = vor.u32 %v7628_v17, %v5713_v15 }
 0x13f   :  { %1852 = vmatpush.bf16.msra.mxu2 %v5838_v41  ;;  %1846 = vmatpush.bf16.msra.mxu1 %v5598_v49  ;;  %v7637_v41 = vld [vmem:[#allocation3 + $0x344] sm:$0xf]  ;;  %v7544_v49 = vld [vmem:[#allocation3 + $0x54] sm:$0xf0]  ;;  %v5473_v23 = vld [vmem:[#allocation3 + $0x108] sm:$0xf] }
 0x140   :  { %1865 = vmatpush.bf16.msra.mxu3 %v5966_v45  ;;  %v7669_v45 = vld [vmem:[#allocation3 + $0x444] sm:$0xf]  ;;  %v5969_v27 = vld [vmem:[#allocation3 + $0x4e8] sm:$0xf]  ;;  %v7624_v35 = vld [vmem:[#allocation3 + $0x2d4] sm:$0xf0] }
 0x141   :  { %1821 = vmatmul.bf16.vlgmr.msrb.gmra.mxu3 %v8340_v24  ;;  %1834 = vmatmul.bf16.vlgmr.msra.gmra.mxu0 %v8343_v32  ;;  %v5825_v38 = vld [vmem:[#allocation3 + $0x3c8] sm:$0xf]  ;;  %v7656_v39 = vld [vmem:[#allocation3 + $0x3d4] sm:$0xf0]  ;;  %v7554_v60 = vld [vmem:[#allocation3 + $0xac] sm:$0xf] }
 0x142   :  { %1878 = vmatpush.bf16.msrb.mxu0 %v5458_v50  ;;  %1847 = vmatmul.bf16.vlgmr.msra.gmra.mxu1 %v8346_v42  ;;  %v5758_v50 = vor.u32 %v7637_v41, %v5755_v43  ;;  %v5953_v41 = vld [vmem:[#allocation3 + $0x4c8] sm:$0xf]  ;;  %v7688_v43 = vld [vmem:[#allocation3 + $0x4d4] sm:$0xf0]  ;;  %v5427_v61 = vld [vmem:[#allocation3 + $0xb8] sm:$0xf0] }
 0x143   :  { %1891 = vmatpush.bf16.msrb.mxu1 %v5586_v55  ;;  %1853 = vmatpush.bf16.msra.mxu2 %v5822_v59  ;;  %v5886_v55 = vor.u32 %v7669_v45, %v5883_v46  ;;  %v5378_v59 = vor.u32 %v7544_v49, %v5377_v48  ;;  %v7558_v45 = vld [vmem:[#allocation3 + $0xcc] sm:$0xf]  ;;  %v5443_v46 = vld [vmem:[#allocation3 + $0xd8] sm:$0xf0]  ;;  %v5681_v48 = vld [vmem:[#allocation3 + $0x2a8] sm:$0xf] }
 0x144   :  { %1866 = vmatpush.bf16.msra.mxu3 %v5950_v62  ;;  %v5506_v62 = vor.u32 %v7576_v54, %v5505_v51  ;;  %v7620_v49 = vld [vmem:[#allocation3 + $0x2b4] sm:$0xf0]  ;;  %v5809_v51 = vld [vmem:[#allocation3 + $0x3a8] sm:$0xf]  ;;  %v5411_v15 = vld [vmem:[#allocation3 + $0x98] sm:$0xf0] }
 0x145   :  { %v7652_v54 = vld [vmem:[#allocation3 + $0x3b4] sm:$0xf0]  ;;  %v5937_v56 = vld [vmem:[#allocation3 + $0x4a8] sm:$0xf] }
 0x146   :  { %1879 = vmatpush.bf16.msrb.mxu0 %v5442_v7  ;;  %v5489_v7 = vld [vmem:[#allocation3 + $0x128] sm:$0xf]  ;;  %v7684_v58 = vld [vmem:[#allocation3 + $0x4b4] sm:$0xf0] }
 0x147   :  { %1892 = vmatpush.bf16.msrb.mxu1 %v5570_v10  ;;  %1854 = vmatpush.bf16.msra.mxu2 %v5806_v13  ;;  %v7629_v10 = vld [vmem:[#allocation3 + $0x304] sm:$0xf]  ;;  %v5490_v20 = vor.u32 %v7572_v9, %v5489_v7  ;;  %v5938_v7 = vor.u32 %v7684_v58, %v5937_v56  ;;  %v7648_v9 = vld [vmem:[#allocation3 + $0x394] sm:$0xf0]  ;;  %v5649_v17 = vld [vmem:[#allocation3 + $0x268] sm:$0xf] }
 0x148   :  { %1867 = vmatpush.bf16.msra.mxu3 %v5934_v16  ;;  %v7661_v13 = vld [vmem:[#allocation3 + $0x404] sm:$0xf]  ;;  %v5362_v16 = vor.u32 %v7540_v6, %v5361_v63  ;;  %v5726_v25 = vor.u32 %v7629_v10, %v5723_v11  ;;  %v5665_v63 = vld [vmem:[#allocation3 + $0x288] sm:$0xf]  ;;  %v7616_v6 = vld [vmem:[#allocation3 + $0x294] sm:$0xf0]  ;;  %v5430_v10 = vor.u32 %v7554_v60, %v5427_v61 }
 0x149   :  { %v5921_v11 = vld [vmem:[#allocation3 + $0x488] sm:$0xf]  ;;  %v7600_v56 = vld [vmem:[#allocation3 + $0x214] sm:$0xf0]  ;;  %v7594_v61 = vld [vmem:[#allocation3 + $0x1ec] sm:$0xf] }
 0x14a   :  { %1880 = vmatpush.bf16.msrb.mxu0 %v5426_v19  ;;  %v7660_v19 = vld [vmem:[#allocation3 + $0x3f4] sm:$0xf0] }
 0x14b   :  { %1893 = vmatpush.bf16.msrb.mxu1 %v5554_v22  ;;  %1855 = vmatpush.bf16.msra.mxu2 %v5790_v26  ;;  %v7536_v22 = vld [vmem:[#allocation3 + $0x14] sm:$0xf0]  ;;  %v5842_v31 = vor.u32 %v7660_v19, %v5841_v18 }
 0x14c   :  { %1868 = vmatpush.bf16.msra.mxu3 %v5918_v29  ;;  %v7568_v26 = vld [vmem:[#allocation3 + $0x114] sm:$0xf0]  ;;  %v5854_v29 = vor.u32 %v7661_v13, %v5851_v14  ;;  %v5346_v33 = vor.u32 %v7536_v22, %v5345_v21  ;;  %v5666_v13 = vor.u32 %v7616_v6, %v5665_v63  ;;  %v7550_v14 = vld [vmem:[#allocation3 + $0x8c] sm:$0xf]  ;;  %v5587_v63 = vld [vmem:[#allocation3 + $0x1f8] sm:$0xf0] }
 0x14d   :  { %v5474_v36 = vor.u32 %v7568_v26, %v5473_v23  ;;  %v7612_v18 = vld [vmem:[#allocation3 + $0x274] sm:$0xf0]  ;;  %v5414_v22 = vor.u32 %v7550_v14, %v5411_v15  ;;  %v5905_v23 = vld [vmem:[#allocation3 + $0x468] sm:$0xf]  ;;  %v7626_v6 = vld [vmem:[#allocation3 + $0x2ec] sm:$0xf] }
 0x14e   :  { %1881 = vmatpush.bf16.msrb.mxu0 %v5410_v57  ;;  %v5459_v57 = vld [vmem:[#allocation3 + $0xf8] sm:$0xf0]  ;;  %v7644_v21 = vld [vmem:[#allocation3 + $0x374] sm:$0xf0]  ;;  %v5650_v26 = vor.u32 %v7612_v18, %v5649_v17  ;;  %v7658_v14 = vld [vmem:[#allocation3 + $0x3ec] sm:$0xf]  ;;  %v5590_v17 = vor.u32 %v7594_v61, %v5587_v63 }
 0x14f   :  { %1894 = vmatpush.bf16.msrb.mxu1 %v5538_v34  ;;  %1856 = vmatpush.bf16.msra.mxu2 %v5774_v37  ;;  %v5697_v34 = vld [vmem:[#allocation3 + $0x2c8] sm:$0xf]  ;;  %v5970_v37 = vor.u32 %v7692_v28, %v5969_v27  ;;  %v7546_v27 = vld [vmem:[#allocation3 + $0x6c] sm:$0xf]  ;;  %v5395_v28 = vld [vmem:[#allocation3 + $0x78] sm:$0xf0] }
 0x150   :  { %1869 = vmatpush.bf16.msra.mxu3 %v5902_v40  ;;  %v5462_v40 = vor.u32 %v7562_v30, %v5459_v57  ;;  %v7608_v30 = vld [vmem:[#allocation3 + $0x254] sm:$0xf0]  ;;  %v5843_v15 = vld [vmem:[#allocation3 + $0x3f8] sm:$0xf0]  ;;  %v7690_v18 = vld [vmem:[#allocation3 + $0x4ec] sm:$0xf] }
 0x151   :  { %v7632_v60 = vld [vmem:[#allocation3 + $0x314] sm:$0xf0]  ;;  %v5923_v61 = vld [vmem:[#allocation3 + $0x498] sm:$0xf0]  ;;  %v7578_v63 = vld [vmem:[#allocation3 + $0x16c] sm:$0xf] }
 0x152   :  { %1882 = vmatpush.bf16.msrb.mxu0 %v5394_v44  ;;  %v5698_v44 = vor.u32 %v7624_v35, %v5697_v34  ;;  %v5398_v34 = vor.u32 %v7546_v27, %v5395_v28  ;;  %v5889_v35 = vld [vmem:[#allocation3 + $0x448] sm:$0xf]  ;;  %v7622_v27 = vld [vmem:[#allocation3 + $0x2cc] sm:$0xf]  ;;  %v5699_v28 = vld [vmem:[#allocation3 + $0x2d8] sm:$0xf0] }
 0x153   :  { %1895 = vmatpush.bf16.msrb.mxu1 %v5522_v47  ;;  %1857 = vmatpush.bf16.msra.mxu2 %v5758_v50  ;;  %v5826_v47 = vor.u32 %v7656_v39, %v5825_v38  ;;  %v5954_v50 = vor.u32 %v7688_v43, %v5953_v41  ;;  %v7542_v38 = vld [vmem:[#allocation3 + $0x4c] sm:$0xf]  ;;  %v5379_v39 = vld [vmem:[#allocation3 + $0x58] sm:$0xf0]  ;;  %v5617_v41 = vld [vmem:[#allocation3 + $0x228] sm:$0xf] }
 0x154   :  { %1870 = vmatpush.bf16.msra.mxu3 %v5886_v55  ;;  %v5446_v55 = vor.u32 %v7558_v45, %v5443_v46  ;;  %v7604_v43 = vld [vmem:[#allocation3 + $0x234] sm:$0xf0]  ;;  %v5745_v45 = vld [vmem:[#allocation3 + $0x328] sm:$0xf] }
 0x155   :  { %v7636_v46 = vld [vmem:[#allocation3 + $0x334] sm:$0xf0] }
 0x156   :  { %1883 = vmatpush.bf16.msrb.mxu0 %v5378_v59  ;;  %v5682_v59 = vor.u32 %v7620_v49, %v5681_v48  ;;  %v5873_v48 = vld [vmem:[#allocation3 + $0x428] sm:$0xf]  ;;  %v7668_v49 = vld [vmem:[#allocation3 + $0x434] sm:$0xf0]  ;;  %v5746_v58 = vor.u32 %v7636_v46, %v5745_v45  ;;  %v7682_v45 = vld [vmem:[#allocation3 + $0x4ac] sm:$0xf] }
 0x157   :  { %1896 = vmatpush.bf16.msrb.mxu1 %v5506_v62  ;;  %1858 = vmatpush.bf16.msra.mxu2 %v5742_v8  ;;  %v5810_v62 = vor.u32 %v7652_v54, %v5809_v51  ;;  %v5793_v8 = vld [vmem:[#allocation3 + $0x388] sm:$0xf]  ;;  %v5618_v51 = vor.u32 %v7604_v43, %v5617_v41  ;;  %v5363_v54 = vld [vmem:[#allocation3 + $0x38] sm:$0xf0]  ;;  %v7650_v41 = vld [vmem:[#allocation3 + $0x3ac] sm:$0xf] }
 0x158   :  { %1871 = vmatpush.bf16.msra.mxu3 %v5870_v12  ;;  %v7680_v12 = vld [vmem:[#allocation3 + $0x494] sm:$0xf0]  ;;  %v5811_v43 = vld [vmem:[#allocation3 + $0x3b8] sm:$0xf0] }
 0x159   :  { %v5922_v19 = vor.u32 %v7680_v12, %v5921_v11  ;;  %v7534_v11 = vld [vmem:[#allocation3 + $0xc] sm:$0xf]  ;;  %v5939_v46 = vld [vmem:[#allocation3 + $0x4b8] sm:$0xf0] }
 0x15a   :  { %1884 = vmatpush.bf16.msrb.mxu0 %v5362_v16  ;;  %v5794_v16 = vor.u32 %v7648_v9, %v5793_v8  ;;  %v5857_v9 = vld [vmem:[#allocation3 + $0x408] sm:$0xf] }
 0x15b   :  { %1897 = vmatpush.bf16.msrb.mxu1 %v5490_v20  ;;  %1859 = vmatpush.bf16.msra.mxu2 %v5726_v25  ;;  %v5777_v20 = vld [vmem:[#allocation3 + $0x368] sm:$0xf]  ;;  %v7676_v25 = vld [vmem:[#allocation3 + $0x474] sm:$0xf0] }
 0x15c   :  { %1872 = vmatpush.bf16.msra.mxu3 %v5854_v29  ;;  %v5778_v29 = vor.u32 %v7644_v21, %v5777_v20  ;;  %v5906_v57 = vor.u32 %v7676_v25, %v5905_v23  ;;  %v5571_v23 = vld [vmem:[#allocation3 + $0x1d8] sm:$0xf0] }
 0x15e   :  { %1885 = vmatpush.bf16.msrb.mxu0 %v5346_v33  ;;  %1860 = vmatmul.bf16.vlgmr.msra.gmra.mxu2 %v8349_v52  ;;  %v7640_v33 = vld [vmem:[#allocation3 + $0x354] sm:$0xf0] }
 0x15f   :  { %1904 = vmatpush.bf16.msrb.mxu2 %v5714_v53  ;;  %1898 = vmatpush.bf16.msrb.mxu1 %v5474_v36  ;;  %v5633_v53 = vld [vmem:[#allocation3 + $0x248] sm:$0xf]  ;;  %v7672_v36 = vld [vmem:[#allocation3 + $0x454] sm:$0xf0] }
 0x160   :  { %1917 = vmatpush.bf16.msrb.mxu3 %v5842_v31  ;;  %v5761_v31 = vld [vmem:[#allocation3 + $0x348] sm:$0xf] }
 0x161   :  { %1873 = vmatmul.bf16.vlgmr.msra.gmra.mxu3 %v8352_v5  ;;  %1886 = vmatmul.bf16.vlgmr.msrb.gmra.mxu0 %v8340_v24 }
 0x162   :  { %1930 = vmatpush.bf16.msra.mxu0 %v5970_v37  ;;  %1899 = vmatmul.bf16.vlgmr.msrb.gmra.mxu1 %v8343_v32  ;;  %v5634_v37 = vor.u32 %v7608_v30, %v5633_v53  ;;  %v7654_v53 = vld [vmem:[#allocation3 + $0x3cc] sm:$0xf]  ;;  %v5827_v30 = vld [vmem:[#allocation3 + $0x3d8] sm:$0xf0] }
 0x163   :  { %1943 = vmatpush.bf16.msra.mxu1 %v5462_v40  ;;  %1905 = vmatpush.bf16.msrb.mxu2 %v5698_v44  ;;  %v5762_v40 = vor.u32 %v7640_v33, %v5761_v31  ;;  %v5890_v44 = vor.u32 %v7672_v36, %v5889_v35  ;;  %v7686_v31 = vld [vmem:[#allocation3 + $0x4cc] sm:$0xf]  ;;  %v5955_v33 = vld [vmem:[#allocation3 + $0x4d8] sm:$0xf0] }
 0x164   :  { %1918 = vmatpush.bf16.msrb.mxu3 %v5826_v47  ;;  %v5382_v47 = vor.u32 %v7542_v38, %v5379_v39  ;;  %v7586_v35 = vld [vmem:[#allocation3 + $0x1ac] sm:$0xf]  ;;  %v5555_v36 = vld [vmem:[#allocation3 + $0x1b8] sm:$0xf0] }
 0x165   :  { %v7618_v38 = vld [vmem:[#allocation3 + $0x2ac] sm:$0xf]  ;;  %v5683_v39 = vld [vmem:[#allocation3 + $0x2b8] sm:$0xf0] }
 0x166   :  { %1931 = vmatpush.bf16.msra.mxu0 %v5954_v50  ;;  %v7538_v50 = vld [vmem:[#allocation3 + $0x2c] sm:$0xf] }
 0x167   :  { %1944 = vmatpush.bf16.msra.mxu1 %v5446_v55  ;;  %1906 = vmatpush.bf16.msrb.mxu2 %v5682_v59  ;;  %v5601_v55 = vld [vmem:[#allocation3 + $0x208] sm:$0xf]  ;;  %v5366_v8 = vor.u32 %v7538_v50, %v5363_v54  ;;  %v5814_v50 = vor.u32 %v7650_v41, %v5811_v43  ;;  %v5667_v54 = vld [vmem:[#allocation3 + $0x298] sm:$0xf0] }
 0x168   :  { %1919 = vmatpush.bf16.msrb.mxu3 %v5810_v62  ;;  %v5729_v59 = vld [vmem:[#allocation3 + $0x308] sm:$0xf]  ;;  %v5874_v62 = vor.u32 %v7668_v49, %v5873_v48  ;;  %v5602_v12 = vor.u32 %v7600_v56, %v5601_v55  ;;  %v7582_v48 = vld [vmem:[#allocation3 + $0x18c] sm:$0xf]  ;;  %v5539_v49 = vld [vmem:[#allocation3 + $0x198] sm:$0xf0]  ;;  %v5942_v55 = vor.u32 %v7682_v45, %v5939_v46 }
 0x169   :  { %v7646_v56 = vld [vmem:[#allocation3 + $0x38c] sm:$0xf]  ;;  %v5475_v41 = vld [vmem:[#allocation3 + $0x118] sm:$0xf0] }
 0x16a   :  { %1932 = vmatpush.bf16.msra.mxu0 %v5938_v7  ;;  %v5715_v7 = vld [vmem:[#allocation3 + $0x2f8] sm:$0xf0] }
 0x16b   :  { %1945 = vmatpush.bf16.msra.mxu1 %v5430_v10  ;;  %1907 = vmatpush.bf16.msrb.mxu2 %v5666_v13  ;;  %v7664_v10 = vld [vmem:[#allocation3 + $0x414] sm:$0xf0]  ;;  %v5347_v13 = vld [vmem:[#allocation3 + $0x18] sm:$0xf0]  ;;  %v5718_v20 = vor.u32 %v7626_v6, %v5715_v7 }
 0x16c   :  { %1920 = vmatpush.bf16.msrb.mxu3 %v5794_v16  ;;  %v5730_v16 = vor.u32 %v7632_v60, %v5729_v59  ;;  %v5858_v21 = vor.u32 %v7664_v10, %v5857_v9  ;;  %v5350_v25 = vor.u32 %v7534_v11, %v5347_v13  ;;  %v5542_v59 = vor.u32 %v7582_v48, %v5539_v49  ;;  %v7678_v60 = vld [vmem:[#allocation3 + $0x48c] sm:$0xf]  ;;  %v5523_v6 = vld [vmem:[#allocation3 + $0x178] sm:$0xf0] }
 0x16d   :  { %v5651_v9 = vld [vmem:[#allocation3 + $0x278] sm:$0xf0]  ;;  %v5926_v10 = vor.u32 %v7678_v60, %v5923_v61  ;;  %v7642_v11 = vld [vmem:[#allocation3 + $0x36c] sm:$0xf] }
 0x16e   :  { %1933 = vmatpush.bf16.msra.mxu0 %v5922_v19  ;;  %v5971_v19 = vld [vmem:[#allocation3 + $0x4f8] sm:$0xf0]  ;;  %v7674_v13 = vld [vmem:[#allocation3 + $0x46c] sm:$0xf] }
 0x16f   :  { %1946 = vmatpush.bf16.msra.mxu1 %v5414_v22  ;;  %1908 = vmatpush.bf16.msrb.mxu2 %v5650_v26  ;;  %v7590_v22 = vld [vmem:[#allocation3 + $0x1cc] sm:$0xf]  ;;  %v5846_v26 = vor.u32 %v7658_v14, %v5843_v15  ;;  %v5907_v14 = vld [vmem:[#allocation3 + $0x478] sm:$0xf0] }
 0x170   :  { %1921 = vmatpush.bf16.msrb.mxu3 %v5778_v29  ;;  %v5974_v29 = vor.u32 %v7690_v18, %v5971_v19  ;;  %v7606_v19 = vld [vmem:[#allocation3 + $0x24c] sm:$0xf]  ;;  %v5603_v45 = vld [vmem:[#allocation3 + $0x218] sm:$0xf0] }
 0x171   :  { %v5731_v48 = vld [vmem:[#allocation3 + $0x318] sm:$0xf0] }
 0x172   :  { %1934 = vmatpush.bf16.msra.mxu0 %v5906_v57  ;;  %v5574_v57 = vor.u32 %v7590_v22, %v5571_v23  ;;  %v7638_v22 = vld [vmem:[#allocation3 + $0x34c] sm:$0xf]  ;;  %v5763_v23 = vld [vmem:[#allocation3 + $0x358] sm:$0xf0] }
 0x173   :  { %1947 = vmatpush.bf16.msra.mxu1 %v5398_v34  ;;  %1909 = vmatpush.bf16.msrb.mxu2 %v5634_v37  ;;  %v5702_v34 = vor.u32 %v7622_v27, %v5699_v28  ;;  %v5830_v37 = vor.u32 %v7654_v53, %v5827_v30  ;;  %v5891_v27 = vld [vmem:[#allocation3 + $0x458] sm:$0xf0]  ;;  %v5766_v30 = vor.u32 %v7638_v22, %v5763_v23 }
 0x174   :  { %1922 = vmatpush.bf16.msrb.mxu3 %v5762_v40  ;;  %v5958_v40 = vor.u32 %v7686_v31, %v5955_v33  ;;  %v5491_v53 = vld [vmem:[#allocation3 + $0x138] sm:$0xf0] }
 0x175   :  { %v5619_v31 = vld [vmem:[#allocation3 + $0x238] sm:$0xf0] }
 0x176   :  { %1935 = vmatpush.bf16.msra.mxu0 %v5890_v44  ;;  %v5558_v44 = vor.u32 %v7586_v35, %v5555_v36  ;;  %v5747_v35 = vld [vmem:[#allocation3 + $0x338] sm:$0xf0] }
 0x177   :  { %1948 = vmatpush.bf16.msra.mxu1 %v5382_v47  ;;  %1910 = vmatpush.bf16.msrb.mxu2 %v5618_v51  ;;  %v5686_v47 = vor.u32 %v7618_v38, %v5683_v39  ;;  %v7614_v51 = vld [vmem:[#allocation3 + $0x28c] sm:$0xf]  ;;  %v5875_v38 = vld [vmem:[#allocation3 + $0x438] sm:$0xf0] }
 0x178   :  { %1923 = vmatpush.bf16.msrb.mxu3 %v5746_v58  ;;  %v5795_v58 = vld [vmem:[#allocation3 + $0x398] sm:$0xf0] }
 0x179   :  { %v5798_v7 = vor.u32 %v7646_v56, %v5795_v58 }
 0x17a   :  { %1936 = vmatpush.bf16.msra.mxu0 %v5874_v62  ;;  %v5670_v62 = vor.u32 %v7614_v51, %v5667_v54  ;;  %v5859_v51 = vld [vmem:[#allocation3 + $0x418] sm:$0xf0] }
 0x17b   :  { %1949 = vmatpush.bf16.msra.mxu1 %v5366_v8  ;;  %1911 = vmatpush.bf16.msrb.mxu2 %v5602_v12  ;;  %v7610_v8 = vld [vmem:[#allocation3 + $0x26c] sm:$0xf]  ;;  %v5526_v12 = vor.u32 %v7578_v63, %v5523_v6 }
 0x17c   :  { %1924 = vmatpush.bf16.msrb.mxu3 %v5730_v16  ;;  %v5654_v15 = vor.u32 %v7610_v8, %v5651_v9  ;;  %v7574_v16 = vld [vmem:[#allocation3 + $0x14c] sm:$0xf] }
 0x17e   :  { %1937 = vmatpush.bf16.msra.mxu0 %v5858_v21  ;;  %1912 = vmatmul.bf16.vlgmr.msrb.gmra.mxu2 %v8346_v42  ;;  %v5910_v21 = vor.u32 %v7674_v13, %v5907_v14 }
 0x17f   :  { %1956 = vmatpush.bf16.msra.mxu2 %v5590_v17  ;;  %1950 = vmatpush.bf16.msra.mxu1 %v5350_v25  ;;  %v5507_v17 = vld [vmem:[#allocation3 + $0x158] sm:$0xf0] }
 0x180   :  { %1969 = vmatpush.bf16.msra.mxu3 %v5718_v20  ;;  %v5635_v20 = vld [vmem:[#allocation3 + $0x258] sm:$0xf0]  ;;  %v5510_v25 = vor.u32 %v7574_v16, %v5507_v17 }
 0x181   :  { %1925 = vmatmul.bf16.vlgmr.msrb.gmra.mxu3 %v8349_v52  ;;  %1938 = vmatmul.bf16.vlgmr.msra.gmra.mxu0 %v8352_v5  ;;  %v5638_v28 = vor.u32 %v7606_v19, %v5635_v20 }
 0x182   :  { %1982 = vmatpush.bf16.msrb.mxu0 %v5846_v26  ;;  %1951 = vmatmul.bf16.vlgmr.msra.gmra.mxu1 %v8340_v24  ;;  %v5779_v24 = vld [vmem:[#allocation3 + $0x378] sm:$0xf0]  ;;  %v7670_v26 = vld [vmem:[#allocation3 + $0x44c] sm:$0xf] }
 0x183   :  { %1995 = vmatpush.bf16.msrb.mxu1 %v5974_v29  ;;  %1957 = vmatpush.bf16.msra.mxu2 %v5574_v57  ;;  %v5782_v18 = vor.u32 %v7642_v11, %v5779_v24  ;;  %v7570_v29 = vld [vmem:[#allocation3 + $0x12c] sm:$0xf]  ;;  %v5894_v33 = vor.u32 %v7670_v26, %v5891_v27 }
 0x184   :  { %1970 = vmatpush.bf16.msra.mxu3 %v5702_v34  ;;  %v7602_v57 = vld [vmem:[#allocation3 + $0x22c] sm:$0xf]  ;;  %v5494_v36 = vor.u32 %v7570_v29, %v5491_v53 }
 0x185   :  { %v7634_v34 = vld [vmem:[#allocation3 + $0x32c] sm:$0xf]  ;;  %v5622_v39 = vor.u32 %v7602_v57, %v5619_v31 }
 0x186   :  { %1983 = vmatpush.bf16.msrb.mxu0 %v5830_v37  ;;  %v7666_v37 = vld [vmem:[#allocation3 + $0x42c] sm:$0xf]  ;;  %v5750_v43 = vor.u32 %v7634_v34, %v5747_v35 }
 0x187   :  { %1996 = vmatpush.bf16.msrb.mxu1 %v5958_v40  ;;  %1958 = vmatpush.bf16.msra.mxu2 %v5558_v44  ;;  %v7566_v40 = vld [vmem:[#allocation3 + $0x10c] sm:$0xf]  ;;  %v5878_v46 = vor.u32 %v7666_v37, %v5875_v38  ;;  %v946_v37 = vperm.slane %v8295_v2, 1 }
 0x188   :  { %1971 = vmatpush.bf16.msra.mxu3 %v5686_v47  ;;  %v7598_v44 = vld [vmem:[#allocation3 + $0x20c] sm:$0xf]  ;;  %v5478_v49 = vor.u32 %v7566_v40, %v5475_v41 }
 0x189   :  { %v7630_v47 = vld [vmem:[#allocation3 + $0x30c] sm:$0xf]  ;;  %v5606_v54 = vor.u32 %v7598_v44, %v5603_v45 }
 0x18a   :  { %1984 = vmatpush.bf16.msrb.mxu0 %v5814_v50  ;;  %v7662_v50 = vld [vmem:[#allocation3 + $0x40c] sm:$0xf] }
 0x18b   :  { %1997 = vmatpush.bf16.msrb.mxu1 %v5942_v55  ;;  %1959 = vmatpush.bf16.msra.mxu2 %v5542_v59  ;;  %v5734_v55 = vor.u32 %v7630_v47, %v5731_v48  ;;  %v5862_v56 = vor.u32 %v7662_v50, %v5859_v51  ;;  %v944_v59 = vperm.slane %v8285_v0, 1 }
 0x18c   :  { %1972 = vmatpush.bf16.msra.mxu3 %v5670_v62 }
 0x18e   :  { %1985 = vmatpush.bf16.msrb.mxu0 %v5798_v7 }
 0x18f   :  { %1998 = vmatpush.bf16.msrb.mxu1 %v5926_v10  ;;  %1960 = vmatpush.bf16.msra.mxu2 %v5526_v12 }
 0x190   :  { %1973 = vmatpush.bf16.msra.mxu3 %v5654_v15 }
 0x192   :  { %1986 = vmatpush.bf16.msrb.mxu0 %v5782_v18 }
 0x193   :  { %1999 = vmatpush.bf16.msrb.mxu1 %v5910_v21  ;;  %1961 = vmatpush.bf16.msra.mxu2 %v5510_v25 }
 0x194   :  { %1974 = vmatpush.bf16.msra.mxu3 %v5638_v28 }
 0x196   :  { %1987 = vmatpush.bf16.msrb.mxu0 %v5766_v30 }
 0x197   :  { %2000 = vmatpush.bf16.msrb.mxu1 %v5894_v33  ;;  %1962 = vmatpush.bf16.msra.mxu2 %v5494_v36 }
 0x198   :  { %1975 = vmatpush.bf16.msra.mxu3 %v5622_v39 }
 0x19a   :  { %1988 = vmatpush.bf16.msrb.mxu0 %v5750_v43 }
 0x19b   :  { %2001 = vmatpush.bf16.msrb.mxu1 %v5878_v46  ;;  %1963 = vmatpush.bf16.msra.mxu2 %v5478_v49 }
 0x19c   :  { %1976 = vmatpush.bf16.msra.mxu3 %v5606_v54 }
 0x19e   :  { %1989 = vmatpush.bf16.msrb.mxu0 %v5734_v55  ;;  %1964 = vmatmul.bf16.vlgmr.msra.gmra.mxu2 %v8343_v32  ;;  %v1783_v58 = vpop.f32.mrf.mxu0 }
 0x19f   :  { %2002 = vmatpush.bf16.msrb.mxu1 %v5862_v56  ;;  %1977 = vmatmul.bf16.vlgmr.msra.gmra.mxu3 %v8346_v42  ;;  %v1796_v60 = vpop.f32.mrf.mxu1 }
 0x1a1   :  { %1990 = vmatmul.bf16.vlgmr.msrb.gmra.mxu0 %v8349_v52  ;;  %v1757_v61 = vpop.f32.mrf.mxu2  ;;  %v945_v52 = vperm.slane %v8290_v1, 1 }
 0x1a2   :  { %2003 = vmatmul.bf16.vlgmr.msrb.gmra.mxu1 %v8352_v5  ;;  %v1758_v62 = vadd.f32 %v1757_v61, %v944_v59 }
 0x1a4   :  { %v1770_v63 = vpop.f32.mrf.mxu3 }
 0x1a5   :  { %v1771_v6 = vadd.f32 %v1770_v63, %v1758_v62 }
 0x1a6   :  { %v1785_v7 = vpop.f32.mrf.mxu0 }
 0x1a7   :  { %v1784_v8 = vadd.f32 %v1783_v58, %v1771_v6  ;;  %v1798_v9 = vpop.f32.mrf.mxu1  ;;  %v947_v58 = vperm.slane %v8300_v3, 1 }
 0x1a9   :  { %v1797_v10 = vadd.f32 %v1796_v60, %v1784_v8  ;;  %v1759_v32 = vpop.f32.mrf.mxu2 }
 0x1ac   :  { %v1772_v11 = vpop.f32.mrf.mxu3 }
 0x1be   :  { %v1835_v24 = vpop.f32.mrf.mxu0 }
 0x1bf   :  { %v1848_v42 = vpop.f32.mrf.mxu1 }
 0x1c1   :  { %v1809_v12 = vpop.f32.mrf.mxu2 }
 0x1c2   :  { %v1810_v5 = vadd.f32 %v1809_v12, %v1797_v10 }
 0x1c4   :  { %v1822_v13 = vpop.f32.mrf.mxu3  ;;  %v2008_v15 = vmul.f32 0.22916667, %v1810_v5 }
 0x1c5   :  { %v1823_v14 = vadd.f32 %v1822_v13, %v945_v52 }
 0x1c6   :  { %v1837_v17 = vpop.f32.mrf.mxu0  ;;  %v2012_v18 = vmax.f32 %v1810_v5, %v2008_v15 }
 0x1c7   :  { %v1836_v16 = vadd.f32 %v1835_v24, %v1823_v14  ;;  %v1850_v19 = vpop.f32.mrf.mxu1 }
 0x1c8   :  { %v8376_v21 = vpack.c.bf16 %v2012_v18, %v2012_v18 }
 0x1c9   :  { %v1849_v20 = vadd.f32 %v1848_v42, %v1836_v16  ;;  %v1811_v22 = vpop.f32.mrf.mxu2 }
 0x1cc   :  { %v1824_v23 = vpop.f32.mrf.mxu3 }
 0x1de   :  { %v1887_v25 = vpop.f32.mrf.mxu0 }
 0x1df   :  { %v1900_v26 = vpop.f32.mrf.mxu1  ;;  %v1888_v38 = vadd.f32 %v1887_v25, %v946_v37 }
 0x1e1   :  { %v1861_v27 = vpop.f32.mrf.mxu2  ;;  %v1901_v40 = vadd.f32 %v1900_v26, %v1888_v38 }
 0x1e2   :  { %v1862_v28 = vadd.f32 %v1861_v27, %v1849_v20 }
 0x1e4   :  { %v1874_v29 = vpop.f32.mrf.mxu3 }
 0x1e5   :  { %v1875_v53 = vadd.f32 %v1874_v29, %v1862_v28 }
 0x1e6   :  { %v1889_v30 = vpop.f32.mrf.mxu0 }
 0x1e7   :  { %v2009_v57 = vmul.f32 0.22916667, %v1875_v53  ;;  %v1902_v31 = vpop.f32.mrf.mxu1 }
 0x1e9   :  { %v2013_v33 = vmax.f32 %v1875_v53, %v2009_v57  ;;  %v1863_v34 = vpop.f32.mrf.mxu2 }
 0x1eb   :  { %v8378_v35 = vpack.c.bf16 %v2013_v33, %v2013_v33 }
 0x1ec   :  { %v1876_v36 = vpop.f32.mrf.mxu3 }
 0x1fe   :  { %v1939_v39 = vpop.f32.mrf.mxu0 }
 0x1ff   :  { %v1952_v41 = vpop.f32.mrf.mxu1 }
 0x200   :  { %v1953_v61 = vadd.f32 %v1952_v41, %v947_v58 }
 0x201   :  { %v1913_v43 = vpop.f32.mrf.mxu2 }
 0x202   :  { %v1914_v44 = vadd.f32 %v1913_v43, %v1901_v40 }
 0x204   :  { %v1926_v45 = vpop.f32.mrf.mxu3 }
 0x205   :  { %v1927_v46 = vadd.f32 %v1926_v45, %v1914_v44 }
 0x206   :  { %v1941_v47 = vpop.f32.mrf.mxu0 }
 0x207   :  { %v1940_v48 = vadd.f32 %v1939_v39, %v1927_v46  ;;  %v1954_v49 = vpop.f32.mrf.mxu1 }
 0x209   :  { %v2010_v50 = vmul.f32 0.22916667, %v1940_v48  ;;  %v1915_v51 = vpop.f32.mrf.mxu2 }
 0x20b   :  { %v2014_v54 = vmax.f32 %v1940_v48, %v2010_v50 }
 0x20c   :  { %v1928_v55 = vpop.f32.mrf.mxu3 }
 0x20d   :  { %v8381_v56 = vpack.c.bf16 %v2014_v54, %v2014_v54 }
 0x21e   :  { %v1991_v59 = vpop.f32.mrf.mxu0 }
 0x21f   :  { %v2004_v60 = vpop.f32.mrf.mxu1 }
 0x221   :  { %v1965_v62 = vpop.f32.mrf.mxu2 }
 0x222   :  { %v1966_v63 = vadd.f32 %v1965_v62, %v1953_v61  ;;  %v1978_v6 = vpop.f32.mrf.mxu3 }
 0x224   :  { %v1979_v7 = vadd.f32 %v1978_v6, %v1966_v63 }
 0x226   :  { %v1993_v8 = vpop.f32.mrf.mxu0  ;;  %v1992_v9 = vadd.f32 %v1991_v59, %v1979_v7 }
 0x227   :  { %v2006_v10 = vpop.f32.mrf.mxu1 }
 0x228   :  { %v2005_v32 = vadd.f32 %v2004_v60, %v1992_v9 }
 0x229   :  { %v1967_v11 = vpop.f32.mrf.mxu2 }
 0x22a   :  { %v2011_v24 = vmul.f32 0.22916667, %v2005_v32  ;;  %v1980_v42 = vpop.f32.mrf.mxu3 }
 0x22c   :  { %v2015_v52 = vmax.f32 %v2005_v32, %v2011_v24 }
 0x22e   :  { %v8384_v12 = vpack.c.bf16 %v2015_v52, %v2015_v52 }
 0x22f   :  { %8215 = dma.done.wait [#allocation8 + $0x2], 8192 }
 0x230   :  { %8216 = vsyncadd [#allocation8 + $0x2], 4294959104  ;;  %v6033_v5 = vld [vmem:[#allocation4 + $0x70] sm:$0xf]  ;;  %v7708_v13 = vld [vmem:[#allocation4 + $0x74] sm:$0xf0] }
 0x231   :  { %v6097_v14 = vld [vmem:[#allocation4 + $0xf0] sm:$0xf]  ;;  %v6034_v15 = vor.u32 %v7708_v13, %v6033_v5  ;;  %v7724_v16 = vld [vmem:[#allocation4 + $0xf4] sm:$0xf0]  ;;  %v6025_v22 = vld [vmem:[#allocation4 + $0x60] sm:$0xf] }
 0x232   :  { %v6161_v17 = vld [vmem:[#allocation4 + $0x170] sm:$0xf]  ;;  %v7740_v18 = vld [vmem:[#allocation4 + $0x174] sm:$0xf0]  ;;  %v6098_v19 = vor.u32 %v7724_v16, %v6097_v14  ;;  %v7706_v23 = vld [vmem:[#allocation4 + $0x64] sm:$0xf0] }
 0x233   :  { %v6162_v20 = vor.u32 %v7740_v18, %v6161_v17  ;;  %v6089_v25 = vld [vmem:[#allocation4 + $0xe0] sm:$0xf]  ;;  %2410 = vmatpush.bf16.msrb.mxu2 %v6034_v15  ;;  %v6026_v26 = vor.u32 %v7706_v23, %v6025_v22  ;;  %v7722_v27 = vld [vmem:[#allocation4 + $0xe4] sm:$0xf0]  ;;  %v6225_v28 = vld [vmem:[#allocation4 + $0x1f0] sm:$0xf] }
 0x234   :  { %v7756_v29 = vld [vmem:[#allocation4 + $0x1f4] sm:$0xf0]  ;;  %2423 = vmatpush.bf16.msrb.mxu3 %v6098_v19  ;;  %v6090_v53 = vor.u32 %v7722_v27, %v6089_v25  ;;  %v6153_v57 = vld [vmem:[#allocation4 + $0x160] sm:$0xf]  ;;  %v7738_v31 = vld [vmem:[#allocation4 + $0x164] sm:$0xf0] }
 0x235   :  { %2436 = vmatpush.bf16.msra.mxu0 %v6162_v20  ;;  %v6226_v30 = vor.u32 %v7756_v29, %v6225_v28  ;;  %v6017_v33 = vld [vmem:[#allocation4 + $0x50] sm:$0xf]  ;;  %v6154_v34 = vor.u32 %v7738_v31, %v6153_v57  ;;  %v7704_v36 = vld [vmem:[#allocation4 + $0x54] sm:$0xf0]  ;;  %v6217_v39 = vld [vmem:[#allocation4 + $0x1e0] sm:$0xf] }
 0x236   :  { %v6081_v37 = vld [vmem:[#allocation4 + $0xd0] sm:$0xf]  ;;  %v7720_v38 = vld [vmem:[#allocation4 + $0xd4] sm:$0xf0]  ;;  %v7754_v40 = vld [vmem:[#allocation4 + $0x1e4] sm:$0xf0]  ;;  %v6018_v43 = vor.u32 %v7704_v36, %v6017_v33 }
 0x237   :  { %2449 = vmatpush.bf16.msra.mxu1 %v6226_v30  ;;  %v6145_v41 = vld [vmem:[#allocation4 + $0x150] sm:$0xf]  ;;  %2411 = vmatpush.bf16.msrb.mxu2 %v6026_v26  ;;  %v6218_v44 = vor.u32 %v7754_v40, %v6217_v39  ;;  %v7736_v45 = vld [vmem:[#allocation4 + $0x154] sm:$0xf0]  ;;  %v6009_v46 = vld [vmem:[#allocation4 + $0x40] sm:$0xf]  ;;  %v6082_v48 = vor.u32 %v7720_v38, %v6081_v37 }
 0x238   :  { %v7702_v47 = vld [vmem:[#allocation4 + $0x44] sm:$0xf0]  ;;  %2424 = vmatpush.bf16.msrb.mxu3 %v6090_v53  ;;  %v6146_v49 = vor.u32 %v7736_v45, %v6145_v41  ;;  %v6073_v50 = vld [vmem:[#allocation4 + $0xc0] sm:$0xf]  ;;  %v6209_v54 = vld [vmem:[#allocation4 + $0x1d0] sm:$0xf] }
 0x239   :  { %2437 = vmatpush.bf16.msra.mxu0 %v6154_v34  ;;  %v7718_v51 = vld [vmem:[#allocation4 + $0xc4] sm:$0xf0]  ;;  %v7752_v55 = vld [vmem:[#allocation4 + $0x1d4] sm:$0xf0]  ;;  %v6137_v58 = vld [vmem:[#allocation4 + $0x140] sm:$0xf]  ;;  %v6010_v61 = vor.u32 %v7702_v47, %v6009_v46 }
 0x23a   :  { %v7734_v59 = vld [vmem:[#allocation4 + $0x144] sm:$0xf0]  ;;  %v6210_v60 = vor.u32 %v7752_v55, %v6209_v54  ;;  %v6201_v62 = vld [vmem:[#allocation4 + $0x1c0] sm:$0xf]  ;;  %v6074_v6 = vor.u32 %v7718_v51, %v6073_v50  ;;  %v6001_v8 = vld [vmem:[#allocation4 + $0x30] sm:$0xf] }
 0x23b   :  { %2450 = vmatpush.bf16.msra.mxu1 %v6218_v44  ;;  %2412 = vmatpush.bf16.msrb.mxu2 %v6018_v43  ;;  %v7750_v63 = vld [vmem:[#allocation4 + $0x1c4] sm:$0xf0]  ;;  %v6138_v7 = vor.u32 %v7734_v59, %v6137_v58  ;;  %v7700_v9 = vld [vmem:[#allocation4 + $0x34] sm:$0xf0]  ;;  %v6065_v10 = vld [vmem:[#allocation4 + $0xb0] sm:$0xf] }
 0x23c   :  { %2425 = vmatpush.bf16.msrb.mxu3 %v6082_v48  ;;  %v7716_v32 = vld [vmem:[#allocation4 + $0xb4] sm:$0xf0]  ;;  %v6129_v11 = vld [vmem:[#allocation4 + $0x130] sm:$0xf]  ;;  %v6202_v42 = vor.u32 %v7750_v63, %v6201_v62  ;;  %v6002_v52 = vor.u32 %v7700_v9, %v6001_v8  ;;  %v5993_v16 = vld [vmem:[#allocation4 + $0x20] sm:$0xf] }
 0x23d   :  { %2438 = vmatpush.bf16.msra.mxu0 %v6146_v49  ;;  %v7732_v24 = vld [vmem:[#allocation4 + $0x134] sm:$0xf0]  ;;  %v6193_v5 = vld [vmem:[#allocation4 + $0x1b0] sm:$0xf]  ;;  %v6066_v14 = vor.u32 %v7716_v32, %v6065_v10  ;;  %v7698_v17 = vld [vmem:[#allocation4 + $0x24] sm:$0xf0] }
 0x23e   :  { %v7748_v13 = vld [vmem:[#allocation4 + $0x1b4] sm:$0xf0]  ;;  %v6130_v15 = vor.u32 %v7732_v24, %v6129_v11  ;;  %v6057_v18 = vld [vmem:[#allocation4 + $0xa0] sm:$0xf]  ;;  %v7714_v19 = vld [vmem:[#allocation4 + $0xa4] sm:$0xf0]  ;;  %v5994_v25 = vor.u32 %v7698_v17, %v5993_v16 }
 0x23f   :  { %2451 = vmatpush.bf16.msra.mxu1 %v6210_v60  ;;  %2413 = vmatpush.bf16.msrb.mxu2 %v6010_v61  ;;  %v6121_v20 = vld [vmem:[#allocation4 + $0x120] sm:$0xf]  ;;  %v7730_v22 = vld [vmem:[#allocation4 + $0x124] sm:$0xf0]  ;;  %v6194_v23 = vor.u32 %v7748_v13, %v6193_v5  ;;  %v6058_v28 = vor.u32 %v7714_v19, %v6057_v18  ;;  %v5985_v53 = vld [vmem:[#allocation4 + $0x10] sm:$0xf] }
 0x240   :  { %2426 = vmatpush.bf16.msrb.mxu3 %v6074_v6  ;;  %v6185_v26 = vld [vmem:[#allocation4 + $0x1a0] sm:$0xf]  ;;  %v7746_v27 = vld [vmem:[#allocation4 + $0x1a4] sm:$0xf0]  ;;  %v6122_v29 = vor.u32 %v7730_v22, %v6121_v20  ;;  %v7696_v30 = vld [vmem:[#allocation4 + $0x14] sm:$0xf0] }
 0x241   :  { %2439 = vmatpush.bf16.msra.mxu0 %v6138_v7  ;;  %v6049_v57 = vld [vmem:[#allocation4 + $0x90] sm:$0xf]  ;;  %v7712_v31 = vld [vmem:[#allocation4 + $0x94] sm:$0xf0]  ;;  %v6186_v36 = vor.u32 %v7746_v27, %v6185_v26  ;;  %v5977_v37 = vld [vmem:[#allocation4] sm:$0xf]  ;;  %v5986_v38 = vor.u32 %v7696_v30, %v5985_v53 }
 0x242   :  { %v6113_v33 = vld [vmem:[#allocation4 + $0x110] sm:$0xf]  ;;  %v7728_v34 = vld [vmem:[#allocation4 + $0x114] sm:$0xf0]  ;;  %v7694_v39 = vld [vmem:[#allocation4 + $0x4] sm:$0xf0]  ;;  %v6050_v43 = vor.u32 %v7712_v31, %v6049_v57 }
 0x243   :  { %2452 = vmatpush.bf16.msra.mxu1 %v6202_v42  ;;  %2414 = vmatpush.bf16.msrb.mxu2 %v6002_v52  ;;  %v6177_v40 = vld [vmem:[#allocation4 + $0x190] sm:$0xf]  ;;  %v7744_v41 = vld [vmem:[#allocation4 + $0x194] sm:$0xf0]  ;;  %v6114_v44 = vor.u32 %v7728_v34, %v6113_v33  ;;  %v6041_v45 = vld [vmem:[#allocation4 + $0x80] sm:$0xf]  ;;  %v5978_v59 = vor.u32 %v7694_v39, %v5977_v37 }
 0x244   :  { %2427 = vmatpush.bf16.msrb.mxu3 %v6066_v14  ;;  %v7710_v46 = vld [vmem:[#allocation4 + $0x84] sm:$0xf0]  ;;  %v7707_v47 = vld [vmem:[#allocation4 + $0x74] sm:$0xf]  ;;  %v6035_v48 = vld [vmem:[#allocation4 + $0x78] sm:$0xf0]  ;;  %v6178_v51 = vor.u32 %v7744_v41, %v6177_v40 }
 0x245   :  { %2440 = vmatpush.bf16.msra.mxu0 %v6130_v15  ;;  %v7723_v49 = vld [vmem:[#allocation4 + $0xf4] sm:$0xf]  ;;  %v6099_v50 = vld [vmem:[#allocation4 + $0xf8] sm:$0xf0]  ;;  %v6105_v54 = vld [vmem:[#allocation4 + $0x100] sm:$0xf]  ;;  %v6042_v63 = vor.u32 %v7710_v46, %v6041_v45  ;;  %v6038_v6 = vor.u32 %v7707_v47, %v6035_v48 }
 0x246   :  { %v7726_v55 = vld [vmem:[#allocation4 + $0x104] sm:$0xf0]  ;;  %v7739_v58 = vld [vmem:[#allocation4 + $0x174] sm:$0xf]  ;;  %v6163_v60 = vld [vmem:[#allocation4 + $0x178] sm:$0xf0]  ;;  %v6102_v9 = vor.u32 %v7723_v49, %v6099_v50 }
 0x247   :  { %2453 = vmatpush.bf16.msra.mxu1 %v6194_v23  ;;  %2415 = vmatpush.bf16.msrb.mxu2 %v5994_v25  ;;  %v6169_v61 = vld [vmem:[#allocation4 + $0x180] sm:$0xf]  ;;  %v7742_v62 = vld [vmem:[#allocation4 + $0x184] sm:$0xf0]  ;;  %v7755_v7 = vld [vmem:[#allocation4 + $0x1f4] sm:$0xf]  ;;  %v6106_v10 = vor.u32 %v7726_v55, %v6105_v54  ;;  %v6166_v24 = vor.u32 %v7739_v58, %v6163_v60 }
 0x248   :  { %2428 = vmatpush.bf16.msrb.mxu3 %v6058_v28  ;;  %v6227_v8 = vld [vmem:[#allocation4 + $0x1f8] sm:$0xf0]  ;;  %v7705_v32 = vld [vmem:[#allocation4 + $0x64] sm:$0xf]  ;;  %v6027_v11 = vld [vmem:[#allocation4 + $0x68] sm:$0xf0]  ;;  %v6170_v42 = vor.u32 %v7742_v62, %v6169_v61 }
 0x249   :  { %2441 = vmatpush.bf16.msra.mxu0 %v6122_v29  ;;  %v7721_v52 = vld [vmem:[#allocation4 + $0xe4] sm:$0xf]  ;;  %v6091_v5 = vld [vmem:[#allocation4 + $0xe8] sm:$0xf0]  ;;  %v6230_v13 = vor.u32 %v7755_v7, %v6227_v8  ;;  %v6030_v16 = vor.u32 %v7705_v32, %v6027_v11  ;;  %v7703_v20 = vld [vmem:[#allocation4 + $0x54] sm:$0xf] }
 0x24a   :  { %v7737_v14 = vld [vmem:[#allocation4 + $0x164] sm:$0xf]  ;;  %v6155_v15 = vld [vmem:[#allocation4 + $0x168] sm:$0xf0]  ;;  %v6094_v19 = vor.u32 %v7721_v52, %v6091_v5  ;;  %v6019_v22 = vld [vmem:[#allocation4 + $0x58] sm:$0xf0] }
 0x24b   :  { %2454 = vmatpush.bf16.msra.mxu1 %v6186_v36  ;;  %2416 = vmatpush.bf16.msrb.mxu2 %v5986_v38  ;;  %v7753_v17 = vld [vmem:[#allocation4 + $0x1e4] sm:$0xf]  ;;  %v6219_v18 = vld [vmem:[#allocation4 + $0x1e8] sm:$0xf0]  ;;  %v6158_v23 = vor.u32 %v7737_v14, %v6155_v15  ;;  %v7719_v25 = vld [vmem:[#allocation4 + $0xd4] sm:$0xf]  ;;  %v6022_v53 = vor.u32 %v7703_v20, %v6019_v22 }
 0x24c   :  { %2429 = vmatpush.bf16.msrb.mxu3 %v6050_v43  ;;  %v6083_v26 = vld [vmem:[#allocation4 + $0xd8] sm:$0xf0]  ;;  %v6222_v27 = vor.u32 %v7753_v17, %v6219_v18  ;;  %v7735_v28 = vld [vmem:[#allocation4 + $0x154] sm:$0xf]  ;;  %v7701_v33 = vld [vmem:[#allocation4 + $0x44] sm:$0xf] }
 0x24d   :  { %2442 = vmatpush.bf16.msra.mxu0 %v6114_v44  ;;  %v6147_v29 = vld [vmem:[#allocation4 + $0x158] sm:$0xf0]  ;;  %v7751_v30 = vld [vmem:[#allocation4 + $0x1d4] sm:$0xf]  ;;  %v6086_v31 = vor.u32 %v7719_v25, %v6083_v26  ;;  %v6011_v34 = vld [vmem:[#allocation4 + $0x48] sm:$0xf0] }
 0x24e   :  { %v6211_v57 = vld [vmem:[#allocation4 + $0x1d8] sm:$0xf0]  ;;  %v6150_v36 = vor.u32 %v7735_v28, %v6147_v29  ;;  %v7717_v37 = vld [vmem:[#allocation4 + $0xc4] sm:$0xf]  ;;  %v6075_v38 = vld [vmem:[#allocation4 + $0xc8] sm:$0xf0]  ;;  %v6014_v43 = vor.u32 %v7701_v33, %v6011_v34 }
 0x24f   :  { %2455 = vmatpush.bf16.msra.mxu1 %v6178_v51  ;;  %2417 = vmatpush.bf16.msrb.mxu2 %v5978_v59  ;;  %v6214_v39 = vor.u32 %v7751_v30, %v6211_v57  ;;  %v7733_v40 = vld [vmem:[#allocation4 + $0x144] sm:$0xf]  ;;  %v6139_v41 = vld [vmem:[#allocation4 + $0x148] sm:$0xf0]  ;;  %v6078_v46 = vor.u32 %v7717_v37, %v6075_v38  ;;  %v7699_v47 = vld [vmem:[#allocation4 + $0x34] sm:$0xf] }
 0x250   :  { %2430 = vmatpush.bf16.msrb.mxu3 %v6042_v63  ;;  %v7749_v44 = vld [vmem:[#allocation4 + $0x1c4] sm:$0xf]  ;;  %v6203_v45 = vld [vmem:[#allocation4 + $0x1c8] sm:$0xf0]  ;;  %v6003_v48 = vld [vmem:[#allocation4 + $0x38] sm:$0xf0]  ;;  %v6142_v49 = vor.u32 %v7733_v40, %v6139_v41 }
 0x251   :  { %2443 = vmatpush.bf16.msra.mxu0 %v6106_v10  ;;  %v7715_v50 = vld [vmem:[#allocation4 + $0xb4] sm:$0xf]  ;;  %v6067_v51 = vld [vmem:[#allocation4 + $0xb8] sm:$0xf0]  ;;  %v6206_v54 = vor.u32 %v7749_v44, %v6203_v45  ;;  %v6006_v59 = vor.u32 %v7699_v47, %v6003_v48  ;;  %v7697_v63 = vld [vmem:[#allocation4 + $0x24] sm:$0xf] }
 0x252   :  { %2418 = vmatmul.bf16.vlgmr.msrb.gmra.mxu2 %v8376_v21  ;;  %v7731_v55 = vld [vmem:[#allocation4 + $0x134] sm:$0xf]  ;;  %v6131_v58 = vld [vmem:[#allocation4 + $0x138] sm:$0xf0]  ;;  %v6070_v62 = vor.u32 %v7715_v50, %v6067_v51  ;;  %v7713_v8 = vld [vmem:[#allocation4 + $0xa4] sm:$0xf] }
 0x253   :  { %2462 = vmatpush.bf16.msra.mxu2 %v6038_v6  ;;  %2456 = vmatpush.bf16.msra.mxu1 %v6170_v42  ;;  %v7747_v60 = vld [vmem:[#allocation4 + $0x1b4] sm:$0xf]  ;;  %v6195_v61 = vld [vmem:[#allocation4 + $0x1b8] sm:$0xf0]  ;;  %v5995_v6 = vld [vmem:[#allocation4 + $0x28] sm:$0xf0]  ;;  %v6134_v7 = vor.u32 %v7731_v55, %v6131_v58 }
 0x254   :  { %2475 = vmatpush.bf16.msra.mxu3 %v6102_v9  ;;  %2444 = vmatmul.bf16.vlgmr.msra.gmra.mxu0 %v8381_v56  ;;  %v6059_v9 = vld [vmem:[#allocation4 + $0xa8] sm:$0xf0]  ;;  %v6198_v10 = vor.u32 %v7747_v60, %v6195_v61  ;;  %v7729_v32 = vld [vmem:[#allocation4 + $0x124] sm:$0xf]  ;;  %v5987_v14 = vld [vmem:[#allocation4 + $0x18] sm:$0xf0] }
 0x255   :  { %2488 = vmatpush.bf16.msrb.mxu0 %v6166_v24  ;;  %2431 = vmatmul.bf16.vlgmr.msrb.gmra.mxu3 %v8378_v35  ;;  %v6123_v11 = vld [vmem:[#allocation4 + $0x128] sm:$0xf0]  ;;  %v5998_v24 = vor.u32 %v7697_v63, %v5995_v6  ;;  %v7745_v42 = vld [vmem:[#allocation4 + $0x1a4] sm:$0xf]  ;;  %v6062_v5 = vor.u32 %v7713_v8, %v6059_v9  ;;  %v6051_v17 = vld [vmem:[#allocation4 + $0x98] sm:$0xf0] }
 0x256   :  { %2457 = vmatmul.bf16.vlgmr.msra.gmra.mxu1 %v8384_v12  ;;  %v6187_v52 = vld [vmem:[#allocation4 + $0x1a8] sm:$0xf0]  ;;  %v6126_v15 = vor.u32 %v7729_v32, %v6123_v11  ;;  %v6115_v20 = vld [vmem:[#allocation4 + $0x118] sm:$0xf0]  ;;  %v2089_v60 = vperm.slane %v8290_v1, 2  ;;  %vm2521_vm0 = vcmask 1041408  }
 0x257   :  { %2501 = vmatpush.bf16.msrb.mxu1 %v6230_v13  ;;  %2463 = vmatpush.bf16.msra.mxu2 %v6030_v16  ;;  %v7695_v13 = vld [vmem:[#allocation4 + $0x14] sm:$0xf]  ;;  %v6190_v18 = vor.u32 %v7745_v42, %v6187_v52  ;;  %v6179_v25 = vld [vmem:[#allocation4 + $0x198] sm:$0xf0]  ;;  %v5979_v28 = vld [vmem:[#allocation4 + $0x8] sm:$0xf0] }
 0x258   :  { %2476 = vmatpush.bf16.msra.mxu3 %v6094_v19  ;;  %v7711_v16 = vld [vmem:[#allocation4 + $0x94] sm:$0xf]  ;;  %v5990_v22 = vor.u32 %v7695_v13, %v5987_v14  ;;  %v6043_v30 = vld [vmem:[#allocation4 + $0x88] sm:$0xf0] }
 0x259   :  { %2489 = vmatpush.bf16.msrb.mxu0 %v6158_v23  ;;  %v7727_v19 = vld [vmem:[#allocation4 + $0x114] sm:$0xf]  ;;  %v6054_v26 = vor.u32 %v7711_v16, %v6051_v17  ;;  %v6107_v33 = vld [vmem:[#allocation4 + $0x108] sm:$0xf0] }
 0x25a   :  { %v7743_v23 = vld [vmem:[#allocation4 + $0x194] sm:$0xf]  ;;  %v6118_v29 = vor.u32 %v7727_v19, %v6115_v20  ;;  %v6171_v37 = vld [vmem:[#allocation4 + $0x188] sm:$0xf0] }
 0x25b   :  { %2502 = vmatpush.bf16.msrb.mxu1 %v6222_v27  ;;  %2464 = vmatpush.bf16.msra.mxu2 %v6022_v53  ;;  %v7693_v27 = vld [vmem:[#allocation4 + $0x4] sm:$0xf]  ;;  %v6182_v57 = vor.u32 %v7743_v23, %v6179_v25 }
 0x25c   :  { %2477 = vmatpush.bf16.msra.mxu3 %v6086_v31  ;;  %v7709_v53 = vld [vmem:[#allocation4 + $0x84] sm:$0xf]  ;;  %v5982_v34 = vor.u32 %v7693_v27, %v5979_v28 }
 0x25d   :  { %2490 = vmatpush.bf16.msrb.mxu0 %v6150_v36  ;;  %v7725_v31 = vld [vmem:[#allocation4 + $0x104] sm:$0xf]  ;;  %v6046_v38 = vor.u32 %v7709_v53, %v6043_v30 }
 0x25e   :  { %v7741_v36 = vld [vmem:[#allocation4 + $0x184] sm:$0xf] }
 0x25f   :  { %2503 = vmatpush.bf16.msrb.mxu1 %v6214_v39  ;;  %2465 = vmatpush.bf16.msra.mxu2 %v6014_v43  ;;  %v6110_v39 = vor.u32 %v7725_v31, %v6107_v33  ;;  %v6174_v40 = vor.u32 %v7741_v36, %v6171_v37  ;;  %v2088_v43 = vperm.slane %v8285_v0, 2 }
 0x260   :  { %2478 = vmatpush.bf16.msra.mxu3 %v6078_v46 }
 0x261   :  { %2491 = vmatpush.bf16.msrb.mxu0 %v6142_v49 }
 0x263   :  { %2504 = vmatpush.bf16.msrb.mxu1 %v6206_v54  ;;  %2466 = vmatpush.bf16.msra.mxu2 %v6006_v59 }
 0x264   :  { %2479 = vmatpush.bf16.msra.mxu3 %v6070_v62 }
 0x265   :  { %2492 = vmatpush.bf16.msrb.mxu0 %v6134_v7 }
 0x267   :  { %2505 = vmatpush.bf16.msrb.mxu1 %v6198_v10  ;;  %2467 = vmatpush.bf16.msra.mxu2 %v5998_v24 }
 0x268   :  { %2480 = vmatpush.bf16.msra.mxu3 %v6062_v5 }
 0x269   :  { %2493 = vmatpush.bf16.msrb.mxu0 %v6126_v15 }
 0x26b   :  { %2506 = vmatpush.bf16.msrb.mxu1 %v6190_v18  ;;  %2468 = vmatpush.bf16.msra.mxu2 %v5990_v22 }
 0x26c   :  { %2481 = vmatpush.bf16.msra.mxu3 %v6054_v26 }
 0x26d   :  { %2494 = vmatpush.bf16.msrb.mxu0 %v6118_v29 }
 0x26f   :  { %2507 = vmatpush.bf16.msrb.mxu1 %v6182_v57  ;;  %2469 = vmatpush.bf16.msra.mxu2 %v5982_v34 }
 0x270   :  { %2482 = vmatpush.bf16.msra.mxu3 %v6046_v38 }
 0x271   :  { %2495 = vmatpush.bf16.msrb.mxu0 %v6110_v39 }
 0x272   :  { %2470 = vmatmul.bf16.vlgmr.msra.gmra.mxu2 %v8376_v21 }
 0x273   :  { %2508 = vmatpush.bf16.msrb.mxu1 %v6174_v40  ;;  %2483 = vmatmul.bf16.vlgmr.msra.gmra.mxu3 %v8378_v35 }
 0x274   :  { %2496 = vmatmul.bf16.vlgmr.msrb.gmra.mxu0 %v8381_v56 }
 0x276   :  { %2509 = vmatmul.bf16.vlgmr.msrb.gmra.mxu1 %v8384_v12 }
 0x2d1   :  { %v2445_v41 = vpop.f32.mrf.mxu0 }
 0x2d3   :  { %v2458_v44 = vpop.f32.mrf.mxu1 }
 0x2d5   :  { %v2419_v45 = vpop.f32.mrf.mxu2 }
 0x2d6   :  { %v2420_v46 = vadd.f32 %v2419_v45, %v2088_v43 }
 0x2d8   :  { %v2432_v47 = vpop.f32.mrf.mxu3 }
 0x2d9   :  { %v2433_v48 = vadd.f32 %v2432_v47, %v2420_v46  ;;  %v2447_v49 = vpop.f32.mrf.mxu0 }
 0x2db   :  { %v2446_v50 = vadd.f32 %v2445_v41, %v2433_v48  ;;  %v2460_v51 = vpop.f32.mrf.mxu1 }
 0x2dd   :  { %v2459_v54 = vadd.f32 %v2458_v44, %v2446_v50  ;;  %v2421_v21 = vpop.f32.mrf.mxu2 }
 0x2df   :  { %v2514_v55 = vmul.f32 0.22916667, %v2459_v54 }
 0x2e0   :  { %v2434_v58 = vpop.f32.mrf.mxu3 }
 0x2e1   :  { %v2516_v35 = vmax.f32 %v2459_v54, %v2514_v55 }
 0x2e3   :  { %v8395_v59 = vpack.c.bf16 %v2516_v35, %v2516_v35 }
 0x2f1   :  { %v2497_v56 = vpop.f32.mrf.mxu0 }
 0x2f3   :  { %v2510_v12 = vpop.f32.mrf.mxu1 }
 0x2f5   :  { %v2471_v61 = vpop.f32.mrf.mxu2 }
 0x2f6   :  { %v2472_v62 = vadd.f32 %v2471_v61, %v2089_v60  ;;  %v2484_v63 = vpop.f32.mrf.mxu3 }
 0x2f8   :  { %v2485_v6 = vadd.f32 %v2484_v63, %v2472_v62 }
 0x2f9   :  { %v2499_v7 = vpop.f32.mrf.mxu0 }
 0x2fa   :  { %v2498_v8 = vadd.f32 %v2497_v56, %v2485_v6 }
 0x2fb   :  { %v2512_v9 = vpop.f32.mrf.mxu1 }
 0x2fc   :  { %v2511_v10 = vadd.f32 %v2510_v12, %v2498_v8 }
 0x2fd   :  { %v2473_v32 = vpop.f32.mrf.mxu2 }
 0x2fe   :  { %v2515_v11 = vmul.f32 0.22916667, %v2511_v10  ;;  %v2486_v24 = vpop.f32.mrf.mxu3 }
 0x300   :  { %v2517_v42 = vmax.f32 %v2511_v10, %v2515_v11 }
 0x302   :  { %v2520_v52 = vrot.slane %v2517_v42, 6  ;;  %v8398_v5 = vpack.c.bf16 %v2517_v42, %v2517_v42 }
 0x304   :  { %v2522_v13 = vsel %vm2521_vm0, %v2516_v35, %v2520_v52 }
 0x305   :  { %2524 = vst [vmem:[%s8479_s9] sm:$0xf] %v2522_v13 }
 0x306   :  { %8217 = dma.done.wait [#allocation8 + $0x3], 8192 }
 0x307   :  { %8218 = vsyncadd [#allocation8 + $0x3], 4294959104  ;;  %v6345_v14 = vld [vmem:[#allocation5 + $0xe0] sm:$0xf]  ;;  %v7787_v15 = vld [vmem:[#allocation5 + $0xec] sm:$0xf0] }
 0x308   :  { %v6473_v16 = vld [vmem:[#allocation5 + $0x1e0] sm:$0xf]  ;;  %v6346_v17 = vor.u32 %v7787_v15, %v6345_v14  ;;  %v7819_v18 = vld [vmem:[#allocation5 + $0x1ec] sm:$0xf0]  ;;  %v7785_v19 = vld [vmem:[#allocation5 + $0xe4] sm:$0xf] }
 0x309   :  { %v6347_v20 = vld [vmem:[#allocation5 + $0xf0] sm:$0xf0]  ;;  %v6474_v22 = vor.u32 %v7819_v18, %v6473_v16  ;;  %v7817_v25 = vld [vmem:[#allocation5 + $0x1e4] sm:$0xf]  ;;  %v6329_v27 = vld [vmem:[#allocation5 + $0xc0] sm:$0xf] }
 0x30a   :  { %v6350_v23 = vor.u32 %v7785_v19, %v6347_v20  ;;  %v6475_v26 = vld [vmem:[#allocation5 + $0x1f0] sm:$0xf0]  ;;  %2918 = vmatpush.bf16.msrb.mxu2 %v6346_v17  ;;  %v7783_v29 = vld [vmem:[#allocation5 + $0xcc] sm:$0xf0]  ;;  %v6457_v53 = vld [vmem:[#allocation5 + $0x1c0] sm:$0xf] }
 0x30b   :  { %v6478_v28 = vor.u32 %v7817_v25, %v6475_v26  ;;  %v7815_v30 = vld [vmem:[#allocation5 + $0x1cc] sm:$0xf0]  ;;  %2931 = vmatpush.bf16.msrb.mxu3 %v6474_v22  ;;  %v6330_v57 = vor.u32 %v7783_v29, %v6329_v27  ;;  %v7781_v33 = vld [vmem:[#allocation5 + $0xc4] sm:$0xf]  ;;  %v6331_v34 = vld [vmem:[#allocation5 + $0xd0] sm:$0xf0] }
 0x30c   :  { %2944 = vmatpush.bf16.msra.mxu0 %v6350_v23  ;;  %v6458_v31 = vor.u32 %v7815_v30, %v6457_v53  ;;  %v7813_v36 = vld [vmem:[#allocation5 + $0x1c4] sm:$0xf]  ;;  %v6334_v37 = vor.u32 %v7781_v33, %v6331_v34  ;;  %v6459_v38 = vld [vmem:[#allocation5 + $0x1d0] sm:$0xf0]  ;;  %v6313_v39 = vld [vmem:[#allocation5 + $0xa0] sm:$0xf] }
 0x30d   :  { %2957 = vmatpush.bf16.msra.mxu1 %v6478_v28  ;;  %v7779_v40 = vld [vmem:[#allocation5 + $0xac] sm:$0xf0]  ;;  %v6462_v41 = vor.u32 %v7813_v36, %v6459_v38  ;;  %v6441_v43 = vld [vmem:[#allocation5 + $0x1a0] sm:$0xf]  ;;  %v7777_v45 = vld [vmem:[#allocation5 + $0xa4] sm:$0xf] }
 0x30e   :  { %v7811_v44 = vld [vmem:[#allocation5 + $0x1ac] sm:$0xf0]  ;;  %2919 = vmatpush.bf16.msrb.mxu2 %v6330_v57  ;;  %v6314_v46 = vor.u32 %v7779_v40, %v6313_v39  ;;  %v6315_v47 = vld [vmem:[#allocation5 + $0xb0] sm:$0xf0]  ;;  %v7809_v48 = vld [vmem:[#allocation5 + $0x1a4] sm:$0xf] }
 0x30f   :  { %v6443_v49 = vld [vmem:[#allocation5 + $0x1b0] sm:$0xf0]  ;;  %2932 = vmatpush.bf16.msrb.mxu3 %v6458_v31  ;;  %v6442_v50 = vor.u32 %v7811_v44, %v6441_v43  ;;  %v6318_v51 = vor.u32 %v7777_v45, %v6315_v47  ;;  %v6297_v54 = vld [vmem:[#allocation5 + $0x80] sm:$0xf]  ;;  %v7775_v21 = vld [vmem:[#allocation5 + $0x8c] sm:$0xf0] }
 0x310   :  { %2945 = vmatpush.bf16.msra.mxu0 %v6334_v37  ;;  %v6425_v55 = vld [vmem:[#allocation5 + $0x180] sm:$0xf]  ;;  %v6446_v58 = vor.u32 %v7809_v48, %v6443_v49  ;;  %v7807_v35 = vld [vmem:[#allocation5 + $0x18c] sm:$0xf0]  ;;  %v7773_v56 = vld [vmem:[#allocation5 + $0x84] sm:$0xf]  ;;  %v6298_v62 = vor.u32 %v7775_v21, %v6297_v54 }
 0x311   :  { %2958 = vmatpush.bf16.msra.mxu1 %v6462_v41  ;;  %v6299_v12 = vld [vmem:[#allocation5 + $0x90] sm:$0xf0]  ;;  %v7805_v60 = vld [vmem:[#allocation5 + $0x184] sm:$0xf]  ;;  %v6426_v63 = vor.u32 %v7807_v35, %v6425_v55  ;;  %v6281_v7 = vld [vmem:[#allocation5 + $0x60] sm:$0xf] }
 0x312   :  { %v6427_v61 = vld [vmem:[#allocation5 + $0x190] sm:$0xf0]  ;;  %2920 = vmatpush.bf16.msrb.mxu2 %v6314_v46  ;;  %v6302_v6 = vor.u32 %v7773_v56, %v6299_v12  ;;  %v7771_v8 = vld [vmem:[#allocation5 + $0x6c] sm:$0xf0]  ;;  %v6409_v9 = vld [vmem:[#allocation5 + $0x160] sm:$0xf] }
 0x313   :  { %2933 = vmatpush.bf16.msrb.mxu3 %v6442_v50  ;;  %v6430_v10 = vor.u32 %v7805_v60, %v6427_v61  ;;  %v7803_v32 = vld [vmem:[#allocation5 + $0x16c] sm:$0xf0]  ;;  %v7769_v11 = vld [vmem:[#allocation5 + $0x64] sm:$0xf]  ;;  %v6283_v24 = vld [vmem:[#allocation5 + $0x70] sm:$0xf0]  ;;  %v6282_v13 = vor.u32 %v7771_v8, %v6281_v7 }
 0x314   :  { %2946 = vmatpush.bf16.msra.mxu0 %v6318_v51  ;;  %v7801_v42 = vld [vmem:[#allocation5 + $0x164] sm:$0xf]  ;;  %v6411_v52 = vld [vmem:[#allocation5 + $0x170] sm:$0xf0]  ;;  %v6410_v14 = vor.u32 %v7803_v32, %v6409_v9  ;;  %v6286_v15 = vor.u32 %v7769_v11, %v6283_v24  ;;  %v6265_v16 = vld [vmem:[#allocation5 + $0x40] sm:$0xf] }
 0x315   :  { %2959 = vmatpush.bf16.msra.mxu1 %v6446_v58  ;;  %v7767_v17 = vld [vmem:[#allocation5 + $0x4c] sm:$0xf0]  ;;  %v6393_v18 = vld [vmem:[#allocation5 + $0x140] sm:$0xf]  ;;  %v6414_v19 = vor.u32 %v7801_v42, %v6411_v52  ;;  %v7765_v22 = vld [vmem:[#allocation5 + $0x44] sm:$0xf] }
 0x316   :  { %2921 = vmatpush.bf16.msrb.mxu2 %v6298_v62  ;;  %v7799_v20 = vld [vmem:[#allocation5 + $0x14c] sm:$0xf0]  ;;  %v6267_v23 = vld [vmem:[#allocation5 + $0x50] sm:$0xf0]  ;;  %v7797_v25 = vld [vmem:[#allocation5 + $0x144] sm:$0xf]  ;;  %v6266_v27 = vor.u32 %v7767_v17, %v6265_v16 }
 0x317   :  { %2934 = vmatpush.bf16.msrb.mxu3 %v6426_v63  ;;  %v6395_v26 = vld [vmem:[#allocation5 + $0x150] sm:$0xf0]  ;;  %v6394_v28 = vor.u32 %v7799_v20, %v6393_v18  ;;  %v6270_v29 = vor.u32 %v7765_v22, %v6267_v23  ;;  %v6249_v53 = vld [vmem:[#allocation5 + $0x20] sm:$0xf]  ;;  %v7763_v30 = vld [vmem:[#allocation5 + $0x2c] sm:$0xf0] }
 0x318   :  { %2947 = vmatpush.bf16.msra.mxu0 %v6302_v6  ;;  %v6377_v57 = vld [vmem:[#allocation5 + $0x120] sm:$0xf]  ;;  %v6398_v31 = vor.u32 %v7797_v25, %v6395_v26  ;;  %v7795_v33 = vld [vmem:[#allocation5 + $0x12c] sm:$0xf0]  ;;  %v7761_v34 = vld [vmem:[#allocation5 + $0x24] sm:$0xf]  ;;  %v6250_v39 = vor.u32 %v7763_v30, %v6249_v53 }
 0x319   :  { %2960 = vmatpush.bf16.msra.mxu1 %v6430_v10  ;;  %v6251_v36 = vld [vmem:[#allocation5 + $0x30] sm:$0xf0]  ;;  %v7793_v37 = vld [vmem:[#allocation5 + $0x124] sm:$0xf]  ;;  %v6233_v40 = vld [vmem:[#allocation5] sm:$0xf]  ;;  %v6378_v43 = vor.u32 %v7795_v33, %v6377_v57 }
 0x31a   :  { %2922 = vmatpush.bf16.msrb.mxu2 %v6282_v13  ;;  %v6379_v38 = vld [vmem:[#allocation5 + $0x130] sm:$0xf0]  ;;  %v7759_v41 = vld [vmem:[#allocation5 + $0xc] sm:$0xf0]  ;;  %v6254_v44 = vor.u32 %v7761_v34, %v6251_v36  ;;  %v6361_v45 = vld [vmem:[#allocation5 + $0x100] sm:$0xf] }
 0x31b   :  { %2935 = vmatpush.bf16.msrb.mxu3 %v6410_v14  ;;  %v7791_v46 = vld [vmem:[#allocation5 + $0x10c] sm:$0xf0]  ;;  %v7757_v47 = vld [vmem:[#allocation5 + $0x4] sm:$0xf]  ;;  %v6382_v48 = vor.u32 %v7793_v37, %v6379_v38  ;;  %v6235_v49 = vld [vmem:[#allocation5 + $0x10] sm:$0xf0]  ;;  %v6234_v58 = vor.u32 %v7759_v41, %v6233_v40 }
 0x31c   :  { %2948 = vmatpush.bf16.msra.mxu0 %v6286_v15  ;;  %v7789_v50 = vld [vmem:[#allocation5 + $0x104] sm:$0xf]  ;;  %v6363_v51 = vld [vmem:[#allocation5 + $0x110] sm:$0xf0]  ;;  %v6353_v54 = vld [vmem:[#allocation5 + $0xe8] sm:$0xf]  ;;  %v6362_v60 = vor.u32 %v7791_v46, %v6361_v45  ;;  %v6238_v61 = vor.u32 %v7757_v47, %v6235_v49 }
 0x31d   :  { %2961 = vmatpush.bf16.msra.mxu1 %v6414_v19  ;;  %v7788_v21 = vld [vmem:[#allocation5 + $0xf4] sm:$0xf0]  ;;  %v6481_v55 = vld [vmem:[#allocation5 + $0x1e8] sm:$0xf]  ;;  %v7786_v56 = vld [vmem:[#allocation5 + $0xec] sm:$0xf]  ;;  %v6366_v6 = vor.u32 %v7789_v50, %v6363_v51 }
 0x31e   :  { %2923 = vmatpush.bf16.msrb.mxu2 %v6266_v27  ;;  %v7820_v35 = vld [vmem:[#allocation5 + $0x1f4] sm:$0xf0]  ;;  %v6355_v12 = vld [vmem:[#allocation5 + $0xf8] sm:$0xf0]  ;;  %v7818_v62 = vld [vmem:[#allocation5 + $0x1ec] sm:$0xf]  ;;  %v6354_v7 = vor.u32 %v7788_v21, %v6353_v54 }
 0x31f   :  { %2936 = vmatpush.bf16.msrb.mxu3 %v6394_v28  ;;  %v6483_v63 = vld [vmem:[#allocation5 + $0x1f8] sm:$0xf0]  ;;  %v6482_v8 = vor.u32 %v7820_v35, %v6481_v55  ;;  %v6358_v9 = vor.u32 %v7786_v56, %v6355_v12  ;;  %v6337_v10 = vld [vmem:[#allocation5 + $0xc8] sm:$0xf]  ;;  %v7784_v32 = vld [vmem:[#allocation5 + $0xd4] sm:$0xf0] }
 0x320   :  { %2949 = vmatpush.bf16.msra.mxu0 %v6270_v29  ;;  %v6465_v11 = vld [vmem:[#allocation5 + $0x1c8] sm:$0xf]  ;;  %v6486_v24 = vor.u32 %v7818_v62, %v6483_v63  ;;  %v7816_v42 = vld [vmem:[#allocation5 + $0x1d4] sm:$0xf0]  ;;  %v7782_v52 = vld [vmem:[#allocation5 + $0xcc] sm:$0xf]  ;;  %v6338_v16 = vor.u32 %v7784_v32, %v6337_v10 }
 0x321   :  { %2962 = vmatpush.bf16.msra.mxu1 %v6398_v31  ;;  %v6339_v13 = vld [vmem:[#allocation5 + $0xd8] sm:$0xf0]  ;;  %v7814_v14 = vld [vmem:[#allocation5 + $0x1cc] sm:$0xf]  ;;  %v6466_v17 = vor.u32 %v7816_v42, %v6465_v11  ;;  %v6321_v19 = vld [vmem:[#allocation5 + $0xa8] sm:$0xf] }
 0x322   :  { %2924 = vmatpush.bf16.msrb.mxu2 %v6250_v39  ;;  %v6467_v15 = vld [vmem:[#allocation5 + $0x1d8] sm:$0xf0]  ;;  %v6342_v18 = vor.u32 %v7782_v52, %v6339_v13  ;;  %v7780_v20 = vld [vmem:[#allocation5 + $0xb4] sm:$0xf0]  ;;  %v6449_v22 = vld [vmem:[#allocation5 + $0x1a8] sm:$0xf] }
 0x323   :  { %2937 = vmatpush.bf16.msrb.mxu3 %v6378_v43  ;;  %v6470_v23 = vor.u32 %v7814_v14, %v6467_v15  ;;  %v7812_v25 = vld [vmem:[#allocation5 + $0x1b4] sm:$0xf0]  ;;  %v7778_v26 = vld [vmem:[#allocation5 + $0xac] sm:$0xf]  ;;  %v6323_v27 = vld [vmem:[#allocation5 + $0xb8] sm:$0xf0]  ;;  %v6322_v53 = vor.u32 %v7780_v20, %v6321_v19 }
 0x324   :  { %2950 = vmatpush.bf16.msra.mxu0 %v6254_v44  ;;  %v7810_v28 = vld [vmem:[#allocation5 + $0x1ac] sm:$0xf]  ;;  %v6451_v29 = vld [vmem:[#allocation5 + $0x1b8] sm:$0xf0]  ;;  %v6450_v30 = vor.u32 %v7812_v25, %v6449_v22  ;;  %v6326_v57 = vor.u32 %v7778_v26, %v6323_v27  ;;  %v6305_v31 = vld [vmem:[#allocation5 + $0x88] sm:$0xf] }
 0x325   :  { %2963 = vmatpush.bf16.msra.mxu1 %v6382_v48  ;;  %v7776_v33 = vld [vmem:[#allocation5 + $0x94] sm:$0xf0]  ;;  %v6433_v34 = vld [vmem:[#allocation5 + $0x188] sm:$0xf]  ;;  %v6454_v36 = vor.u32 %v7810_v28, %v6451_v29  ;;  %v7774_v38 = vld [vmem:[#allocation5 + $0x8c] sm:$0xf] }
 0x326   :  { %2925 = vmatpush.bf16.msrb.mxu2 %v6234_v58  ;;  %v7808_v37 = vld [vmem:[#allocation5 + $0x194] sm:$0xf0]  ;;  %v6307_v39 = vld [vmem:[#allocation5 + $0x98] sm:$0xf0]  ;;  %v7806_v40 = vld [vmem:[#allocation5 + $0x18c] sm:$0xf]  ;;  %v6306_v43 = vor.u32 %v7776_v33, %v6305_v31 }
 0x327   :  { %2938 = vmatpush.bf16.msrb.mxu3 %v6362_v60  ;;  %v6435_v41 = vld [vmem:[#allocation5 + $0x198] sm:$0xf0]  ;;  %v6434_v44 = vor.u32 %v7808_v37, %v6433_v34  ;;  %v6310_v45 = vor.u32 %v7774_v38, %v6307_v39  ;;  %v6289_v46 = vld [vmem:[#allocation5 + $0x68] sm:$0xf]  ;;  %v7772_v47 = vld [vmem:[#allocation5 + $0x74] sm:$0xf0] }
 0x328   :  { %2951 = vmatpush.bf16.msra.mxu0 %v6238_v61  ;;  %v6417_v48 = vld [vmem:[#allocation5 + $0x168] sm:$0xf]  ;;  %v6438_v49 = vor.u32 %v7806_v40, %v6435_v41  ;;  %v7804_v50 = vld [vmem:[#allocation5 + $0x174] sm:$0xf0]  ;;  %v7770_v51 = vld [vmem:[#allocation5 + $0x6c] sm:$0xf]  ;;  %v6290_v58 = vor.u32 %v7772_v47, %v6289_v46 }
 0x329   :  { %2964 = vmatpush.bf16.msra.mxu1 %v6366_v6  ;;  %2926 = vmatmul.bf16.vlgmr.msrb.gmra.mxu2 %v8395_v59  ;;  %v6291_v54 = vld [vmem:[#allocation5 + $0x78] sm:$0xf0]  ;;  %v7802_v21 = vld [vmem:[#allocation5 + $0x16c] sm:$0xf]  ;;  %v6418_v35 = vor.u32 %v7804_v50, %v6417_v48  ;;  %v6273_v12 = vld [vmem:[#allocation5 + $0x48] sm:$0xf] }
 0x32a   :  { %2970 = vmatpush.bf16.msra.mxu2 %v6354_v7  ;;  %2939 = vmatmul.bf16.vlgmr.msrb.gmra.mxu3 %v8398_v5  ;;  %v6419_v55 = vld [vmem:[#allocation5 + $0x178] sm:$0xf0]  ;;  %v6294_v56 = vor.u32 %v7770_v51, %v6291_v54  ;;  %v7768_v60 = vld [vmem:[#allocation5 + $0x54] sm:$0xf0]  ;;  %v6401_v61 = vld [vmem:[#allocation5 + $0x148] sm:$0xf] }
 0x32b   :  { %2983 = vmatpush.bf16.msra.mxu3 %v6482_v8  ;;  %2952 = vmatmul.bf16.vlgmr.msra.gmra.mxu0 %v8395_v59  ;;  %v6422_v62 = vor.u32 %v7802_v21, %v6419_v55  ;;  %v7800_v63 = vld [vmem:[#allocation5 + $0x154] sm:$0xf0]  ;;  %v7766_v6 = vld [vmem:[#allocation5 + $0x4c] sm:$0xf]  ;;  %v6275_v7 = vld [vmem:[#allocation5 + $0x58] sm:$0xf0]  ;;  %v6274_v10 = vor.u32 %v7768_v60, %v6273_v12 }
 0x32c   :  { %2996 = vmatpush.bf16.msrb.mxu0 %v6358_v9  ;;  %2965 = vmatmul.bf16.vlgmr.msra.gmra.mxu1 %v8398_v5  ;;  %v7798_v8 = vld [vmem:[#allocation5 + $0x14c] sm:$0xf]  ;;  %v6403_v9 = vld [vmem:[#allocation5 + $0x158] sm:$0xf0]  ;;  %v6402_v32 = vor.u32 %v7800_v63, %v6401_v61  ;;  %v6278_v11 = vor.u32 %v7766_v6, %v6275_v7  ;;  %v7764_v42 = vld [vmem:[#allocation5 + $0x34] sm:$0xf0] }
 0x32d   :  { %3009 = vmatpush.bf16.msrb.mxu1 %v6486_v24  ;;  %v6257_v24 = vld [vmem:[#allocation5 + $0x28] sm:$0xf]  ;;  %v6406_v13 = vor.u32 %v7798_v8, %v6403_v9  ;;  %v7796_v14 = vld [vmem:[#allocation5 + $0x134] sm:$0xf0]  ;;  %v7762_v15 = vld [vmem:[#allocation5 + $0x2c] sm:$0xf] }
 0x32e   :  { %2971 = vmatpush.bf16.msra.mxu2 %v6338_v16  ;;  %v6385_v52 = vld [vmem:[#allocation5 + $0x128] sm:$0xf]  ;;  %v6259_v16 = vld [vmem:[#allocation5 + $0x38] sm:$0xf0]  ;;  %v6258_v19 = vor.u32 %v7764_v42, %v6257_v24  ;;  %v7760_v25 = vld [vmem:[#allocation5 + $0x14] sm:$0xf0] }
 0x32f   :  { %2984 = vmatpush.bf16.msra.mxu3 %v6466_v17  ;;  %v7794_v17 = vld [vmem:[#allocation5 + $0x12c] sm:$0xf]  ;;  %v6386_v20 = vor.u32 %v7796_v14, %v6385_v52  ;;  %v6262_v22 = vor.u32 %v7762_v15, %v6259_v16  ;;  %v6369_v26 = vld [vmem:[#allocation5 + $0x108] sm:$0xf]  ;;  %v7792_v28 = vld [vmem:[#allocation5 + $0x114] sm:$0xf0] }
 0x330   :  { %2997 = vmatpush.bf16.msrb.mxu0 %v6342_v18  ;;  %v6387_v18 = vld [vmem:[#allocation5 + $0x138] sm:$0xf0]  ;;  %v7758_v29 = vld [vmem:[#allocation5 + $0xc] sm:$0xf]  ;;  %v6370_v33 = vor.u32 %v7792_v28, %v6369_v26  ;;  %v2595_v37 = vperm.slane %v8290_v1, 3  ;;  %v2594_v41 = vperm.slane %v8285_v0, 3 }
 0x331   :  { %3010 = vmatpush.bf16.msrb.mxu1 %v6470_v23  ;;  %v6241_v23 = vld [vmem:[#allocation5 + $0x8] sm:$0xf]  ;;  %v6390_v27 = vor.u32 %v7794_v17, %v6387_v18  ;;  %v2596_v61 = vperm.slane %v8295_v2, 3 }
 0x332   :  { %2972 = vmatpush.bf16.msra.mxu2 %v6322_v53  ;;  %v6243_v53 = vld [vmem:[#allocation5 + $0x18] sm:$0xf0]  ;;  %v6242_v31 = vor.u32 %v7760_v25, %v6241_v23 }
 0x333   :  { %2985 = vmatpush.bf16.msra.mxu3 %v6450_v30  ;;  %v7790_v30 = vld [vmem:[#allocation5 + $0x10c] sm:$0xf]  ;;  %v6246_v34 = vor.u32 %v7758_v29, %v6243_v53 }
 0x334   :  { %2998 = vmatpush.bf16.msrb.mxu0 %v6326_v57  ;;  %v6371_v57 = vld [vmem:[#allocation5 + $0x118] sm:$0xf0] }
 0x335   :  { %3011 = vmatpush.bf16.msrb.mxu1 %v6454_v36  ;;  %v6374_v36 = vor.u32 %v7790_v30, %v6371_v57 }
 0x336   :  { %2973 = vmatpush.bf16.msra.mxu2 %v6306_v43 }
 0x337   :  { %2986 = vmatpush.bf16.msra.mxu3 %v6434_v44 }
 0x338   :  { %2999 = vmatpush.bf16.msrb.mxu0 %v6310_v45 }
 0x339   :  { %3012 = vmatpush.bf16.msrb.mxu1 %v6438_v49 }
 0x33a   :  { %2974 = vmatpush.bf16.msra.mxu2 %v6290_v58 }
 0x33b   :  { %2987 = vmatpush.bf16.msra.mxu3 %v6418_v35  ;;  %v2597_v35 = vperm.slane %v8300_v3, 3 }
 0x33c   :  { %3000 = vmatpush.bf16.msrb.mxu0 %v6294_v56 }
 0x33d   :  { %3013 = vmatpush.bf16.msrb.mxu1 %v6422_v62 }
 0x33e   :  { %2975 = vmatpush.bf16.msra.mxu2 %v6274_v10 }
 0x33f   :  { %2988 = vmatpush.bf16.msra.mxu3 %v6402_v32 }
 0x340   :  { %3001 = vmatpush.bf16.msrb.mxu0 %v6278_v11 }
 0x341   :  { %3014 = vmatpush.bf16.msrb.mxu1 %v6406_v13 }
 0x342   :  { %2976 = vmatpush.bf16.msra.mxu2 %v6258_v19 }
 0x343   :  { %2989 = vmatpush.bf16.msra.mxu3 %v6386_v20 }
 0x344   :  { %3002 = vmatpush.bf16.msrb.mxu0 %v6262_v22 }
 0x345   :  { %3015 = vmatpush.bf16.msrb.mxu1 %v6390_v27 }
 0x346   :  { %2977 = vmatpush.bf16.msra.mxu2 %v6242_v31 }
 0x347   :  { %2990 = vmatpush.bf16.msra.mxu3 %v6370_v33 }
 0x348   :  { %3003 = vmatpush.bf16.msrb.mxu0 %v6246_v34 }
 0x349   :  { %3016 = vmatpush.bf16.msrb.mxu1 %v6374_v36  ;;  %2978 = vmatmul.bf16.vlgmr.msra.gmra.mxu2 %v8395_v59 }
 0x34a   :  { %2991 = vmatmul.bf16.vlgmr.msra.gmra.mxu3 %v8398_v5 }
 0x34b   :  { %3004 = vmatmul.bf16.vlgmr.msrb.gmra.mxu0 %v8395_v59 }
 0x34c   :  { %3017 = vmatmul.bf16.vlgmr.msrb.gmra.mxu1 %v8398_v5 }
 0x3a8   :  { %v2953_v38 = vpop.f32.mrf.mxu0 }
 0x3a9   :  { %v2954_v39 = vadd.f32 %v2953_v38, %v2595_v37  ;;  %v2966_v40 = vpop.f32.mrf.mxu1 }
 0x3ab   :  { %v2967_v43 = vadd.f32 %v2966_v40, %v2954_v39 }
 0x3ac   :  { %v2927_v44 = vpop.f32.mrf.mxu2 }
 0x3ad   :  { %v3023_v45 = vmul.f32 0.22916667, %v2967_v43  ;;  %v2928_v46 = vadd.f32 %v2927_v44, %v2594_v41  ;;  %v2940_v47 = vpop.f32.mrf.mxu3 }
 0x3af   :  { %v3027_v48 = vmax.f32 %v2967_v43, %v3023_v45  ;;  %v2941_v49 = vadd.f32 %v2940_v47, %v2928_v46 }
 0x3b0   :  { %v2955_v50 = vpop.f32.mrf.mxu0 }
 0x3b1   :  { %v8414_v51 = vpack.c.bf16 %v3027_v48, %v3027_v48  ;;  %v2968_v59 = vpop.f32.mrf.mxu1  ;;  %v3022_v54 = vmul.f32 0.22916667, %v2941_v49 }
 0x3b3   :  { %v3026_v5 = vmax.f32 %v2941_v49, %v3022_v54 }
 0x3b4   :  { %v2929_v21 = vpop.f32.mrf.mxu2 }
 0x3b5   :  { %v8416_v55 = vpack.c.bf16 %v3026_v5, %v3026_v5  ;;  %v2942_v58 = vpop.f32.mrf.mxu3 }
 0x3c8   :  { %v3005_v56 = vpop.f32.mrf.mxu0 }
 0x3c9   :  { %v3006_v12 = vadd.f32 %v3005_v56, %v2597_v35  ;;  %v3018_v60 = vpop.f32.mrf.mxu1 }
 0x3cb   :  { %v3019_v62 = vadd.f32 %v3018_v60, %v3006_v12 }
 0x3cc   :  { %v2979_v6 = vpop.f32.mrf.mxu2 }
 0x3cd   :  { %v3025_v63 = vmul.f32 0.22916667, %v3019_v62  ;;  %v2980_v7 = vadd.f32 %v2979_v6, %v2596_v61  ;;  %v2992_v8 = vpop.f32.mrf.mxu3 }
 0x3cf   :  { %v3029_v9 = vmax.f32 %v3019_v62, %v3025_v63  ;;  %v2993_v10 = vadd.f32 %v2992_v8, %v2980_v7 }
 0x3d0   :  { %v3007_v32 = vpop.f32.mrf.mxu0 }
 0x3d1   :  { %v8420_v11 = vpack.c.bf16 %v3029_v9, %v3029_v9  ;;  %v3020_v24 = vpop.f32.mrf.mxu1  ;;  %v3024_v42 = vmul.f32 0.22916667, %v2993_v10 }
 0x3d3   :  { %v3028_v52 = vmax.f32 %v2993_v10, %v3024_v42 }
 0x3d4   :  { %v2981_v13 = vpop.f32.mrf.mxu2 }
 0x3d5   :  { %v8422_v14 = vpack.c.bf16 %v3028_v52, %v3028_v52  ;;  %v2994_v15 = vpop.f32.mrf.mxu3 }
 0x3d6   :  { %8219 = dma.done.wait [#allocation8 + $0x4], 20480 }
 0x3d7   :  { %8220 = vsyncadd [#allocation8 + $0x4], 4294946816  ;;  %v6629_v16 = vld [vmem:[#allocation6 + $0x118] sm:$0xf]  ;;  %v7858_v17 = vld [vmem:[#allocation6 + $0x128] sm:$0xf0] }
 0x3d8   :  { %v6789_v18 = vld [vmem:[#allocation6 + $0x258] sm:$0xf]  ;;  %v6630_v19 = vor.u32 %v7858_v17, %v6629_v16  ;;  %v7898_v20 = vld [vmem:[#allocation6 + $0x268] sm:$0xf0]  ;;  %v6609_v29 = vld [vmem:[#allocation6 + $0xf0] sm:$0xf] }
 0x3d9   :  { %v6949_v22 = vld [vmem:[#allocation6 + $0x398] sm:$0xf]  ;;  %v7938_v23 = vld [vmem:[#allocation6 + $0x3a8] sm:$0xf0]  ;;  %v6790_v25 = vor.u32 %v7898_v20, %v6789_v18  ;;  %v7853_v30 = vld [vmem:[#allocation6 + $0x100] sm:$0xf0] }
 0x3da   :  { %v6950_v26 = vor.u32 %v7938_v23, %v6949_v22  ;;  %v7109_v27 = vld [vmem:[#allocation6 + $0x4d8] sm:$0xf]  ;;  %v7978_v28 = vld [vmem:[#allocation6 + $0x4e8] sm:$0xf0]  ;;  %4066 = vmatpush.bf16.msrb.mxu2 %v6630_v19  ;;  %v6769_v57 = vld [vmem:[#allocation6 + $0x230] sm:$0xf]  ;;  %v6610_v33 = vor.u32 %v7853_v30, %v6609_v29 }
 0x3db   :  { %v7110_v53 = vor.u32 %v7978_v28, %v7109_v27  ;;  %v7893_v31 = vld [vmem:[#allocation6 + $0x240] sm:$0xf0]  ;;  %4079 = vmatpush.bf16.msrb.mxu3 %v6790_v25  ;;  %v6929_v36 = vld [vmem:[#allocation6 + $0x370] sm:$0xf]  ;;  %v6589_v41 = vld [vmem:[#allocation6 + $0xc8] sm:$0xf] }
 0x3dc   :  { %4092 = vmatpush.bf16.msra.mxu0 %v6950_v26  ;;  %v6770_v34 = vor.u32 %v7893_v31, %v6769_v57  ;;  %v7933_v37 = vld [vmem:[#allocation6 + $0x380] sm:$0xf0]  ;;  %v7089_v38 = vld [vmem:[#allocation6 + $0x4b0] sm:$0xf]  ;;  %v7848_v43 = vld [vmem:[#allocation6 + $0xd8] sm:$0xf0] }
 0x3dd   :  { %4105 = vmatpush.bf16.msra.mxu1 %v7110_v53  ;;  %v6930_v39 = vor.u32 %v7933_v37, %v6929_v36  ;;  %v7973_v40 = vld [vmem:[#allocation6 + $0x4c0] sm:$0xf0]  ;;  %v6749_v45 = vld [vmem:[#allocation6 + $0x208] sm:$0xf]  ;;  %v7888_v46 = vld [vmem:[#allocation6 + $0x218] sm:$0xf0]  ;;  %v6590_v48 = vor.u32 %v7848_v43, %v6589_v41 }
 0x3de   :  { %v7090_v44 = vor.u32 %v7973_v40, %v7089_v38  ;;  %v6909_v47 = vld [vmem:[#allocation6 + $0x348] sm:$0xf]  ;;  %4067 = vmatpush.bf16.msrb.mxu2 %v6610_v33  ;;  %v7928_v49 = vld [vmem:[#allocation6 + $0x358] sm:$0xf0]  ;;  %v6750_v54 = vor.u32 %v7888_v46, %v6749_v45  ;;  %v6569_v21 = vld [vmem:[#allocation6 + $0xa0] sm:$0xf] }
 0x3df   :  { %v7069_v50 = vld [vmem:[#allocation6 + $0x488] sm:$0xf]  ;;  %v7968_v59 = vld [vmem:[#allocation6 + $0x498] sm:$0xf0]  ;;  %4080 = vmatpush.bf16.msrb.mxu3 %v6770_v34  ;;  %v6910_v5 = vor.u32 %v7928_v49, %v6909_v47  ;;  %v7843_v58 = vld [vmem:[#allocation6 + $0xb0] sm:$0xf0] }
 0x3e0   :  { %4093 = vmatpush.bf16.msra.mxu0 %v6930_v39  ;;  %v6729_v35 = vld [vmem:[#allocation6 + $0x1e0] sm:$0xf]  ;;  %v7070_v56 = vor.u32 %v7968_v59, %v7069_v50  ;;  %v7883_v12 = vld [vmem:[#allocation6 + $0x1f0] sm:$0xf0]  ;;  %v6570_v6 = vor.u32 %v7843_v58, %v6569_v21  ;;  %v6549_v9 = vld [vmem:[#allocation6 + $0x78] sm:$0xf] }
 0x3e1   :  { %4106 = vmatpush.bf16.msra.mxu1 %v7090_v44  ;;  %v6889_v60 = vld [vmem:[#allocation6 + $0x320] sm:$0xf]  ;;  %v7923_v61 = vld [vmem:[#allocation6 + $0x330] sm:$0xf0]  ;;  %v6730_v7 = vor.u32 %v7883_v12, %v6729_v35  ;;  %v7838_v10 = vld [vmem:[#allocation6 + $0x88] sm:$0xf0] }
 0x3e2   :  { %v7049_v62 = vld [vmem:[#allocation6 + $0x460] sm:$0xf]  ;;  %v7963_v63 = vld [vmem:[#allocation6 + $0x470] sm:$0xf0]  ;;  %4068 = vmatpush.bf16.msrb.mxu2 %v6590_v48  ;;  %v6890_v8 = vor.u32 %v7923_v61, %v6889_v60  ;;  %v6709_v32 = vld [vmem:[#allocation6 + $0x1b8] sm:$0xf]  ;;  %v6550_v17 = vor.u32 %v7838_v10, %v6549_v9 }
 0x3e3   :  { %4081 = vmatpush.bf16.msrb.mxu3 %v6750_v54  ;;  %v7050_v24 = vor.u32 %v7963_v63, %v7049_v62  ;;  %v7878_v42 = vld [vmem:[#allocation6 + $0x1c8] sm:$0xf0]  ;;  %v6869_v52 = vld [vmem:[#allocation6 + $0x2f8] sm:$0xf]  ;;  %v6529_v20 = vld [vmem:[#allocation6 + $0x50] sm:$0xf] }
 0x3e4   :  { %4094 = vmatpush.bf16.msra.mxu0 %v6910_v5  ;;  %v7918_v13 = vld [vmem:[#allocation6 + $0x308] sm:$0xf0]  ;;  %v7029_v15 = vld [vmem:[#allocation6 + $0x438] sm:$0xf]  ;;  %v6710_v18 = vor.u32 %v7878_v42, %v6709_v32  ;;  %v7833_v22 = vld [vmem:[#allocation6 + $0x60] sm:$0xf0] }
 0x3e5   :  { %4107 = vmatpush.bf16.msra.mxu1 %v7070_v56  ;;  %v7958_v16 = vld [vmem:[#allocation6 + $0x448] sm:$0xf0]  ;;  %v6870_v19 = vor.u32 %v7918_v13, %v6869_v52  ;;  %v6689_v23 = vld [vmem:[#allocation6 + $0x190] sm:$0xf]  ;;  %v7873_v26 = vld [vmem:[#allocation6 + $0x1a0] sm:$0xf0]  ;;  %v6530_v30 = vor.u32 %v7833_v22, %v6529_v20 }
 0x3e6   :  { %4069 = vmatpush.bf16.msrb.mxu2 %v6570_v6  ;;  %v7030_v25 = vor.u32 %v7958_v16, %v7029_v15  ;;  %v6849_v27 = vld [vmem:[#allocation6 + $0x2d0] sm:$0xf]  ;;  %v7913_v28 = vld [vmem:[#allocation6 + $0x2e0] sm:$0xf0]  ;;  %v6690_v57 = vor.u32 %v7873_v26, %v6689_v23  ;;  %v6509_v33 = vld [vmem:[#allocation6 + $0x28] sm:$0xf] }
 0x3e7   :  { %4082 = vmatpush.bf16.msrb.mxu3 %v6730_v7  ;;  %v7009_v29 = vld [vmem:[#allocation6 + $0x410] sm:$0xf]  ;;  %v7953_v53 = vld [vmem:[#allocation6 + $0x420] sm:$0xf0]  ;;  %v6850_v31 = vor.u32 %v7913_v28, %v6849_v27  ;;  %v7828_v34 = vld [vmem:[#allocation6 + $0x38] sm:$0xf0] }
 0x3e8   :  { %4095 = vmatpush.bf16.msra.mxu0 %v6890_v8  ;;  %v6669_v36 = vld [vmem:[#allocation6 + $0x168] sm:$0xf]  ;;  %v7010_v37 = vor.u32 %v7953_v53, %v7009_v29  ;;  %v7868_v38 = vld [vmem:[#allocation6 + $0x178] sm:$0xf0]  ;;  %v6510_v44 = vor.u32 %v7828_v34, %v6509_v33  ;;  %v6489_v45 = vld [vmem:[#allocation6] sm:$0xf] }
 0x3e9   :  { %4108 = vmatpush.bf16.msra.mxu1 %v7050_v24  ;;  %v6829_v39 = vld [vmem:[#allocation6 + $0x2a8] sm:$0xf]  ;;  %v7908_v40 = vld [vmem:[#allocation6 + $0x2b8] sm:$0xf0]  ;;  %v7823_v46 = vld [vmem:[#allocation6 + $0x10] sm:$0xf0]  ;;  %v6670_v47 = vor.u32 %v7868_v38, %v6669_v36 }
 0x3ea   :  { %4070 = vmatpush.bf16.msrb.mxu2 %v6550_v17  ;;  %v6989_v41 = vld [vmem:[#allocation6 + $0x3e8] sm:$0xf]  ;;  %v7948_v43 = vld [vmem:[#allocation6 + $0x3f8] sm:$0xf0]  ;;  %v6830_v48 = vor.u32 %v7908_v40, %v6829_v39  ;;  %v6649_v49 = vld [vmem:[#allocation6 + $0x140] sm:$0xf]  ;;  %v6490_v60 = vor.u32 %v7823_v46, %v6489_v45 }
 0x3eb   :  { %4083 = vmatpush.bf16.msrb.mxu3 %v6710_v18  ;;  %v7863_v50 = vld [vmem:[#allocation6 + $0x150] sm:$0xf0]  ;;  %v7856_v59 = vld [vmem:[#allocation6 + $0x11c] sm:$0xf]  ;;  %v6990_v54 = vor.u32 %v7948_v43, %v6989_v41  ;;  %v6631_v5 = vld [vmem:[#allocation6 + $0x12c] sm:$0xf0] }
 0x3ec   :  { %4096 = vmatpush.bf16.msra.mxu0 %v6870_v19  ;;  %v7896_v21 = vld [vmem:[#allocation6 + $0x25c] sm:$0xf]  ;;  %v6791_v58 = vld [vmem:[#allocation6 + $0x26c] sm:$0xf0]  ;;  %v6809_v35 = vld [vmem:[#allocation6 + $0x280] sm:$0xf]  ;;  %v6650_v6 = vor.u32 %v7863_v50, %v6649_v49  ;;  %v6634_v7 = vor.u32 %v7856_v59, %v6631_v5 }
 0x3ed   :  { %4109 = vmatpush.bf16.msra.mxu1 %v7030_v25  ;;  %v7903_v56 = vld [vmem:[#allocation6 + $0x290] sm:$0xf0]  ;;  %v6969_v12 = vld [vmem:[#allocation6 + $0x3c0] sm:$0xf]  ;;  %v7936_v62 = vld [vmem:[#allocation6 + $0x39c] sm:$0xf]  ;;  %v6794_v10 = vor.u32 %v7896_v21, %v6791_v58 }
 0x3ee   :  { %4071 = vmatpush.bf16.msrb.mxu2 %v6530_v30  ;;  %v7943_v61 = vld [vmem:[#allocation6 + $0x3d0] sm:$0xf0]  ;;  %v6951_v63 = vld [vmem:[#allocation6 + $0x3ac] sm:$0xf0]  ;;  %v7976_v8 = vld [vmem:[#allocation6 + $0x4dc] sm:$0xf]  ;;  %v6810_v32 = vor.u32 %v7903_v56, %v6809_v35 }
 0x3ef   :  { %4084 = vmatpush.bf16.msrb.mxu3 %v6690_v57  ;;  %v7111_v9 = vld [vmem:[#allocation6 + $0x4ec] sm:$0xf0]  ;;  %v7851_v24 = vld [vmem:[#allocation6 + $0xf4] sm:$0xf]  ;;  %v6611_v42 = vld [vmem:[#allocation6 + $0x104] sm:$0xf0]  ;;  %v6970_v52 = vor.u32 %v7943_v61, %v6969_v12  ;;  %v6954_v13 = vor.u32 %v7936_v62, %v6951_v63 }
 0x3f0   :  { %4097 = vmatpush.bf16.msra.mxu0 %v6850_v31  ;;  %v7891_v15 = vld [vmem:[#allocation6 + $0x234] sm:$0xf]  ;;  %v6771_v16 = vld [vmem:[#allocation6 + $0x244] sm:$0xf0]  ;;  %v7114_v17 = vor.u32 %v7976_v8, %v7111_v9  ;;  %v6614_v20 = vor.u32 %v7851_v24, %v6611_v42  ;;  %v7846_v26 = vld [vmem:[#allocation6 + $0xcc] sm:$0xf] }
 0x3f1   :  { %4110 = vmatpush.bf16.msra.mxu1 %v7010_v37  ;;  %v7931_v18 = vld [vmem:[#allocation6 + $0x374] sm:$0xf]  ;;  %v6931_v19 = vld [vmem:[#allocation6 + $0x384] sm:$0xf0]  ;;  %v6774_v25 = vor.u32 %v7891_v15, %v6771_v16  ;;  %v6591_v27 = vld [vmem:[#allocation6 + $0xdc] sm:$0xf0] }
 0x3f2   :  { %4072 = vmatpush.bf16.msrb.mxu2 %v6510_v44  ;;  %v7971_v22 = vld [vmem:[#allocation6 + $0x4b4] sm:$0xf]  ;;  %v7091_v23 = vld [vmem:[#allocation6 + $0x4c4] sm:$0xf0]  ;;  %v6934_v28 = vor.u32 %v7931_v18, %v6931_v19  ;;  %v7886_v29 = vld [vmem:[#allocation6 + $0x20c] sm:$0xf]  ;;  %v6594_v33 = vor.u32 %v7846_v26, %v6591_v27 }
 0x3f3   :  { %4085 = vmatpush.bf16.msrb.mxu3 %v6670_v47  ;;  %v6751_v53 = vld [vmem:[#allocation6 + $0x21c] sm:$0xf0]  ;;  %v7094_v30 = vor.u32 %v7971_v22, %v7091_v23  ;;  %v7926_v57 = vld [vmem:[#allocation6 + $0x34c] sm:$0xf]  ;;  %v7841_v38 = vld [vmem:[#allocation6 + $0xa4] sm:$0xf] }
 0x3f4   :  { %4098 = vmatpush.bf16.msra.mxu0 %v6830_v48  ;;  %v6911_v31 = vld [vmem:[#allocation6 + $0x35c] sm:$0xf0]  ;;  %v7966_v34 = vld [vmem:[#allocation6 + $0x48c] sm:$0xf]  ;;  %v6754_v37 = vor.u32 %v7886_v29, %v6751_v53  ;;  %v6571_v39 = vld [vmem:[#allocation6 + $0xb4] sm:$0xf0] }
 0x3f5   :  { %4111 = vmatpush.bf16.msra.mxu1 %v6990_v54  ;;  %v7071_v36 = vld [vmem:[#allocation6 + $0x49c] sm:$0xf0]  ;;  %v6914_v40 = vor.u32 %v7926_v57, %v6911_v31  ;;  %v7881_v41 = vld [vmem:[#allocation6 + $0x1e4] sm:$0xf]  ;;  %v6731_v43 = vld [vmem:[#allocation6 + $0x1f4] sm:$0xf0]  ;;  %v6574_v47 = vor.u32 %v7841_v38, %v6571_v39 }
 0x3f6   :  { %4073 = vmatpush.bf16.msrb.mxu2 %v6490_v60  ;;  %v7074_v44 = vor.u32 %v7966_v34, %v7071_v36  ;;  %v7921_v45 = vld [vmem:[#allocation6 + $0x324] sm:$0xf]  ;;  %v6891_v46 = vld [vmem:[#allocation6 + $0x334] sm:$0xf0]  ;;  %v6734_v50 = vor.u32 %v7881_v41, %v6731_v43  ;;  %v7836_v59 = vld [vmem:[#allocation6 + $0x7c] sm:$0xf] }
 0x3f7   :  { %4086 = vmatpush.bf16.msrb.mxu3 %v6650_v6  ;;  %v7961_v48 = vld [vmem:[#allocation6 + $0x464] sm:$0xf]  ;;  %v7051_v49 = vld [vmem:[#allocation6 + $0x474] sm:$0xf0]  ;;  %v6551_v54 = vld [vmem:[#allocation6 + $0x8c] sm:$0xf0]  ;;  %v6894_v5 = vor.u32 %v7921_v45, %v6891_v46 }
 0x3f8   :  { %4099 = vmatpush.bf16.msra.mxu0 %v6810_v32  ;;  %v7876_v21 = vld [vmem:[#allocation6 + $0x1bc] sm:$0xf]  ;;  %v6711_v58 = vld [vmem:[#allocation6 + $0x1cc] sm:$0xf0]  ;;  %v7054_v35 = vor.u32 %v7961_v48, %v7051_v49  ;;  %v6554_v60 = vor.u32 %v7836_v59, %v6551_v54  ;;  %v7831_v6 = vld [vmem:[#allocation6 + $0x54] sm:$0xf] }
 0x3f9   :  { %4112 = vmatpush.bf16.msra.mxu1 %v6970_v52  ;;  %4074 = vmatmul.bf16.vlgmr.msrb.gmra.mxu2 %v8416_v55  ;;  %v7916_v56 = vld [vmem:[#allocation6 + $0x2fc] sm:$0xf]  ;;  %v6871_v12 = vld [vmem:[#allocation6 + $0x30c] sm:$0xf0]  ;;  %v6714_v63 = vor.u32 %v7876_v21, %v6711_v58  ;;  %v7871_v9 = vld [vmem:[#allocation6 + $0x194] sm:$0xf] }
 0x3fa   :  { %4118 = vmatpush.bf16.msra.mxu2 %v6634_v7  ;;  %4087 = vmatmul.bf16.vlgmr.msrb.gmra.mxu3 %v8414_v51  ;;  %v7956_v61 = vld [vmem:[#allocation6 + $0x43c] sm:$0xf]  ;;  %v7031_v62 = vld [vmem:[#allocation6 + $0x44c] sm:$0xf0]  ;;  %v6531_v7 = vld [vmem:[#allocation6 + $0x64] sm:$0xf0]  ;;  %v6874_v8 = vor.u32 %v7916_v56, %v6871_v12 }
 0x3fb   :  { %4131 = vmatpush.bf16.msra.mxu3 %v6794_v10  ;;  %4100 = vmatmul.bf16.vlgmr.msra.gmra.mxu0 %v8422_v14  ;;  %v6691_v10 = vld [vmem:[#allocation6 + $0x1a4] sm:$0xf0]  ;;  %v7034_v32 = vor.u32 %v7956_v61, %v7031_v62  ;;  %v7911_v24 = vld [vmem:[#allocation6 + $0x2d4] sm:$0xf]  ;;  %v6534_v52 = vor.u32 %v7831_v6, %v6531_v7  ;;  %v6511_v18 = vld [vmem:[#allocation6 + $0x3c] sm:$0xf0] }
 0x3fc   :  { %4144 = vmatpush.bf16.msrb.mxu0 %v6954_v13  ;;  %4113 = vmatmul.bf16.vlgmr.msra.gmra.mxu1 %v8420_v11  ;;  %v6851_v42 = vld [vmem:[#allocation6 + $0x2e4] sm:$0xf0]  ;;  %v7951_v13 = vld [vmem:[#allocation6 + $0x414] sm:$0xf]  ;;  %v6694_v16 = vor.u32 %v7871_v9, %v6691_v10  ;;  %v6671_v22 = vld [vmem:[#allocation6 + $0x17c] sm:$0xf0] }
 0x3fd   :  { %4157 = vmatpush.bf16.msrb.mxu1 %v7114_v17  ;;  %v7011_v15 = vld [vmem:[#allocation6 + $0x424] sm:$0xf0]  ;;  %v7826_v17 = vld [vmem:[#allocation6 + $0x2c] sm:$0xf]  ;;  %v6854_v19 = vor.u32 %v7911_v24, %v6851_v42  ;;  %v6831_v26 = vld [vmem:[#allocation6 + $0x2bc] sm:$0xf0] }
 0x3fe   :  { %4119 = vmatpush.bf16.msra.mxu2 %v6614_v20  ;;  %v7866_v20 = vld [vmem:[#allocation6 + $0x16c] sm:$0xf]  ;;  %v7014_v23 = vor.u32 %v7951_v13, %v7011_v15  ;;  %v6991_v29 = vld [vmem:[#allocation6 + $0x3fc] sm:$0xf0]  ;;  %v7821_v53 = vld [vmem:[#allocation6 + $0x4] sm:$0xf] }
 0x3ff   :  { %4132 = vmatpush.bf16.msra.mxu3 %v6774_v25  ;;  %v7906_v25 = vld [vmem:[#allocation6 + $0x2ac] sm:$0xf]  ;;  %v6674_v57 = vor.u32 %v7866_v20, %v6671_v22  ;;  %v7861_v31 = vld [vmem:[#allocation6 + $0x144] sm:$0xf]  ;;  %v6637_v34 = vld [vmem:[#allocation6 + $0x120] sm:$0xf] }
 0x400   :  { %4145 = vmatpush.bf16.msrb.mxu0 %v6934_v28  ;;  %v7946_v27 = vld [vmem:[#allocation6 + $0x3ec] sm:$0xf]  ;;  %v6514_v28 = vor.u32 %v7826_v17, %v6511_v18  ;;  %v6834_v36 = vor.u32 %v7906_v25, %v6831_v26  ;;  %v6797_v38 = vld [vmem:[#allocation6 + $0x260] sm:$0xf]  ;;  %v7899_v39 = vld [vmem:[#allocation6 + $0x270] sm:$0xf0] }
 0x401   :  { %4158 = vmatpush.bf16.msrb.mxu1 %v7094_v30  ;;  %v6491_v30 = vld [vmem:[#allocation6 + $0x14] sm:$0xf0]  ;;  %v7901_v41 = vld [vmem:[#allocation6 + $0x284] sm:$0xf]  ;;  %v7939_v48 = vld [vmem:[#allocation6 + $0x3b0] sm:$0xf0] }
 0x402   :  { %4120 = vmatpush.bf16.msra.mxu2 %v6594_v33  ;;  %v6651_v33 = vld [vmem:[#allocation6 + $0x154] sm:$0xf0]  ;;  %v6494_v45 = vor.u32 %v7821_v53, %v6491_v30  ;;  %v7117_v59 = vld [vmem:[#allocation6 + $0x4e0] sm:$0xf]  ;;  %v7979_v54 = vld [vmem:[#allocation6 + $0x4f0] sm:$0xf0] }
 0x403   :  { %4133 = vmatpush.bf16.msra.mxu3 %v6754_v37  ;;  %v7859_v37 = vld [vmem:[#allocation6 + $0x130] sm:$0xf0]  ;;  %v6811_v43 = vld [vmem:[#allocation6 + $0x294] sm:$0xf0]  ;;  %v6654_v49 = vor.u32 %v7861_v31, %v6651_v33  ;;  %v7894_v61 = vld [vmem:[#allocation6 + $0x248] sm:$0xf0]  ;;  %v7118_v62 = vor.u32 %v7979_v54, %v7117_v59 }
 0x404   :  { %4146 = vmatpush.bf16.msrb.mxu0 %v6914_v40  ;;  %v6994_v40 = vor.u32 %v7946_v27, %v6991_v29  ;;  %v6971_v46 = vld [vmem:[#allocation6 + $0x3d4] sm:$0xf0]  ;;  %v6814_v21 = vor.u32 %v7901_v41, %v6811_v43  ;;  %v7934_v6 = vld [vmem:[#allocation6 + $0x388] sm:$0xf0]  ;;  %v7849_v24 = vld [vmem:[#allocation6 + $0xe0] sm:$0xf0] }
 0x405   :  { %4159 = vmatpush.bf16.msrb.mxu1 %v7074_v44  ;;  %v7941_v44 = vld [vmem:[#allocation6 + $0x3c4] sm:$0xf]  ;;  %v6617_v58 = vld [vmem:[#allocation6 + $0xf8] sm:$0xf]  ;;  %v7974_v9 = vld [vmem:[#allocation6 + $0x4c8] sm:$0xf0] }
 0x406   :  { %4121 = vmatpush.bf16.msra.mxu2 %v6574_v47  ;;  %v6957_v47 = vld [vmem:[#allocation6 + $0x3a0] sm:$0xf]  ;;  %v6974_v56 = vor.u32 %v7941_v44, %v6971_v46  ;;  %v7889_v13 = vld [vmem:[#allocation6 + $0x220] sm:$0xf0]  ;;  %v7844_v25 = vld [vmem:[#allocation6 + $0xb8] sm:$0xf0] }
 0x407   :  { %4134 = vmatpush.bf16.msra.mxu3 %v6734_v50  ;;  %v6638_v50 = vor.u32 %v7859_v37, %v6637_v34  ;;  %v6958_v12 = vor.u32 %v7939_v48, %v6957_v47  ;;  %v7929_v17 = vld [vmem:[#allocation6 + $0x360] sm:$0xf0]  ;;  %v6737_v27 = vld [vmem:[#allocation6 + $0x1e8] sm:$0xf]  ;;  %v7924_v30 = vld [vmem:[#allocation6 + $0x338] sm:$0xf0] }
 0x408   :  { %4147 = vmatpush.bf16.msrb.mxu0 %v6894_v5  ;;  %v6798_v5 = vor.u32 %v7899_v39, %v6797_v38  ;;  %v7969_v20 = vld [vmem:[#allocation6 + $0x4a0] sm:$0xf0]  ;;  %v6897_v53 = vld [vmem:[#allocation6 + $0x328] sm:$0xf]  ;;  %v7964_v33 = vld [vmem:[#allocation6 + $0x478] sm:$0xf0] }
 0x409   :  { %4160 = vmatpush.bf16.msrb.mxu1 %v7054_v35  ;;  %v7854_v35 = vld [vmem:[#allocation6 + $0x108] sm:$0xf0]  ;;  %v7057_v31 = vld [vmem:[#allocation6 + $0x468] sm:$0xf]  ;;  %v7839_v37 = vld [vmem:[#allocation6 + $0x90] sm:$0xf0]  ;;  %v6898_v38 = vor.u32 %v7924_v30, %v6897_v53 }
 0x40a   :  { %4122 = vmatpush.bf16.msra.mxu2 %v6554_v60  ;;  %v6777_v60 = vld [vmem:[#allocation6 + $0x238] sm:$0xf]  ;;  %v6618_v7 = vor.u32 %v7854_v35, %v6617_v58  ;;  %v6717_v39 = vld [vmem:[#allocation6 + $0x1c0] sm:$0xf]  ;;  %v7058_v41 = vor.u32 %v7964_v33, %v7057_v31  ;;  %v7919_v44 = vld [vmem:[#allocation6 + $0x310] sm:$0xf0] }
 0x40b   :  { %4135 = vmatpush.bf16.msra.mxu3 %v6714_v63  ;;  %v6937_v63 = vld [vmem:[#allocation6 + $0x378] sm:$0xf]  ;;  %v6778_v10 = vor.u32 %v7894_v61, %v6777_v60  ;;  %v6877_v43 = vld [vmem:[#allocation6 + $0x300] sm:$0xf]  ;;  %v7959_v47 = vld [vmem:[#allocation6 + $0x450] sm:$0xf0] }
 0x40c   :  { %4148 = vmatpush.bf16.msrb.mxu0 %v6874_v8  ;;  %v7097_v8 = vld [vmem:[#allocation6 + $0x4b8] sm:$0xf]  ;;  %v6938_v42 = vor.u32 %v7934_v6, %v6937_v63  ;;  %v7037_v46 = vld [vmem:[#allocation6 + $0x440] sm:$0xf]  ;;  %v6878_v59 = vor.u32 %v7919_v44, %v6877_v43  ;;  %v7914_v35 = vld [vmem:[#allocation6 + $0x2e8] sm:$0xf0] }
 0x40d   :  { %4161 = vmatpush.bf16.msrb.mxu1 %v7034_v32  ;;  %v6597_v32 = vld [vmem:[#allocation6 + $0xd0] sm:$0xf]  ;;  %v7098_v15 = vor.u32 %v7974_v9, %v7097_v8  ;;  %v6697_v54 = vld [vmem:[#allocation6 + $0x198] sm:$0xf]  ;;  %v7954_v60 = vld [vmem:[#allocation6 + $0x428] sm:$0xf0] }
 0x40e   :  { %4123 = vmatpush.bf16.msra.mxu2 %v6534_v52  ;;  %v6757_v52 = vld [vmem:[#allocation6 + $0x210] sm:$0xf]  ;;  %v6598_v18 = vor.u32 %v7849_v24, %v6597_v32  ;;  %v6857_v58 = vld [vmem:[#allocation6 + $0x2d8] sm:$0xf]  ;;  %v7829_v63 = vld [vmem:[#allocation6 + $0x40] sm:$0xf0] }
 0x40f   :  { %4136 = vmatpush.bf16.msra.mxu3 %v6694_v16  ;;  %v6917_v16 = vld [vmem:[#allocation6 + $0x350] sm:$0xf]  ;;  %v6758_v22 = vor.u32 %v7889_v13, %v6757_v52  ;;  %v6858_v6 = vor.u32 %v7914_v35, %v6857_v58  ;;  %v7869_v8 = vld [vmem:[#allocation6 + $0x180] sm:$0xf0]  ;;  %v6497_v13 = vld [vmem:[#allocation6 + $0x8] sm:$0xf] }
 0x410   :  { %4149 = vmatpush.bf16.msrb.mxu0 %v6854_v19  ;;  %v7077_v19 = vld [vmem:[#allocation6 + $0x490] sm:$0xf]  ;;  %v6918_v26 = vor.u32 %v7929_v17, %v6917_v16  ;;  %v7909_v32 = vld [vmem:[#allocation6 + $0x2c0] sm:$0xf0]  ;;  %v6657_v17 = vld [vmem:[#allocation6 + $0x148] sm:$0xf] }
 0x411   :  { %4162 = vmatpush.bf16.msrb.mxu1 %v7014_v23  ;;  %v6577_v23 = vld [vmem:[#allocation6 + $0xa8] sm:$0xf]  ;;  %v7078_v29 = vor.u32 %v7969_v20, %v7077_v19  ;;  %v6997_v24 = vld [vmem:[#allocation6 + $0x3f0] sm:$0xf]  ;;  %v7949_v52 = vld [vmem:[#allocation6 + $0x400] sm:$0xf0] }
 0x412   :  { %4124 = vmatpush.bf16.msra.mxu2 %v6514_v28  ;;  %v7884_v28 = vld [vmem:[#allocation6 + $0x1f8] sm:$0xf0]  ;;  %v7857_v19 = vld [vmem:[#allocation6 + $0x124] sm:$0xf]  ;;  %v6959_v31 = vld [vmem:[#allocation6 + $0x3b4] sm:$0xf0] }
 0x413   :  { %4137 = vmatpush.bf16.msra.mxu3 %v6674_v57  ;;  %v6578_v57 = vor.u32 %v7844_v25, %v6577_v23  ;;  %v6738_v34 = vor.u32 %v7884_v28, %v6737_v27  ;;  %v7897_v23 = vld [vmem:[#allocation6 + $0x264] sm:$0xf]  ;;  %v6799_v25 = vld [vmem:[#allocation6 + $0x274] sm:$0xf0]  ;;  %v6817_v27 = vld [vmem:[#allocation6 + $0x288] sm:$0xf] }
 0x414   :  { %4150 = vmatpush.bf16.msrb.mxu0 %v6834_v36  ;;  %v6557_v36 = vld [vmem:[#allocation6 + $0x80] sm:$0xf]  ;;  %v7904_v28 = vld [vmem:[#allocation6 + $0x298] sm:$0xf0]  ;;  %v6599_v58 = vld [vmem:[#allocation6 + $0xe4] sm:$0xf0] }
 0x415   :  { %4163 = vmatpush.bf16.msrb.mxu1 %v6994_v40  ;;  %v7879_v40 = vld [vmem:[#allocation6 + $0x1d0] sm:$0xf0]  ;;  %v7944_v30 = vld [vmem:[#allocation6 + $0x3d8] sm:$0xf0] }
 0x416   :  { %4125 = vmatpush.bf16.msra.mxu2 %v6494_v45  ;;  %v6558_v45 = vor.u32 %v7839_v37, %v6557_v36  ;;  %v6718_v48 = vor.u32 %v7879_v40, %v6717_v39  ;;  %v7977_v36 = vld [vmem:[#allocation6 + $0x4e4] sm:$0xf]  ;;  %v7119_v37 = vld [vmem:[#allocation6 + $0x4f4] sm:$0xf0]  ;;  %v6818_v39 = vor.u32 %v7904_v28, %v6817_v27  ;;  %v7852_v40 = vld [vmem:[#allocation6 + $0xfc] sm:$0xf] }
 0x417   :  { %4138 = vmatpush.bf16.msra.mxu3 %v6654_v49  ;;  %v6537_v49 = vld [vmem:[#allocation6 + $0x58] sm:$0xf]  ;;  %v7917_v28 = vld [vmem:[#allocation6 + $0x304] sm:$0xf] }
 0x418   :  { %4151 = vmatpush.bf16.msrb.mxu0 %v6814_v21  ;;  %v7038_v21 = vor.u32 %v7959_v47, %v7037_v46  ;;  %v6779_v46 = vld [vmem:[#allocation6 + $0x24c] sm:$0xf0]  ;;  %v7122_v47 = vor.u32 %v7977_v36, %v7119_v37  ;;  %v7872_v37 = vld [vmem:[#allocation6 + $0x19c] sm:$0xf] }
 0x419   :  { %4164 = vmatpush.bf16.msrb.mxu1 %v6974_v56  ;;  %4126 = vmatmul.bf16.vlgmr.msra.gmra.mxu2 %v8416_v55 }
 0x41a   :  { %4170 = vmatpush.bf16.msrb.mxu2 %v6638_v50  ;;  %4139 = vmatmul.bf16.vlgmr.msra.gmra.mxu3 %v8414_v51  ;;  %v7834_v50 = vld [vmem:[#allocation6 + $0x68] sm:$0xf0] }
 0x41b   :  { %4183 = vmatpush.bf16.msrb.mxu3 %v6798_v5  ;;  %4152 = vmatmul.bf16.vlgmr.msrb.gmra.mxu0 %v8422_v14  ;;  %v7874_v5 = vld [vmem:[#allocation6 + $0x1a8] sm:$0xf0]  ;;  %v6538_v56 = vor.u32 %v7834_v50, %v6537_v49  ;;  %v6939_v49 = vld [vmem:[#allocation6 + $0x38c] sm:$0xf0] }
 0x41c   :  { %4196 = vmatpush.bf16.msra.mxu0 %v6958_v12  ;;  %4165 = vmatmul.bf16.vlgmr.msrb.gmra.mxu1 %v8420_v11  ;;  %v7017_v12 = vld [vmem:[#allocation6 + $0x418] sm:$0xf]  ;;  %v6698_v61 = vor.u32 %v7874_v5, %v6697_v54  ;;  %v7099_v54 = vld [vmem:[#allocation6 + $0x4cc] sm:$0xf0] }
 0x41d   :  { %4209 = vmatpush.bf16.msra.mxu1 %v7118_v62  ;;  %v6517_v62 = vld [vmem:[#allocation6 + $0x30] sm:$0xf]  ;;  %v7018_v9 = vor.u32 %v7954_v60, %v7017_v12  ;;  %v6759_v12 = vld [vmem:[#allocation6 + $0x224] sm:$0xf0] }
 0x41e   :  { %4171 = vmatpush.bf16.msrb.mxu2 %v6618_v7  ;;  %v6677_v7 = vld [vmem:[#allocation6 + $0x170] sm:$0xf] }
 0x41f   :  { %4184 = vmatpush.bf16.msrb.mxu3 %v6778_v10  ;;  %v6837_v10 = vld [vmem:[#allocation6 + $0x2b0] sm:$0xf]  ;;  %v6678_v16 = vor.u32 %v7869_v8, %v6677_v7  ;;  %v7079_v7 = vld [vmem:[#allocation6 + $0x4a4] sm:$0xf0] }
 0x420   :  { %4197 = vmatpush.bf16.msra.mxu0 %v6938_v42  ;;  %v6518_v42 = vor.u32 %v7829_v63, %v6517_v62  ;;  %v6838_v20 = vor.u32 %v7909_v32, %v6837_v10  ;;  %v6919_v62 = vld [vmem:[#allocation6 + $0x364] sm:$0xf0]  ;;  %v6579_v10 = vld [vmem:[#allocation6 + $0xbc] sm:$0xf0] }
 0x421   :  { %4210 = vmatpush.bf16.msra.mxu1 %v7098_v15  ;;  %v7824_v15 = vld [vmem:[#allocation6 + $0x18] sm:$0xf0] }
 0x422   :  { %4172 = vmatpush.bf16.msrb.mxu2 %v6598_v18  ;;  %v7864_v18 = vld [vmem:[#allocation6 + $0x158] sm:$0xf0]  ;;  %v6498_v53 = vor.u32 %v7824_v15, %v6497_v13  ;;  %v7922_v13 = vld [vmem:[#allocation6 + $0x32c] sm:$0xf]  ;;  %v6899_v15 = vld [vmem:[#allocation6 + $0x33c] sm:$0xf0] }
 0x423   :  { %4185 = vmatpush.bf16.msrb.mxu3 %v6758_v22  ;;  %v6639_v22 = vld [vmem:[#allocation6 + $0x134] sm:$0xf0]  ;;  %v6658_v33 = vor.u32 %v7864_v18, %v6657_v17  ;;  %v7962_v17 = vld [vmem:[#allocation6 + $0x46c] sm:$0xf]  ;;  %v7059_v18 = vld [vmem:[#allocation6 + $0x47c] sm:$0xf0] }
 0x424   :  { %4198 = vmatpush.bf16.msra.mxu0 %v6918_v26  ;;  %v6998_v26 = vor.u32 %v7949_v52, %v6997_v24  ;;  %v7882_v24 = vld [vmem:[#allocation6 + $0x1ec] sm:$0xf]  ;;  %v7062_v27 = vor.u32 %v7962_v17, %v7059_v18  ;;  %v7940_v17 = vld [vmem:[#allocation6 + $0x3b8] sm:$0xf0] }
 0x425   :  { %4211 = vmatpush.bf16.msra.mxu1 %v7078_v29  ;;  %v6977_v29 = vld [vmem:[#allocation6 + $0x3c8] sm:$0xf] }
 0x426   :  { %4173 = vmatpush.bf16.msrb.mxu2 %v6578_v57  ;;  %v7937_v57 = vld [vmem:[#allocation6 + $0x3a4] sm:$0xf]  ;;  %v6978_v43 = vor.u32 %v7944_v30, %v6977_v29  ;;  %v6879_v29 = vld [vmem:[#allocation6 + $0x314] sm:$0xf0] }
 0x427   :  { %4186 = vmatpush.bf16.msrb.mxu3 %v6738_v34  ;;  %v6642_v34 = vor.u32 %v7857_v19, %v6639_v22  ;;  %v6962_v44 = vor.u32 %v7937_v57, %v6959_v31  ;;  %v6559_v22 = vld [vmem:[#allocation6 + $0x94] sm:$0xf0]  ;;  %v7957_v30 = vld [vmem:[#allocation6 + $0x444] sm:$0xf]  ;;  %v6882_v36 = vor.u32 %v7917_v28, %v6879_v29 }
 0x428   :  { %4199 = vmatpush.bf16.msra.mxu0 %v6898_v38  ;;  %v6802_v38 = vor.u32 %v7897_v23, %v6799_v25  ;;  %v6902_v23 = vor.u32 %v7922_v13, %v6899_v15  ;;  %v7877_v25 = vld [vmem:[#allocation6 + $0x1c4] sm:$0xf]  ;;  %v7039_v57 = vld [vmem:[#allocation6 + $0x454] sm:$0xf0]  ;;  %v6979_v15 = vld [vmem:[#allocation6 + $0x3dc] sm:$0xf0] }
 0x429   :  { %4212 = vmatpush.bf16.msra.mxu1 %v7058_v41  ;;  %v6619_v41 = vld [vmem:[#allocation6 + $0x10c] sm:$0xf0] }
 0x42a   :  { %4174 = vmatpush.bf16.msrb.mxu2 %v6558_v45  ;;  %v7892_v45 = vld [vmem:[#allocation6 + $0x23c] sm:$0xf]  ;;  %v6622_v50 = vor.u32 %v7852_v40, %v6619_v41  ;;  %v6859_v41 = vld [vmem:[#allocation6 + $0x2ec] sm:$0xf0] }
 0x42b   :  { %4187 = vmatpush.bf16.msrb.mxu3 %v6718_v48  ;;  %v7932_v48 = vld [vmem:[#allocation6 + $0x37c] sm:$0xf]  ;;  %v6782_v5 = vor.u32 %v7892_v45, %v6779_v46  ;;  %v7019_v45 = vld [vmem:[#allocation6 + $0x42c] sm:$0xf0] }
 0x42c   :  { %4200 = vmatpush.bf16.msra.mxu0 %v6878_v59  ;;  %v7972_v59 = vld [vmem:[#allocation6 + $0x4bc] sm:$0xf]  ;;  %v6942_v35 = vor.u32 %v7932_v48, %v6939_v49  ;;  %v6519_v48 = vld [vmem:[#allocation6 + $0x44] sm:$0xf0] }
 0x42d   :  { %4213 = vmatpush.bf16.msra.mxu1 %v7038_v21  ;;  %v7847_v21 = vld [vmem:[#allocation6 + $0xd4] sm:$0xf]  ;;  %v7102_v60 = vor.u32 %v7972_v59, %v7099_v54  ;;  %v7912_v40 = vld [vmem:[#allocation6 + $0x2dc] sm:$0xf]  ;;  %v6679_v59 = vld [vmem:[#allocation6 + $0x184] sm:$0xf0] }
 0x42e   :  { %4175 = vmatpush.bf16.msrb.mxu2 %v6538_v56  ;;  %v7887_v56 = vld [vmem:[#allocation6 + $0x214] sm:$0xf]  ;;  %v6602_v63 = vor.u32 %v7847_v21, %v6599_v58  ;;  %v6862_v49 = vor.u32 %v7912_v40, %v6859_v41  ;;  %v6839_v21 = vld [vmem:[#allocation6 + $0x2c4] sm:$0xf0]  ;;  %v7850_v40 = vld [vmem:[#allocation6 + $0xe8] sm:$0xf0] }
 0x42f   :  { %4188 = vmatpush.bf16.msrb.mxu3 %v6698_v61  ;;  %v7927_v61 = vld [vmem:[#allocation6 + $0x354] sm:$0xf]  ;;  %v6762_v8 = vor.u32 %v7887_v56, %v6759_v12  ;;  %v6999_v56 = vld [vmem:[#allocation6 + $0x404] sm:$0xf0]  ;;  %v7822_v12 = vld [vmem:[#allocation6 + $0xc] sm:$0xf] }
 0x430   :  { %4201 = vmatpush.bf16.msra.mxu0 %v6858_v6  ;;  %v7967_v6 = vld [vmem:[#allocation6 + $0x494] sm:$0xf]  ;;  %v6922_v32 = vor.u32 %v7927_v61, %v6919_v62  ;;  %v7862_v62 = vld [vmem:[#allocation6 + $0x14c] sm:$0xf] }
 0x431   :  { %4214 = vmatpush.bf16.msra.mxu1 %v7018_v9  ;;  %v7842_v9 = vld [vmem:[#allocation6 + $0xac] sm:$0xf]  ;;  %v7082_v52 = vor.u32 %v7967_v6, %v7079_v7  ;;  %v7947_v58 = vld [vmem:[#allocation6 + $0x3f4] sm:$0xf]  ;;  %v6645_v6 = vld [vmem:[#allocation6 + $0x128] sm:$0xf] }
 0x432   :  { %4176 = vmatpush.bf16.msrb.mxu2 %v6518_v42  ;;  %v6739_v42 = vld [vmem:[#allocation6 + $0x1fc] sm:$0xf0] }
 0x433   :  { %4189 = vmatpush.bf16.msrb.mxu3 %v6678_v16  ;;  %v6582_v16 = vor.u32 %v7842_v9, %v6579_v10  ;;  %v6742_v19 = vor.u32 %v7882_v24, %v6739_v42  ;;  %v6805_v9 = vld [vmem:[#allocation6 + $0x268] sm:$0xf]  ;;  %v7900_v10 = vld [vmem:[#allocation6 + $0x278] sm:$0xf0]  ;;  %v7902_v24 = vld [vmem:[#allocation6 + $0x28c] sm:$0xf] }
 0x434   :  { %4202 = vmatpush.bf16.msra.mxu0 %v6838_v20  ;;  %v7837_v20 = vld [vmem:[#allocation6 + $0x84] sm:$0xf]  ;;  %v6819_v42 = vld [vmem:[#allocation6 + $0x29c] sm:$0xf0] }
 0x435   :  { %4215 = vmatpush.bf16.msra.mxu1 %v6998_v26  ;;  %v6719_v26 = vld [vmem:[#allocation6 + $0x1d4] sm:$0xf0] }
 0x436   :  { %4177 = vmatpush.bf16.msrb.mxu2 %v6498_v53  ;;  %v6562_v53 = vor.u32 %v7837_v20, %v6559_v22  ;;  %v6722_v31 = vor.u32 %v7877_v25, %v6719_v26  ;;  %v7125_v20 = vld [vmem:[#allocation6 + $0x4e8] sm:$0xf]  ;;  %v7980_v22 = vld [vmem:[#allocation6 + $0x4f8] sm:$0xf0]  ;;  %v6822_v25 = vor.u32 %v7902_v24, %v6819_v42  ;;  %v6625_v26 = vld [vmem:[#allocation6 + $0x100] sm:$0xf] }
 0x437   :  { %4190 = vmatpush.bf16.msrb.mxu3 %v6658_v33  ;;  %v7832_v33 = vld [vmem:[#allocation6 + $0x5c] sm:$0xf]  ;;  %v6885_v42 = vld [vmem:[#allocation6 + $0x308] sm:$0xf] }
 0x438   :  { %4203 = vmatpush.bf16.msra.mxu0 %v6818_v39  ;;  %v7042_v39 = vor.u32 %v7957_v30, %v7039_v57  ;;  %v7895_v30 = vld [vmem:[#allocation6 + $0x250] sm:$0xf0]  ;;  %v7126_v57 = vor.u32 %v7980_v22, %v7125_v20  ;;  %v6705_v22 = vld [vmem:[#allocation6 + $0x1a0] sm:$0xf] }
 0x439   :  { %4216 = vmatpush.bf16.msra.mxu1 %v6978_v43  ;;  %4178 = vmatmul.bf16.vlgmr.msrb.gmra.mxu2 %v8416_v55 }
 0x43a   :  { %4222 = vmatpush.bf16.msra.mxu2 %v6642_v34  ;;  %4191 = vmatmul.bf16.vlgmr.msrb.gmra.mxu3 %v8414_v51  ;;  %v6539_v34 = vld [vmem:[#allocation6 + $0x6c] sm:$0xf0] }
 0x43b   :  { %4235 = vmatpush.bf16.msra.mxu3 %v6802_v38  ;;  %4204 = vmatmul.bf16.vlgmr.msra.gmra.mxu0 %v8422_v14  ;;  %v6699_v38 = vld [vmem:[#allocation6 + $0x1ac] sm:$0xf0]  ;;  %v6542_v43 = vor.u32 %v7832_v33, %v6539_v34  ;;  %v7935_v33 = vld [vmem:[#allocation6 + $0x390] sm:$0xf0] }
 0x43c   :  { %4248 = vmatpush.bf16.msrb.mxu0 %v6962_v44  ;;  %4217 = vmatmul.bf16.vlgmr.msra.gmra.mxu1 %v8420_v11  ;;  %v7952_v44 = vld [vmem:[#allocation6 + $0x41c] sm:$0xf]  ;;  %v6702_v46 = vor.u32 %v7872_v37, %v6699_v38  ;;  %v7975_v37 = vld [vmem:[#allocation6 + $0x4d0] sm:$0xf0] }
 0x43d   :  { %4261 = vmatpush.bf16.msrb.mxu1 %v7122_v47  ;;  %v7827_v47 = vld [vmem:[#allocation6 + $0x34] sm:$0xf]  ;;  %v7022_v54 = vor.u32 %v7952_v44, %v7019_v45  ;;  %v7890_v44 = vld [vmem:[#allocation6 + $0x228] sm:$0xf0] }
 0x43e   :  { %4223 = vmatpush.bf16.msra.mxu2 %v6622_v50  ;;  %v7867_v50 = vld [vmem:[#allocation6 + $0x174] sm:$0xf] }
 0x43f   :  { %4236 = vmatpush.bf16.msra.mxu3 %v6782_v5  ;;  %v7907_v5 = vld [vmem:[#allocation6 + $0x2b4] sm:$0xf]  ;;  %v6682_v61 = vor.u32 %v7867_v50, %v6679_v59  ;;  %v7970_v50 = vld [vmem:[#allocation6 + $0x4a8] sm:$0xf0] }
 0x440   :  { %4249 = vmatpush.bf16.msrb.mxu0 %v6942_v35  ;;  %v6522_v35 = vor.u32 %v7827_v47, %v6519_v48  ;;  %v6842_v7 = vor.u32 %v7907_v5, %v6839_v21  ;;  %v7930_v47 = vld [vmem:[#allocation6 + $0x368] sm:$0xf0]  ;;  %v7845_v5 = vld [vmem:[#allocation6 + $0xc0] sm:$0xf0] }
 0x441   :  { %4262 = vmatpush.bf16.msrb.mxu1 %v7102_v60  ;;  %v6499_v60 = vld [vmem:[#allocation6 + $0x1c] sm:$0xf0] }
 0x442   :  { %4224 = vmatpush.bf16.msra.mxu2 %v6602_v63  ;;  %v6659_v63 = vld [vmem:[#allocation6 + $0x15c] sm:$0xf0]  ;;  %v6502_v13 = vor.u32 %v7822_v12, %v6499_v60  ;;  %v6905_v12 = vld [vmem:[#allocation6 + $0x330] sm:$0xf]  ;;  %v7925_v60 = vld [vmem:[#allocation6 + $0x340] sm:$0xf0] }
 0x443   :  { %4237 = vmatpush.bf16.msra.mxu3 %v6762_v8  ;;  %v7860_v8 = vld [vmem:[#allocation6 + $0x138] sm:$0xf0]  ;;  %v6662_v18 = vor.u32 %v7862_v62, %v6659_v63  ;;  %v7065_v62 = vld [vmem:[#allocation6 + $0x470] sm:$0xf]  ;;  %v7965_v63 = vld [vmem:[#allocation6 + $0x480] sm:$0xf0] }
 0x444   :  { %4250 = vmatpush.bf16.msrb.mxu0 %v6922_v32  ;;  %v7002_v32 = vor.u32 %v7947_v58, %v6999_v56  ;;  %v6745_v58 = vld [vmem:[#allocation6 + $0x1f0] sm:$0xf]  ;;  %v7066_v24 = vor.u32 %v7965_v63, %v7065_v62 }
 0x445   :  { %4263 = vmatpush.bf16.msrb.mxu1 %v7082_v52  ;;  %v7942_v52 = vld [vmem:[#allocation6 + $0x3cc] sm:$0xf] }
 0x446   :  { %4225 = vmatpush.bf16.msra.mxu2 %v6582_v16  ;;  %v6965_v16 = vld [vmem:[#allocation6 + $0x3a8] sm:$0xf]  ;;  %v6982_v28 = vor.u32 %v7942_v52, %v6979_v15  ;;  %v7920_v52 = vld [vmem:[#allocation6 + $0x318] sm:$0xf0] }
 0x447   :  { %4238 = vmatpush.bf16.msra.mxu3 %v6742_v19  ;;  %v6646_v19 = vor.u32 %v7860_v8, %v6645_v6  ;;  %v6966_v29 = vor.u32 %v7940_v17, %v6965_v16  ;;  %v7840_v8 = vld [vmem:[#allocation6 + $0x98] sm:$0xf0]  ;;  %v7045_v15 = vld [vmem:[#allocation6 + $0x448] sm:$0xf]  ;;  %v6886_v20 = vor.u32 %v7920_v52, %v6885_v42 }
 0x448   :  { %4251 = vmatpush.bf16.msrb.mxu0 %v6902_v23  ;;  %v6806_v23 = vor.u32 %v7900_v10, %v6805_v9  ;;  %v6906_v9 = vor.u32 %v7925_v60, %v6905_v12  ;;  %v6725_v10 = vld [vmem:[#allocation6 + $0x1c8] sm:$0xf]  ;;  %v7960_v16 = vld [vmem:[#allocation6 + $0x458] sm:$0xf0] }
 0x449   :  { %4264 = vmatpush.bf16.msrb.mxu1 %v7062_v27  ;;  %v7855_v27 = vld [vmem:[#allocation6 + $0x110] sm:$0xf0] }
 0x44a   :  { %4226 = vmatpush.bf16.msra.mxu2 %v6562_v53  ;;  %v6785_v53 = vld [vmem:[#allocation6 + $0x240] sm:$0xf]  ;;  %v6626_v34 = vor.u32 %v7855_v27, %v6625_v26  ;;  %v7915_v27 = vld [vmem:[#allocation6 + $0x2f0] sm:$0xf0] }
 0x44b   :  { %4239 = vmatpush.bf16.msra.mxu3 %v6722_v31  ;;  %v6945_v31 = vld [vmem:[#allocation6 + $0x380] sm:$0xf]  ;;  %v6786_v38 = vor.u32 %v7895_v30, %v6785_v53  ;;  %v7955_v53 = vld [vmem:[#allocation6 + $0x430] sm:$0xf0] }
 0x44c   :  { %4252 = vmatpush.bf16.msrb.mxu0 %v6882_v36  ;;  %v7105_v36 = vld [vmem:[#allocation6 + $0x4c0] sm:$0xf]  ;;  %v6946_v41 = vor.u32 %v7935_v33, %v6945_v31  ;;  %v7830_v31 = vld [vmem:[#allocation6 + $0x48] sm:$0xf0] }
 0x44d   :  { %4265 = vmatpush.bf16.msrb.mxu1 %v7042_v39  ;;  %v6605_v39 = vld [vmem:[#allocation6 + $0xd8] sm:$0xf]  ;;  %v7106_v45 = vor.u32 %v7975_v37, %v7105_v36  ;;  %v6865_v26 = vld [vmem:[#allocation6 + $0x2e0] sm:$0xf]  ;;  %v7870_v36 = vld [vmem:[#allocation6 + $0x188] sm:$0xf0] }
 0x44e   :  { %4227 = vmatpush.bf16.msra.mxu2 %v6542_v43  ;;  %v6765_v43 = vld [vmem:[#allocation6 + $0x218] sm:$0xf]  ;;  %v6606_v48 = vor.u32 %v7850_v40, %v6605_v39  ;;  %v6866_v33 = vor.u32 %v7915_v27, %v6865_v26  ;;  %v7910_v39 = vld [vmem:[#allocation6 + $0x2c8] sm:$0xf0] }
 0x44f   :  { %4240 = vmatpush.bf16.msra.mxu3 %v6702_v46  ;;  %v6925_v46 = vld [vmem:[#allocation6 + $0x358] sm:$0xf]  ;;  %v6766_v59 = vor.u32 %v7890_v44, %v6765_v43  ;;  %v7950_v43 = vld [vmem:[#allocation6 + $0x408] sm:$0xf0] }
 0x450   :  { %4253 = vmatpush.bf16.msrb.mxu0 %v6862_v49  ;;  %v7085_v49 = vld [vmem:[#allocation6 + $0x498] sm:$0xf]  ;;  %v6926_v21 = vor.u32 %v7930_v47, %v6925_v46  ;;  %v7825_v46 = vld [vmem:[#allocation6 + $0x20] sm:$0xf0] }
 0x451   :  { %4266 = vmatpush.bf16.msrb.mxu1 %v7022_v54  ;;  %v6585_v54 = vld [vmem:[#allocation6 + $0xb0] sm:$0xf]  ;;  %v7086_v56 = vor.u32 %v7970_v50, %v7085_v49  ;;  %v7865_v49 = vld [vmem:[#allocation6 + $0x160] sm:$0xf0] }
 0x452   :  { %4228 = vmatpush.bf16.msra.mxu2 %v6522_v35  ;;  %v7885_v35 = vld [vmem:[#allocation6 + $0x200] sm:$0xf0] }
 0x453   :  { %4241 = vmatpush.bf16.msra.mxu3 %v6682_v61  ;;  %v6586_v61 = vor.u32 %v7845_v5, %v6585_v54  ;;  %v6746_v6 = vor.u32 %v7885_v35, %v6745_v58  ;;  %v7905_v54 = vld [vmem:[#allocation6 + $0x2a0] sm:$0xf0] }
 0x454   :  { %4254 = vmatpush.bf16.msrb.mxu0 %v6842_v7  ;;  %v6565_v7 = vld [vmem:[#allocation6 + $0x88] sm:$0xf]  ;;  %v7945_v58 = vld [vmem:[#allocation6 + $0x3e0] sm:$0xf0] }
 0x455   :  { %4267 = vmatpush.bf16.msrb.mxu1 %v7002_v32  ;;  %v7880_v32 = vld [vmem:[#allocation6 + $0x1d8] sm:$0xf0] }
 0x456   :  { %4229 = vmatpush.bf16.msra.mxu2 %v6502_v13  ;;  %v6566_v13 = vor.u32 %v7840_v8, %v6565_v7  ;;  %v6726_v17 = vor.u32 %v7880_v32, %v6725_v10 }
 0x457   :  { %4242 = vmatpush.bf16.msra.mxu3 %v6662_v18  ;;  %v6545_v18 = vld [vmem:[#allocation6 + $0x60] sm:$0xf] }
 0x458   :  { %4255 = vmatpush.bf16.msrb.mxu0 %v6822_v25  ;;  %v7046_v25 = vor.u32 %v7960_v16, %v7045_v15 }
 0x459   :  { %4268 = vmatpush.bf16.msrb.mxu1 %v6982_v28  ;;  %4230 = vmatmul.bf16.vlgmr.msra.gmra.mxu2 %v8416_v55 }
 0x45a   :  { %4274 = vmatpush.bf16.msrb.mxu2 %v6646_v19  ;;  %4243 = vmatmul.bf16.vlgmr.msra.gmra.mxu3 %v8414_v51  ;;  %v7835_v19 = vld [vmem:[#allocation6 + $0x70] sm:$0xf0] }
 0x45b   :  { %4287 = vmatpush.bf16.msrb.mxu3 %v6806_v23  ;;  %4256 = vmatmul.bf16.vlgmr.msrb.gmra.mxu0 %v8422_v14  ;;  %v7875_v23 = vld [vmem:[#allocation6 + $0x1b0] sm:$0xf0]  ;;  %v6546_v28 = vor.u32 %v7835_v19, %v6545_v18 }
 0x45c   :  { %4300 = vmatpush.bf16.msra.mxu0 %v6966_v29  ;;  %4269 = vmatmul.bf16.vlgmr.msrb.gmra.mxu1 %v8420_v11  ;;  %v7025_v29 = vld [vmem:[#allocation6 + $0x420] sm:$0xf]  ;;  %v6706_v30 = vor.u32 %v7875_v23, %v6705_v22 }
 0x45d   :  { %4313 = vmatpush.bf16.msra.mxu1 %v7126_v57  ;;  %v6525_v57 = vld [vmem:[#allocation6 + $0x38] sm:$0xf]  ;;  %v7026_v37 = vor.u32 %v7955_v53, %v7025_v29 }
 0x45e   :  { %4275 = vmatpush.bf16.msrb.mxu2 %v6626_v34  ;;  %v6685_v34 = vld [vmem:[#allocation6 + $0x178] sm:$0xf]  ;;  %v6526_v40 = vor.u32 %v7830_v31, %v6525_v57  ;;  %v3231_v57 = vperm.slane %v8295_v2, 4 }
 0x45f   :  { %4288 = vmatpush.bf16.msrb.mxu3 %v6786_v38  ;;  %v6845_v38 = vld [vmem:[#allocation6 + $0x2b8] sm:$0xf]  ;;  %v6686_v44 = vor.u32 %v7870_v36, %v6685_v34 }
 0x460   :  { %4301 = vmatpush.bf16.msra.mxu0 %v6946_v41  ;;  %v7005_v41 = vld [vmem:[#allocation6 + $0x3f8] sm:$0xf]  ;;  %v6846_v47 = vor.u32 %v7910_v39, %v6845_v38 }
 0x461   :  { %4314 = vmatpush.bf16.msra.mxu1 %v7106_v45  ;;  %v6505_v45 = vld [vmem:[#allocation6 + $0x10] sm:$0xf]  ;;  %v7006_v50 = vor.u32 %v7950_v43, %v7005_v41 }
 0x462   :  { %4276 = vmatpush.bf16.msrb.mxu2 %v6606_v48  ;;  %v6665_v48 = vld [vmem:[#allocation6 + $0x150] sm:$0xf]  ;;  %v6506_v5 = vor.u32 %v7825_v46, %v6505_v45 }
 0x463   :  { %4289 = vmatpush.bf16.msrb.mxu3 %v6766_v59  ;;  %v6825_v59 = vld [vmem:[#allocation6 + $0x290] sm:$0xf]  ;;  %v6666_v35 = vor.u32 %v7865_v49, %v6665_v48  ;;  %v3232_v49 = vperm.slane %v8300_v3, 4 }
 0x464   :  { %4302 = vmatpush.bf16.msra.mxu0 %v6926_v21  ;;  %v6985_v21 = vld [vmem:[#allocation6 + $0x3d0] sm:$0xf] }
 0x465   :  { %4315 = vmatpush.bf16.msra.mxu1 %v7086_v56  ;;  %v6826_v56 = vor.u32 %v7905_v54, %v6825_v59  ;;  %v6986_v12 = vor.u32 %v7945_v58, %v6985_v21 }
 0x466   :  { %4277 = vmatpush.bf16.msrb.mxu2 %v6586_v61  ;;  %v3229_v61 = vperm.slane %v8285_v0, 4 }
 0x467   :  { %4290 = vmatpush.bf16.msrb.mxu3 %v6746_v6 }
 0x468   :  { %4303 = vmatpush.bf16.msra.mxu0 %v6906_v9 }
 0x469   :  { %4316 = vmatpush.bf16.msra.mxu1 %v7066_v24 }
 0x46a   :  { %4278 = vmatpush.bf16.msrb.mxu2 %v6566_v13 }
 0x46b   :  { %4291 = vmatpush.bf16.msrb.mxu3 %v6726_v17 }
 0x46c   :  { %4304 = vmatpush.bf16.msra.mxu0 %v6886_v20 }
 0x46d   :  { %4317 = vmatpush.bf16.msra.mxu1 %v7046_v25 }
 0x46e   :  { %4279 = vmatpush.bf16.msrb.mxu2 %v6546_v28 }
 0x46f   :  { %4292 = vmatpush.bf16.msrb.mxu3 %v6706_v30 }
 0x470   :  { %4305 = vmatpush.bf16.msra.mxu0 %v6866_v33 }
 0x471   :  { %4318 = vmatpush.bf16.msra.mxu1 %v7026_v37 }
 0x472   :  { %4280 = vmatpush.bf16.msrb.mxu2 %v6526_v40 }
 0x473   :  { %4293 = vmatpush.bf16.msrb.mxu3 %v6686_v44 }
 0x474   :  { %4306 = vmatpush.bf16.msra.mxu0 %v6846_v47 }
 0x475   :  { %4319 = vmatpush.bf16.msra.mxu1 %v7006_v50 }
 0x476   :  { %4281 = vmatpush.bf16.msrb.mxu2 %v6506_v5 }
 0x477   :  { %4294 = vmatpush.bf16.msrb.mxu3 %v6666_v35 }
 0x478   :  { %4307 = vmatpush.bf16.msra.mxu0 %v6826_v56  ;;  %v4101_v60 = vpop.f32.mrf.mxu0 }
 0x479   :  { %4282 = vmatmul.bf16.vlgmr.msrb.gmra.mxu2 %v8416_v55  ;;  %4320 = vmatpush.bf16.msra.mxu1 %v6986_v12  ;;  %v4114_v62 = vpop.f32.mrf.mxu1 }
 0x47a   :  { %4295 = vmatmul.bf16.vlgmr.msrb.gmra.mxu3 %v8414_v51 }
 0x47b   :  { %4308 = vmatmul.bf16.vlgmr.msra.gmra.mxu0 %v8422_v14 }
 0x47c   :  { %4321 = vmatmul.bf16.vlgmr.msra.gmra.mxu1 %v8420_v11  ;;  %v4075_v63 = vpop.f32.mrf.mxu2  ;;  %v3230_v11 = vperm.slane %v8290_v1, 4 }
 0x47d   :  { %v4076_v6 = vadd.f32 %v4075_v63, %v3229_v61  ;;  %v4088_v7 = vpop.f32.mrf.mxu3 }
 0x47f   :  { %v4089_v8 = vadd.f32 %v4088_v7, %v4076_v6 }
 0x480   :  { %v4103_v9 = vpop.f32.mrf.mxu0 }
 0x481   :  { %v4102_v10 = vadd.f32 %v4101_v60, %v4089_v8  ;;  %v4116_v32 = vpop.f32.mrf.mxu1  ;;  %v3233_v8 = vperm.slane %v8305_v4, 4 }
 0x483   :  { %v4115_v24 = vadd.f32 %v4114_v62, %v4102_v10 }
 0x484   :  { %v4077_v55 = vpop.f32.mrf.mxu2 }
 0x485   :  { %v4326_v42 = vmul.f32 0.22916667, %v4115_v24  ;;  %v4090_v52 = vpop.f32.mrf.mxu3 }
 0x487   :  { %v4331_v51 = vmax.f32 %v4115_v24, %v4326_v42 }
 0x489   :  { %v8445_v13 = vpack.c.bf16 %v4331_v51, %v4331_v51 }
 0x498   :  { %v4153_v14 = vpop.f32.mrf.mxu0 }
 0x499   :  { %v4166_v15 = vpop.f32.mrf.mxu1 }
 0x49c   :  { %v4127_v16 = vpop.f32.mrf.mxu2 }
 0x49d   :  { %v4128_v17 = vadd.f32 %v4127_v16, %v3230_v11  ;;  %v4140_v18 = vpop.f32.mrf.mxu3 }
 0x49f   :  { %v4141_v19 = vadd.f32 %v4140_v18, %v4128_v17 }
 0x4a0   :  { %v4155_v20 = vpop.f32.mrf.mxu0 }
 0x4a1   :  { %v4154_v22 = vadd.f32 %v4153_v14, %v4141_v19  ;;  %v4168_v23 = vpop.f32.mrf.mxu1 }
 0x4a3   :  { %v4167_v25 = vadd.f32 %v4166_v15, %v4154_v22 }
 0x4a4   :  { %v4129_v26 = vpop.f32.mrf.mxu2 }
 0x4a5   :  { %v4327_v27 = vmul.f32 0.22916667, %v4167_v25  ;;  %v4142_v28 = vpop.f32.mrf.mxu3 }
 0x4a7   :  { %v4332_v29 = vmax.f32 %v4167_v25, %v4327_v27 }
 0x4a9   :  { %v8448_v53 = vpack.c.bf16 %v4332_v29, %v4332_v29 }
 0x4b8   :  { %v4205_v30 = vpop.f32.mrf.mxu0 }
 0x4b9   :  { %v4218_v31 = vpop.f32.mrf.mxu1 }
 0x4bc   :  { %v4179_v33 = vpop.f32.mrf.mxu2 }
 0x4bd   :  { %v4180_v34 = vadd.f32 %v4179_v33, %v3231_v57  ;;  %v4192_v36 = vpop.f32.mrf.mxu3 }
 0x4bf   :  { %v4193_v37 = vadd.f32 %v4192_v36, %v4180_v34 }
 0x4c0   :  { %v4207_v38 = vpop.f32.mrf.mxu0 }
 0x4c1   :  { %v4206_v39 = vadd.f32 %v4205_v30, %v4193_v37  ;;  %v4220_v40 = vpop.f32.mrf.mxu1 }
 0x4c3   :  { %v4219_v41 = vadd.f32 %v4218_v31, %v4206_v39 }
 0x4c4   :  { %v4181_v43 = vpop.f32.mrf.mxu2 }
 0x4c5   :  { %v4328_v44 = vmul.f32 0.22916667, %v4219_v41  ;;  %v4194_v45 = vpop.f32.mrf.mxu3 }
 0x4c7   :  { %v4333_v46 = vmax.f32 %v4219_v41, %v4328_v44 }
 0x4c9   :  { %v8451_v47 = vpack.c.bf16 %v4333_v46, %v4333_v46 }
 0x4d8   :  { %v4257_v48 = vpop.f32.mrf.mxu0 }
 0x4d9   :  { %v4270_v50 = vpop.f32.mrf.mxu1 }
 0x4dc   :  { %v4231_v2 = vpop.f32.mrf.mxu2 }
 0x4dd   :  { %v4232_v59 = vadd.f32 %v4231_v2, %v3232_v49  ;;  %v4244_v54 = vpop.f32.mrf.mxu3 }
 0x4df   :  { %v4245_v5 = vadd.f32 %v4244_v54, %v4232_v59 }
 0x4e0   :  { %v4259_v21 = vpop.f32.mrf.mxu0 }
 0x4e1   :  { %v4258_v58 = vadd.f32 %v4257_v48, %v4245_v5  ;;  %v4272_v35 = vpop.f32.mrf.mxu1 }
 0x4e3   :  { %v4271_v56 = vadd.f32 %v4270_v50, %v4258_v58 }
 0x4e4   :  { %v4233_v12 = vpop.f32.mrf.mxu2 }
 0x4e5   :  { %v4329_v60 = vmul.f32 0.22916667, %v4271_v56  ;;  %v4246_v61 = vpop.f32.mrf.mxu3 }
 0x4e7   :  { %v4334_v62 = vmax.f32 %v4271_v56, %v4329_v60 }
 0x4e9   :  { %v8454_v63 = vpack.c.bf16 %v4334_v62, %v4334_v62 }
 0x4f8   :  { %v4309_v6 = vpop.f32.mrf.mxu0 }
 0x4f9   :  { %v4322_v7 = vpop.f32.mrf.mxu1 }
 0x4fc   :  { %v4283_v3 = vpop.f32.mrf.mxu2 }
 0x4fd   :  { %v4284_v9 = vadd.f32 %v4283_v3, %v3233_v8  ;;  %v4296_v10 = vpop.f32.mrf.mxu3 }
 0x4ff   :  { %v4297_v32 = vadd.f32 %v4296_v10, %v4284_v9 }
 0x500   :  { %v4311_v24 = vpop.f32.mrf.mxu0 }
 0x501   :  { %v4310_v55 = vadd.f32 %v4309_v6, %v4297_v32  ;;  %v4324_v42 = vpop.f32.mrf.mxu1 }
 0x503   :  { %v4323_v52 = vadd.f32 %v4322_v7, %v4310_v55 }
 0x504   :  { %v4285_v51 = vpop.f32.mrf.mxu2 }
 0x505   :  { %v4330_v14 = vmul.f32 0.22916667, %v4323_v52  ;;  %v4298_v11 = vpop.f32.mrf.mxu3 }
 0x507   :  { %v4335_v15 = vmax.f32 %v4323_v52, %v4330_v14 }
 0x509   :  { %v8457_v16 = vpack.c.bf16 %v4335_v15, %v4335_v15 }
 0x50a   :  { %8221 = dma.done.wait [#allocation8 + $0x5], 10240 }
 0x50b   :  { %8222 = vsyncadd [#allocation8 + $0x5], 4294957056  ;;  %v7185_v17 = vld [vmem:[#allocation7 + $0x70] sm:$0xf]  ;;  %v7996_v18 = vld [vmem:[#allocation7 + $0x74] sm:$0xf0] }
 0x50c   :  { %v7249_v19 = vld [vmem:[#allocation7 + $0xf0] sm:$0xf]  ;;  %v7186_v4 = vor.u32 %v7996_v18, %v7185_v17  ;;  %v8012_v20 = vld [vmem:[#allocation7 + $0xf4] sm:$0xf0]  ;;  %v7177_v22 = vld [vmem:[#allocation7 + $0x60] sm:$0xf] }
 0x50d   :  { %v7994_v23 = vld [vmem:[#allocation7 + $0x64] sm:$0xf0]  ;;  %v7250_v25 = vor.u32 %v8012_v20, %v7249_v19  ;;  %v7241_v26 = vld [vmem:[#allocation7 + $0xe0] sm:$0xf]  ;;  %v7169_v30 = vld [vmem:[#allocation7 + $0x50] sm:$0xf] }
 0x50e   :  { %v8010_v27 = vld [vmem:[#allocation7 + $0xe4] sm:$0xf0]  ;;  %4826 = vmatpush.bf16.msra.mxu2 %v7186_v4  ;;  %v7178_v28 = vor.u32 %v7994_v23, %v7177_v22  ;;  %v7992_v57 = vld [vmem:[#allocation7 + $0x54] sm:$0xf0]  ;;  %v7233_v31 = vld [vmem:[#allocation7 + $0xd0] sm:$0xf] }
 0x50f   :  { %4839 = vmatpush.bf16.msra.mxu3 %v7250_v25  ;;  %v7242_v29 = vor.u32 %v8010_v27, %v7241_v26  ;;  %v8008_v33 = vld [vmem:[#allocation7 + $0xd4] sm:$0xf0]  ;;  %v7170_v34 = vor.u32 %v7992_v57, %v7169_v30  ;;  %v7161_v36 = vld [vmem:[#allocation7 + $0x40] sm:$0xf]  ;;  %v7990_v38 = vld [vmem:[#allocation7 + $0x44] sm:$0xf0] }
 0x510   :  { %v7234_v37 = vor.u32 %v8008_v33, %v7233_v31  ;;  %v7313_v39 = vld [vmem:[#allocation7 + $0x170] sm:$0xf]  ;;  %v8028_v40 = vld [vmem:[#allocation7 + $0x174] sm:$0xf0]  ;;  %v7225_v41 = vld [vmem:[#allocation7 + $0xc0] sm:$0xf]  ;;  %v7162_v49 = vor.u32 %v7990_v38, %v7161_v36 }
 0x511   :  { %v8006_v43 = vld [vmem:[#allocation7 + $0xc4] sm:$0xf0]  ;;  %v7314_v44 = vor.u32 %v8028_v40, %v7313_v39  ;;  %v7377_v45 = vld [vmem:[#allocation7 + $0x1f0] sm:$0xf]  ;;  %v8044_v46 = vld [vmem:[#allocation7 + $0x1f4] sm:$0xf0] }
 0x512   :  { %4827 = vmatpush.bf16.msra.mxu2 %v7178_v28  ;;  %v7305_v48 = vld [vmem:[#allocation7 + $0x160] sm:$0xf]  ;;  %v7378_v50 = vor.u32 %v8044_v46, %v7377_v45  ;;  %v8026_v2 = vld [vmem:[#allocation7 + $0x164] sm:$0xf0]  ;;  %v7226_v59 = vor.u32 %v8006_v43, %v7225_v41  ;;  %v7153_v54 = vld [vmem:[#allocation7 + $0x30] sm:$0xf] }
 0x513   :  { %4840 = vmatpush.bf16.msra.mxu3 %v7242_v29  ;;  %4852 = vmatpush.bf16.msrb.mxu0 %v7314_v44  ;;  %v7988_v5 = vld [vmem:[#allocation7 + $0x34] sm:$0xf0]  ;;  %v7306_v21 = vor.u32 %v8026_v2, %v7305_v48  ;;  %v7369_v58 = vld [vmem:[#allocation7 + $0x1e0] sm:$0xf]  ;;  %v7217_v35 = vld [vmem:[#allocation7 + $0xb0] sm:$0xf] }
 0x514   :  { %v8004_v56 = vld [vmem:[#allocation7 + $0xb4] sm:$0xf0]  ;;  %4865 = vmatpush.bf16.msrb.mxu1 %v7378_v50  ;;  %v8042_v12 = vld [vmem:[#allocation7 + $0x1e4] sm:$0xf0]  ;;  %v7297_v61 = vld [vmem:[#allocation7 + $0x150] sm:$0xf]  ;;  %v7154_v62 = vor.u32 %v7988_v5, %v7153_v54 }
 0x515   :  { %v7370_v60 = vor.u32 %v8042_v12, %v7369_v58  ;;  %v8024_v6 = vld [vmem:[#allocation7 + $0x154] sm:$0xf0]  ;;  %v7361_v7 = vld [vmem:[#allocation7 + $0x1d0] sm:$0xf]  ;;  %v7218_v3 = vor.u32 %v8004_v56, %v7217_v35  ;;  %v7145_v9 = vld [vmem:[#allocation7 + $0x20] sm:$0xf] }
 0x516   :  { %4828 = vmatpush.bf16.msra.mxu2 %v7170_v34  ;;  %v8040_v8 = vld [vmem:[#allocation7 + $0x1d4] sm:$0xf0]  ;;  %v7986_v10 = vld [vmem:[#allocation7 + $0x24] sm:$0xf0]  ;;  %v7209_v32 = vld [vmem:[#allocation7 + $0xa0] sm:$0xf]  ;;  %v7298_v24 = vor.u32 %v8024_v6, %v7297_v61 }
 0x517   :  { %4841 = vmatpush.bf16.msra.mxu3 %v7234_v37  ;;  %4853 = vmatpush.bf16.msrb.mxu0 %v7306_v21  ;;  %v8002_v55 = vld [vmem:[#allocation7 + $0xa4] sm:$0xf0]  ;;  %v7362_v42 = vor.u32 %v8040_v8, %v7361_v7  ;;  %v7289_v52 = vld [vmem:[#allocation7 + $0x140] sm:$0xf]  ;;  %v7146_v15 = vor.u32 %v7986_v10, %v7145_v9  ;;  %v7137_v17 = vld [vmem:[#allocation7 + $0x10] sm:$0xf] }
 0x518   :  { %4866 = vmatpush.bf16.msrb.mxu1 %v7370_v60  ;;  %v8022_v51 = vld [vmem:[#allocation7 + $0x144] sm:$0xf0]  ;;  %v7353_v14 = vld [vmem:[#allocation7 + $0x1c0] sm:$0xf]  ;;  %v7210_v19 = vor.u32 %v8002_v55, %v7209_v32  ;;  %v7984_v4 = vld [vmem:[#allocation7 + $0x14] sm:$0xf0] }
 0x519   :  { %v8038_v11 = vld [vmem:[#allocation7 + $0x1c4] sm:$0xf0]  ;;  %v7290_v18 = vor.u32 %v8022_v51, %v7289_v52  ;;  %v7281_v20 = vld [vmem:[#allocation7 + $0x130] sm:$0xf]  ;;  %v8020_v22 = vld [vmem:[#allocation7 + $0x134] sm:$0xf0]  ;;  %v7138_v29 = vor.u32 %v7984_v4, %v7137_v17 }
 0x51a   :  { %4829 = vmatpush.bf16.msra.mxu2 %v7162_v49  ;;  %v7201_v23 = vld [vmem:[#allocation7 + $0x90] sm:$0xf]  ;;  %v8000_v25 = vld [vmem:[#allocation7 + $0x94] sm:$0xf0]  ;;  %v7354_v26 = vor.u32 %v8038_v11, %v7353_v14  ;;  %v7129_v30 = vld [vmem:[#allocation7] sm:$0xf]  ;;  %v7282_v33 = vor.u32 %v8020_v22, %v7281_v20 }
 0x51b   :  { %4842 = vmatpush.bf16.msra.mxu3 %v7226_v59  ;;  %4854 = vmatpush.bf16.msrb.mxu0 %v7298_v24  ;;  %v7345_v27 = vld [vmem:[#allocation7 + $0x1b0] sm:$0xf]  ;;  %v8036_v28 = vld [vmem:[#allocation7 + $0x1b4] sm:$0xf0]  ;;  %v7982_v57 = vld [vmem:[#allocation7 + $0x4] sm:$0xf0]  ;;  %v7202_v34 = vor.u32 %v8000_v25, %v7201_v23 }
 0x51c   :  { %4867 = vmatpush.bf16.msrb.mxu1 %v7362_v42  ;;  %v7193_v31 = vld [vmem:[#allocation7 + $0x80] sm:$0xf]  ;;  %v7998_v36 = vld [vmem:[#allocation7 + $0x84] sm:$0xf0]  ;;  %v7441_v39 = vld [vmem:[#allocation7 + $0x270] sm:$0xf]  ;;  %v7346_v43 = vor.u32 %v8036_v28, %v7345_v27  ;;  %v7130_v48 = vor.u32 %v7982_v57, %v7129_v30 }
 0x51d   :  { %v7273_v37 = vld [vmem:[#allocation7 + $0x120] sm:$0xf]  ;;  %v8018_v38 = vld [vmem:[#allocation7 + $0x124] sm:$0xf0]  ;;  %v8060_v40 = vld [vmem:[#allocation7 + $0x274] sm:$0xf0]  ;;  %v7194_v50 = vor.u32 %v7998_v36, %v7193_v31 }
 0x51e   :  { %4830 = vmatpush.bf16.msra.mxu2 %v7154_v62  ;;  %v7995_v41 = vld [vmem:[#allocation7 + $0x74] sm:$0xf]  ;;  %v7187_v44 = vld [vmem:[#allocation7 + $0x78] sm:$0xf0]  ;;  %v7337_v45 = vld [vmem:[#allocation7 + $0x1a0] sm:$0xf]  ;;  %v7274_v49 = vor.u32 %v8018_v38, %v7273_v37  ;;  %v7442_v2 = vor.u32 %v8060_v40, %v7441_v39 }
 0x51f   :  { %4843 = vmatpush.bf16.msra.mxu3 %v7218_v3  ;;  %4855 = vmatpush.bf16.msrb.mxu0 %v7290_v18  ;;  %v8034_v46 = vld [vmem:[#allocation7 + $0x1a4] sm:$0xf0]  ;;  %v7265_v59 = vld [vmem:[#allocation7 + $0x110] sm:$0xf]  ;;  %v8016_v54 = vld [vmem:[#allocation7 + $0x114] sm:$0xf0]  ;;  %v7190_v5 = vor.u32 %v7995_v41, %v7187_v44 }
 0x520   :  { %4868 = vmatpush.bf16.msrb.mxu1 %v7354_v26  ;;  %v7433_v21 = vld [vmem:[#allocation7 + $0x260] sm:$0xf]  ;;  %v8058_v58 = vld [vmem:[#allocation7 + $0x264] sm:$0xf0]  ;;  %v7993_v35 = vld [vmem:[#allocation7 + $0x64] sm:$0xf]  ;;  %v7338_v56 = vor.u32 %v8034_v46, %v7337_v45  ;;  %v7266_v6 = vor.u32 %v8016_v54, %v7265_v59 }
 0x521   :  { %v7179_v12 = vld [vmem:[#allocation7 + $0x68] sm:$0xf0]  ;;  %v7329_v60 = vld [vmem:[#allocation7 + $0x190] sm:$0xf]  ;;  %v8032_v61 = vld [vmem:[#allocation7 + $0x194] sm:$0xf0]  ;;  %v7434_v7 = vor.u32 %v8058_v58, %v7433_v21 }
 0x522   :  { %4831 = vmatpush.bf16.msra.mxu2 %v7146_v15  ;;  %v7425_v62 = vld [vmem:[#allocation7 + $0x250] sm:$0xf]  ;;  %v8056_v8 = vld [vmem:[#allocation7 + $0x254] sm:$0xf0]  ;;  %v7257_v3 = vld [vmem:[#allocation7 + $0x100] sm:$0xf]  ;;  %v7182_v10 = vor.u32 %v7993_v35, %v7179_v12  ;;  %v7330_v24 = vor.u32 %v8032_v61, %v7329_v60 }
 0x523   :  { %4844 = vmatpush.bf16.msra.mxu3 %v7210_v19  ;;  %4856 = vmatpush.bf16.msrb.mxu0 %v7282_v33  ;;  %v8014_v9 = vld [vmem:[#allocation7 + $0x104] sm:$0xf0]  ;;  %v7991_v32 = vld [vmem:[#allocation7 + $0x54] sm:$0xf]  ;;  %v7251_v42 = vld [vmem:[#allocation7 + $0xf8] sm:$0xf0]  ;;  %v7426_v18 = vor.u32 %v8056_v8, %v7425_v62 }
 0x524   :  { %4869 = vmatpush.bf16.msrb.mxu1 %v7346_v43  ;;  %v8011_v55 = vld [vmem:[#allocation7 + $0xf4] sm:$0xf]  ;;  %v7171_v52 = vld [vmem:[#allocation7 + $0x58] sm:$0xf0]  ;;  %v7321_v51 = vld [vmem:[#allocation7 + $0x180] sm:$0xf]  ;;  %v7258_v11 = vor.u32 %v8014_v9, %v7257_v3 }
 0x525   :  { %v8030_v14 = vld [vmem:[#allocation7 + $0x184] sm:$0xf0]  ;;  %v8027_v15 = vld [vmem:[#allocation7 + $0x174] sm:$0xf]  ;;  %v7315_v17 = vld [vmem:[#allocation7 + $0x178] sm:$0xf0]  ;;  %v7254_v4 = vor.u32 %v8011_v55, %v7251_v42  ;;  %v7174_v20 = vor.u32 %v7991_v32, %v7171_v52 }
 0x526   :  { %4832 = vmatpush.bf16.msra.mxu2 %v7138_v29  ;;  %v7417_v19 = vld [vmem:[#allocation7 + $0x240] sm:$0xf]  ;;  %v8054_v22 = vld [vmem:[#allocation7 + $0x244] sm:$0xf0]  ;;  %v7322_v23 = vor.u32 %v8030_v14, %v7321_v51  ;;  %v8009_v25 = vld [vmem:[#allocation7 + $0xe4] sm:$0xf]  ;;  %v7318_v29 = vor.u32 %v8027_v15, %v7315_v17 }
 0x527   :  { %4845 = vmatpush.bf16.msra.mxu3 %v7202_v34  ;;  %4857 = vmatpush.bf16.msrb.mxu0 %v7274_v49  ;;  %v7243_v26 = vld [vmem:[#allocation7 + $0xe8] sm:$0xf0]  ;;  %v7989_v27 = vld [vmem:[#allocation7 + $0x44] sm:$0xf]  ;;  %v7418_v31 = vor.u32 %v8054_v22, %v7417_v19  ;;  %v7409_v33 = vld [vmem:[#allocation7 + $0x230] sm:$0xf] }
 0x528   :  { %4870 = vmatpush.bf16.msrb.mxu1 %v7338_v56  ;;  %v7163_v28 = vld [vmem:[#allocation7 + $0x48] sm:$0xf0]  ;;  %v8025_v30 = vld [vmem:[#allocation7 + $0x164] sm:$0xf]  ;;  %v7246_v34 = vor.u32 %v8009_v25, %v7243_v26  ;;  %v8052_v37 = vld [vmem:[#allocation7 + $0x234] sm:$0xf0] }
 0x529   :  { %v7307_v57 = vld [vmem:[#allocation7 + $0x168] sm:$0xf0]  ;;  %v7166_v36 = vor.u32 %v7989_v27, %v7163_v28  ;;  %v8007_v38 = vld [vmem:[#allocation7 + $0xd4] sm:$0xf]  ;;  %v7235_v39 = vld [vmem:[#allocation7 + $0xd8] sm:$0xf0]  ;;  %v7410_v46 = vor.u32 %v8052_v37, %v7409_v33 }
 0x52a   :  { %4833 = vmatpush.bf16.msra.mxu2 %v7130_v48  ;;  %v7987_v40 = vld [vmem:[#allocation7 + $0x34] sm:$0xf]  ;;  %v7155_v41 = vld [vmem:[#allocation7 + $0x38] sm:$0xf0]  ;;  %v7310_v43 = vor.u32 %v8025_v30, %v7307_v57  ;;  %v7401_v48 = vld [vmem:[#allocation7 + $0x220] sm:$0xf]  ;;  %v7238_v49 = vor.u32 %v8007_v38, %v7235_v39 }
 0x52b   :  { %4846 = vmatpush.bf16.msra.mxu3 %v7194_v50  ;;  %4858 = vmatpush.bf16.msrb.mxu0 %v7266_v6  ;;  %v8023_v44 = vld [vmem:[#allocation7 + $0x154] sm:$0xf]  ;;  %v7299_v45 = vld [vmem:[#allocation7 + $0x158] sm:$0xf0]  ;;  %v7158_v50 = vor.u32 %v7987_v40, %v7155_v41  ;;  %v8005_v59 = vld [vmem:[#allocation7 + $0xc4] sm:$0xf] }
 0x52c   :  { %4871 = vmatpush.bf16.msrb.mxu1 %v7330_v24  ;;  %v7227_v54 = vld [vmem:[#allocation7 + $0xc8] sm:$0xf0]  ;;  %v7302_v58 = vor.u32 %v8023_v44, %v7299_v45  ;;  %v8021_v35 = vld [vmem:[#allocation7 + $0x144] sm:$0xf]  ;;  %v7393_v60 = vld [vmem:[#allocation7 + $0x210] sm:$0xf] }
 0x52d   :  { %4834 = vmatmul.bf16.vlgmr.msra.gmra.mxu2 %v8445_v13  ;;  %v7147_v21 = vld [vmem:[#allocation7 + $0x28] sm:$0xf0]  ;;  %v7230_v61 = vor.u32 %v8005_v59, %v7227_v54  ;;  %v8048_v6 = vld [vmem:[#allocation7 + $0x214] sm:$0xf0]  ;;  %v7219_v8 = vld [vmem:[#allocation7 + $0xb8] sm:$0xf0] }
 0x52e   :  { %4878 = vmatpush.bf16.msrb.mxu2 %v7442_v2  ;;  %4847 = vmatmul.bf16.vlgmr.msra.gmra.mxu3 %v8448_v53  ;;  %v8050_v2 = vld [vmem:[#allocation7 + $0x224] sm:$0xf0]  ;;  %v7291_v56 = vld [vmem:[#allocation7 + $0x148] sm:$0xf0]  ;;  %v7983_v3 = vld [vmem:[#allocation7 + $0x14] sm:$0xf]  ;;  %v7394_v55 = vor.u32 %v8048_v6, %v7393_v60 }
 0x52f   :  { %4891 = vmatpush.bf16.msrb.mxu3 %v7190_v5  ;;  %4859 = vmatpush.bf16.msrb.mxu0 %v7258_v11  ;;  %v7985_v5 = vld [vmem:[#allocation7 + $0x24] sm:$0xf]  ;;  %v7402_v12 = vor.u32 %v8050_v2, %v7401_v48  ;;  %v7139_v9 = vld [vmem:[#allocation7 + $0x18] sm:$0xf0]  ;;  %v8019_v32 = vld [vmem:[#allocation7 + $0x134] sm:$0xf] }
 0x530   :  { %4872 = vmatpush.bf16.msrb.mxu1 %v7322_v23  ;;  %v7150_v62 = vor.u32 %v7985_v5, %v7147_v21  ;;  %v7283_v24 = vld [vmem:[#allocation7 + $0x138] sm:$0xf0]  ;;  %v7385_v42 = vld [vmem:[#allocation7 + $0x200] sm:$0xf]  ;;  %v8046_v52 = vld [vmem:[#allocation7 + $0x204] sm:$0xf0]  ;;  %v7142_v11 = vor.u32 %v7983_v3, %v7139_v9 }
 0x531   :  { %v7981_v51 = vld [vmem:[#allocation7 + $0x4] sm:$0xf]  ;;  %v7131_v15 = vld [vmem:[#allocation7 + $0x8] sm:$0xf0]  ;;  %v8043_v19 = vld [vmem:[#allocation7 + $0x1f4] sm:$0xf]  ;;  %v7286_v22 = vor.u32 %v8019_v32, %v7283_v24  ;;  %v7386_v27 = vor.u32 %v8046_v52, %v7385_v42 }
 0x532   :  { %4879 = vmatpush.bf16.msrb.mxu2 %v7434_v7  ;;  %4860 = vmatmul.bf16.vlgmr.msrb.gmra.mxu0 %v8451_v47  ;;  %v8003_v7 = vld [vmem:[#allocation7 + $0xb4] sm:$0xf]  ;;  %v8001_v17 = vld [vmem:[#allocation7 + $0xa4] sm:$0xf]  ;;  %v7443_v23 = vld [vmem:[#allocation7 + $0x278] sm:$0xf0] }
 0x533   :  { %4892 = vmatpush.bf16.msrb.mxu3 %v7182_v10  ;;  %4904 = vmatpush.bf16.msra.mxu0 %v7254_v4  ;;  %v7294_v10 = vor.u32 %v8021_v35, %v7291_v56  ;;  %v7222_v14 = vor.u32 %v8003_v7, %v7219_v8  ;;  %v7379_v4 = vld [vmem:[#allocation7 + $0x1f8] sm:$0xf0]  ;;  %v8017_v25 = vld [vmem:[#allocation7 + $0x124] sm:$0xf]  ;;  %v7275_v26 = vld [vmem:[#allocation7 + $0x128] sm:$0xf0] }
 0x534   :  { %4917 = vmatpush.bf16.msra.mxu1 %v7318_v29  ;;  %v7134_v29 = vor.u32 %v7981_v51, %v7131_v15  ;;  %v7382_v30 = vor.u32 %v8043_v19, %v7379_v4  ;;  %v7999_v57 = vld [vmem:[#allocation7 + $0x94] sm:$0xf]  ;;  %v8057_v37 = vld [vmem:[#allocation7 + $0x264] sm:$0xf]  ;;  %v7278_v38 = vor.u32 %v8017_v25, %v7275_v26  ;;  %v7435_v39 = vld [vmem:[#allocation7 + $0x268] sm:$0xf0] }
 0x535   :  { %4873 = vmatmul.bf16.vlgmr.msrb.gmra.mxu1 %v8454_v63  ;;  %v8015_v40 = vld [vmem:[#allocation7 + $0x114] sm:$0xf]  ;;  %v7267_v41 = vld [vmem:[#allocation7 + $0x118] sm:$0xf0]  ;;  %v7997_v45 = vld [vmem:[#allocation7 + $0x84] sm:$0xf]  ;;  %v7438_v48 = vor.u32 %v8057_v37, %v7435_v39 }
 0x536   :  { %4880 = vmatpush.bf16.msrb.mxu2 %v7426_v18  ;;  %v7211_v18 = vld [vmem:[#allocation7 + $0xa8] sm:$0xf0]  ;;  %v8055_v2 = vld [vmem:[#allocation7 + $0x254] sm:$0xf]  ;;  %v7270_v59 = vor.u32 %v8015_v40, %v7267_v41  ;;  %v7427_v54 = vld [vmem:[#allocation7 + $0x258] sm:$0xf0] }
 0x537   :  { %4893 = vmatpush.bf16.msrb.mxu3 %v7174_v20  ;;  %4905 = vmatpush.bf16.msra.mxu0 %v7246_v34  ;;  %v8059_v20 = vld [vmem:[#allocation7 + $0x274] sm:$0xf]  ;;  %v7214_v28 = vor.u32 %v8001_v17, %v7211_v18  ;;  %v8041_v34 = vld [vmem:[#allocation7 + $0x1e4] sm:$0xf]  ;;  %v7259_v21 = vld [vmem:[#allocation7 + $0x108] sm:$0xf0]  ;;  %v7430_v56 = vor.u32 %v8055_v2, %v7427_v54 }
 0x538   :  { %4918 = vmatpush.bf16.msra.mxu1 %v7310_v43  ;;  %v7446_v33 = vor.u32 %v8059_v20, %v7443_v23  ;;  %v8013_v5 = vld [vmem:[#allocation7 + $0x104] sm:$0xf]  ;;  %v7355_v60 = vld [vmem:[#allocation7 + $0x1c8] sm:$0xf0]  ;;  %v8035_v3 = vld [vmem:[#allocation7 + $0x1b4] sm:$0xf] }
 0x539   :  { %v7419_v6 = vld [vmem:[#allocation7 + $0x248] sm:$0xf0]  ;;  %v7347_v9 = vld [vmem:[#allocation7 + $0x1b8] sm:$0xf0]  ;;  %v8049_v52 = vld [vmem:[#allocation7 + $0x224] sm:$0xf] }
 0x53a   :  { %4881 = vmatpush.bf16.msrb.mxu2 %v7418_v31  ;;  %v7203_v31 = vld [vmem:[#allocation7 + $0x98] sm:$0xf0]  ;;  %v7350_v32 = vor.u32 %v8035_v3, %v7347_v9  ;;  %v7339_v42 = vld [vmem:[#allocation7 + $0x1a8] sm:$0xf0]  ;;  %v8031_v15 = vld [vmem:[#allocation7 + $0x194] sm:$0xf] }
 0x53b   :  { %4894 = vmatpush.bf16.msrb.mxu3 %v7166_v36  ;;  %4906 = vmatpush.bf16.msra.mxu0 %v7238_v49  ;;  %v7371_v36 = vld [vmem:[#allocation7 + $0x1e8] sm:$0xf0]  ;;  %v7206_v43 = vor.u32 %v7999_v57, %v7203_v31  ;;  %v8039_v49 = vld [vmem:[#allocation7 + $0x1d4] sm:$0xf]  ;;  %v7331_v17 = vld [vmem:[#allocation7 + $0x198] sm:$0xf0] }
 0x53c   :  { %4919 = vmatpush.bf16.msra.mxu1 %v7302_v58  ;;  %v7374_v44 = vor.u32 %v8041_v34, %v7371_v36  ;;  %v7403_v51 = vld [vmem:[#allocation7 + $0x228] sm:$0xf0]  ;;  %v8047_v18 = vld [vmem:[#allocation7 + $0x214] sm:$0xf]  ;;  %v7395_v19 = vld [vmem:[#allocation7 + $0x218] sm:$0xf0] }
 0x53d   :  { %v7398_v4 = vor.u32 %v8047_v18, %v7395_v19  ;;  %v8029_v20 = vld [vmem:[#allocation7 + $0x184] sm:$0xf]  ;;  %v7387_v23 = vld [vmem:[#allocation7 + $0x208] sm:$0xf0] }
 0x53e   :  { %4882 = vmatpush.bf16.msrb.mxu2 %v7410_v46  ;;  %v7195_v46 = vld [vmem:[#allocation7 + $0x88] sm:$0xf0] }
 0x53f   :  { %4895 = vmatpush.bf16.msrb.mxu3 %v7158_v50  ;;  %4907 = vmatpush.bf16.msra.mxu0 %v7230_v61  ;;  %v7363_v50 = vld [vmem:[#allocation7 + $0x1d8] sm:$0xf0]  ;;  %v7198_v58 = vor.u32 %v7997_v45, %v7195_v46  ;;  %v7262_v61 = vor.u32 %v8013_v5, %v7259_v21 }
 0x540   :  { %4920 = vmatpush.bf16.msra.mxu1 %v7294_v10  ;;  %v7366_v35 = vor.u32 %v8039_v49, %v7363_v50  ;;  %v7411_v10 = vld [vmem:[#allocation7 + $0x238] sm:$0xf0] }
 0x542   :  { %4883 = vmatpush.bf16.msrb.mxu2 %v7402_v12  ;;  %v8037_v12 = vld [vmem:[#allocation7 + $0x1c4] sm:$0xf] }
 0x543   :  { %4896 = vmatpush.bf16.msrb.mxu3 %v7150_v62  ;;  %4908 = vmatpush.bf16.msra.mxu0 %v7222_v14  ;;  %v8053_v62 = vld [vmem:[#allocation7 + $0x244] sm:$0xf]  ;;  %v7358_v7 = vor.u32 %v8037_v12, %v7355_v60 }
 0x544   :  { %4921 = vmatpush.bf16.msra.mxu1 %v7286_v22  ;;  %v7422_v8 = vor.u32 %v8053_v62, %v7419_v6  ;;  %v8045_v22 = vld [vmem:[#allocation7 + $0x204] sm:$0xf] }
 0x545   :  { %v7390_v26 = vor.u32 %v8045_v22, %v7387_v23 }
 0x546   :  { %4884 = vmatpush.bf16.msrb.mxu2 %v7394_v55  ;;  %v8033_v55 = vld [vmem:[#allocation7 + $0x1a4] sm:$0xf] }
 0x547   :  { %4897 = vmatpush.bf16.msrb.mxu3 %v7142_v11  ;;  %4909 = vmatpush.bf16.msra.mxu0 %v7214_v28  ;;  %v7342_v14 = vor.u32 %v8033_v55, %v7339_v42  ;;  %v7406_v11 = vor.u32 %v8049_v52, %v7403_v51 }
 0x548   :  { %4922 = vmatpush.bf16.msra.mxu1 %v7278_v38 }
 0x54a   :  { %4885 = vmatpush.bf16.msrb.mxu2 %v7386_v27 }
 0x54b   :  { %4898 = vmatpush.bf16.msrb.mxu3 %v7134_v29  ;;  %4910 = vmatpush.bf16.msra.mxu0 %v7206_v43  ;;  %v4424_v43 = vperm.slane %v8285_v0, 5 }
 0x54c   :  { %4923 = vmatpush.bf16.msra.mxu1 %v7270_v59 }
 0x54d   :  { %4886 = vmatmul.bf16.vlgmr.msrb.gmra.mxu2 %v8457_v16 }
 0x54e   :  { %4930 = vmatpush.bf16.msra.mxu2 %v7382_v30  ;;  %4899 = vmatmul.bf16.vlgmr.msrb.gmra.mxu3 %v8445_v13  ;;  %v8051_v13 = vld [vmem:[#allocation7 + $0x234] sm:$0xf] }
 0x54f   :  { %4943 = vmatpush.bf16.msra.mxu3 %v7446_v33  ;;  %4911 = vmatpush.bf16.msra.mxu0 %v7198_v58  ;;  %v7414_v24 = vor.u32 %v8051_v13, %v7411_v10 }
 0x550   :  { %4924 = vmatpush.bf16.msra.mxu1 %v7262_v61 }
 0x552   :  { %4931 = vmatpush.bf16.msra.mxu2 %v7374_v44  ;;  %4912 = vmatmul.bf16.vlgmr.msra.gmra.mxu0 %v8448_v53  ;;  %v7334_v53 = vor.u32 %v8031_v15, %v7331_v17 }
 0x553   :  { %4944 = vmatpush.bf16.msra.mxu3 %v7438_v48  ;;  %4925 = vmatmul.bf16.vlgmr.msra.gmra.mxu1 %v8451_v47  ;;  %v7323_v47 = vld [vmem:[#allocation7 + $0x188] sm:$0xf0] }
 0x554   :  { %v7326_v25 = vor.u32 %v8029_v20, %v7323_v47 }
 0x556   :  { %4932 = vmatpush.bf16.msra.mxu2 %v7366_v35 }
 0x557   :  { %4945 = vmatpush.bf16.msra.mxu3 %v7430_v56 }
 0x55a   :  { %4933 = vmatpush.bf16.msra.mxu2 %v7358_v7 }
 0x55b   :  { %4946 = vmatpush.bf16.msra.mxu3 %v7422_v8 }
 0x55e   :  { %4934 = vmatpush.bf16.msra.mxu2 %v7350_v32 }
 0x55f   :  { %4947 = vmatpush.bf16.msra.mxu3 %v7414_v24 }
 0x562   :  { %4935 = vmatpush.bf16.msra.mxu2 %v7342_v14 }
 0x563   :  { %4948 = vmatpush.bf16.msra.mxu3 %v7406_v11 }
 0x566   :  { %4936 = vmatpush.bf16.msra.mxu2 %v7334_v53 }
 0x567   :  { %4949 = vmatpush.bf16.msra.mxu3 %v7398_v4 }
 0x56a   :  { %4937 = vmatpush.bf16.msra.mxu2 %v7326_v25 }
 0x56b   :  { %4950 = vmatpush.bf16.msra.mxu3 %v7390_v26 }
 0x56d   :  { %4938 = vmatmul.bf16.vlgmr.msra.gmra.mxu2 %v8454_v63 }
 0x56e   :  { %4951 = vmatmul.bf16.vlgmr.msra.gmra.mxu3 %v8457_v16  ;;  %v4425_v16 = vperm.slane %v8290_v1, 5 }
 0x5af   :  { %v4861_v29 = vpop.f32.mrf.mxu0 }
 0x5b0   :  { %v4835_v27 = vpop.f32.mrf.mxu2 }
 0x5b1   :  { %v4848_v28 = vpop.f32.mrf.mxu3  ;;  %v4836_v45 = vadd.f32 %v4835_v27, %v4424_v43 }
 0x5b2   :  { %v4874_v30 = vpop.f32.mrf.mxu1 }
 0x5b3   :  { %v4849_v46 = vadd.f32 %v4848_v28, %v4836_v45 }
 0x5b5   :  { %v4862_v49 = vadd.f32 %v4861_v29, %v4849_v46 }
 0x5b7   :  { %v4863_v33 = vpop.f32.mrf.mxu0  ;;  %v4875_v2 = vadd.f32 %v4874_v30, %v4862_v49 }
 0x5b8   :  { %v4837_v57 = vpop.f32.mrf.mxu2 }
 0x5b9   :  { %v4850_v31 = vpop.f32.mrf.mxu3 }
 0x5ba   :  { %v4876_v34 = vpop.f32.mrf.mxu1 }
 0x5cf   :  { %v4913_v38 = vpop.f32.mrf.mxu0 }
 0x5d0   :  { %v4887_v36 = vpop.f32.mrf.mxu2  ;;  %v4926_v39 = vpop.f32.mrf.mxu1 }
 0x5d1   :  { %v4900_v37 = vpop.f32.mrf.mxu3  ;;  %v4888_v5 = vadd.f32 %v4887_v36, %v4875_v2 }
 0x5d2   :  { %v4901_v48 = vadd.f32 %v4900_v37, %v4425_v16 }
 0x5d3   :  { %v4956_v56 = vmul.f32 0.22916667, %v4888_v5 }
 0x5d4   :  { %v4914_v50 = vadd.f32 %v4913_v38, %v4901_v48 }
 0x5d5   :  { %v4958_v61 = vmax.f32 %v4888_v5, %v4956_v56 }
 0x5d6   :  { %v4927_v59 = vadd.f32 %v4926_v39, %v4914_v50 }
 0x5d7   :  { %v4915_v44 = vpop.f32.mrf.mxu0 }
 0x5d8   :  { %v4889_v40 = vpop.f32.mrf.mxu2  ;;  %v4928_v63 = vpop.f32.mrf.mxu1 }
 0x5d9   :  { %v4902_v41 = vpop.f32.mrf.mxu3 }
 0x5f0   :  { %v4939_v54 = vpop.f32.mrf.mxu2 }
 0x5f1   :  { %v4940_v21 = vadd.f32 %v4939_v54, %v4927_v59  ;;  %v4952_v58 = vpop.f32.mrf.mxu3 }
 0x5f3   :  { %v4953_v35 = vadd.f32 %v4952_v58, %v4940_v21 }
 0x5f5   :  { %v4957_v12 = vmul.f32 0.22916667, %v4953_v35 }
 0x5f7   :  { %v4959_v60 = vmax.f32 %v4953_v35, %v4957_v12 }
 0x5f8   :  { %v4941_v0 = vpop.f32.mrf.mxu2 }
 0x5f9   :  { %v4962_v62 = vrot.slane %v4959_v60, 6  ;;  %v4954_v6 = vpop.f32.mrf.mxu3 }
 0x5fb   :  { %v4963_v1 = vsel %vm2521_vm0, %v4958_v61, %v4962_v62 }
 0x5fc   :  { %4965 = vst [vmem:[%s8478_s8] sm:$0xf] %v4963_v1 }
 0x5fd   :  { %4974 = vsyncmov [#allocation8] }
 0x600   :  { %s4975_s24 = vpop.sfrf %4974 }
 0x601   :  { %p7447_p0 = scmp.ne.s32.totalorder %s4975_s24, 0 }
 0x603   :  { %4979 = shalt.err (%p7447_p0)  }
 0x604   :  { %4981 = vsyncmov [#allocation8 + $0x1] }
 0x607   :  { %s4982_s25 = vpop.sfrf %4981 }
 0x608   :  { %p7448_p1 = scmp.ne.s32.totalorder %s4982_s25, 0 }
 0x60a   :  { %4986 = shalt.err (%p7448_p1)  }
 0x60b   :  { %4988 = vsyncmov [#allocation8 + $0x2] }
 0x60e   :  { %s4989_s26 = vpop.sfrf %4988 }
 0x60f   :  { %p7449_p2 = scmp.ne.s32.totalorder %s4989_s26, 0 }
 0x611   :  { %4993 = shalt.err (%p7449_p2)  }
 0x612   :  { %4995 = vsyncmov [#allocation8 + $0x3] }
 0x615   :  { %s4996_s27 = vpop.sfrf %4995 }
 0x616   :  { %p7450_p3 = scmp.ne.s32.totalorder %s4996_s27, 0 }
 0x618   :  { %5000 = shalt.err (%p7450_p3)  }
 0x619   :  { %5002 = vsyncmov [#allocation8 + $0x4] }
 0x61c   :  { %s5003_s28 = vpop.sfrf %5002 }
 0x61d   :  { %p7451_p4 = scmp.ne.s32.totalorder %s5003_s28, 0 }
 0x61f   :  { %5007 = shalt.err (%p7451_p4)  }
 0x620   :  { %5009 = vsyncmov [#allocation8 + $0x5] }
 0x623   :  { %s5010_s8 = vpop.sfrf %5009 }
 0x624   :  { %p7452_p5 = scmp.ne.s32.totalorder %s5010_s8, 0 }
 0x626   :  { %5014 = shalt.err (%p7452_p5)  }

</bundles_post_ra>
